<compile_context>
chip_gen: v5e
topology: v5e:2x2
jax: 0.10.0
libtpu: 0.0.40
codegen_flags: <defaults>
</compile_context>

<pallas_src>
import functools

import numpy as np
import jax
import jax.numpy as jnp
from jax import lax
from jax.experimental import pallas as pl
from jax.experimental.pallas import tpu as pltpu

BN_EPS = 1e-5
LANE = 128


def _round_up(v: int, m: int) -> int:
    return ((v + m - 1) // m) * m


# ------------------------------ Pallas kernel ------------------------------ #

def _bottleneck_kernel(x_ref, w0_ref, b0_ref, w1_ref, b1_ref, w2_ref, b2_ref,
                       wid_ref, bid_ref, o_ref, h0pad_ref):
    """Whole bottleneck block for one batch image; intermediates stay in VMEM.

    x_ref    : (1, H, W, Cin)   activations (compute dtype)
    w*_ref   : folded conv+BN weights (compute dtype); b*_ref biases (f32)
    o_ref    : (1, H, W, Coutp)
    h0pad_ref: VMEM scratch (H+2, W+2, midp) -- zero-padded conv_0 output used as
               the 3x3 conv input (replaces the HBM im2col round trip).
    """
    _, H, W, Cin = x_ref.shape
    midp = w0_ref.shape[1]
    coutp = w2_ref.shape[1]

    xf = x_ref[...].reshape(H * W, Cin)

    # conv_0: 1x1 conv + BN + ReLU (folded into matmul + bias).
    h0 = jnp.dot(xf, w0_ref[...], preferred_element_type=jnp.float32)
    h0 = jnp.maximum(h0 + b0_ref[...], 0.0)

    # conv_1: 3x3 conv (stride=1, pad=1) + BN + ReLU as 9 shifted MXU matmuls
    # against a zero-padded VMEM scratch (padding of conv_0's *output* is zero).
    h0pad_ref[...] = jnp.zeros_like(h0pad_ref)
    h0pad_ref[pl.ds(1, H), pl.ds(1, W), :] = (
        h0.reshape(H, W, midp).astype(h0pad_ref.dtype))
    acc = jnp.zeros((H * W, midp), jnp.float32)
    for t in range(9):                      # static unroll: 9 (rows, midp)x(midp, midp) dots
        dy, dx = divmod(t, 3)
        tap = h0pad_ref[pl.ds(dy, H), pl.ds(dx, W), :].reshape(H * W, midp)
        acc = acc + jnp.dot(tap, w1_ref[t], preferred_element_type=jnp.float32)
    h1 = jnp.maximum(acc + b1_ref[...], 0.0).astype(w2_ref.dtype)

    # conv_2 (1x1 + BN, zero_bn) fused with identity 1x1 conv + BN and final ReLU:
    #   out = relu(h1 @ W2 + b2 + x @ Wid + bid)   -- no HBM residual tensor.
    main = jnp.dot(h1, w2_ref[...], preferred_element_type=jnp.float32) + b2_ref[...]
    ident = jnp.dot(xf, wid_ref[...], preferred_element_type=jnp.float32) + bid_ref[...]
    out = jnp.maximum(main + ident, 0.0)
    o_ref[...] = out.reshape(1, H, W, coutp).astype(o_ref.dtype)


# ------------------------- weight folding (host side) ----------------------- #

def fold_conv_bn(w_oihw, gamma, beta, mean, var, *, cin_pad, cout_pad,
                 dtype=jnp.bfloat16):
    """Fold conv(bias=False)+BatchNorm(eval) into matmul weight + bias.

    Weight returned as (cin_pad, cout_pad) for 1x1 convs or (9, cin_pad, cout_pad)
    for 3x3 convs ((dy,dx) outer), zero-padded on channel dims so the kernel's MXU
    shapes / stores are lane-dense.  Bias is f32, shape (1, cout_pad).
    """
    cout, cin, kh, kw = w_oihw.shape
    scale = gamma / jnp.sqrt(var + BN_EPS)
    w = jnp.transpose(w_oihw, (2, 3, 1, 0)) * scale[None, None, None, :]   # (kh,kw,cin,cout)
    bias = beta - mean * scale
    w = jnp.pad(w, ((0, 0), (0, 0), (0, cin_pad - cin), (0, cout_pad - cout)))
    bias = jnp.pad(bias, (0, cout_pad - cout))
    if kh == 1:
        w = w.reshape(cin_pad, cout_pad)
    else:
        w = w.reshape(kh * kw, cin_pad, cout_pad)
    return w.astype(dtype), bias.reshape(1, cout_pad).astype(jnp.float32)


def prepare_params(raw, in_channels, mid, out_channels, compute_dtype):
    midp = _round_up(mid, LANE)
    coutp = _round_up(out_channels, LANE)
    return {
        "conv0":   fold_conv_bn(*raw["conv0"],   cin_pad=in_channels, cout_pad=midp,
                                dtype=compute_dtype),
        "conv1":   fold_conv_bn(*raw["conv1"],   cin_pad=midp,        cout_pad=midp,
                                dtype=compute_dtype),
        "conv2":   fold_conv_bn(*raw["conv2"],   cin_pad=midp,        cout_pad=coutp,
                                dtype=compute_dtype),
        "id_conv": fold_conv_bn(*raw["id_conv"], cin_pad=in_channels, cout_pad=coutp,
                                dtype=compute_dtype),
    }


# --------------------------------- wrapper ---------------------------------- #

def bottleneck_forward(x_nchw, params, *, out_channels, compute_dtype=jnp.bfloat16):
    """Pallas implementation of BottleneckBlock.forward (stride=1, in!=out)."""
    N, Cin, H, W = x_nchw.shape
    w0, b0 = params["conv0"]
    w1, b1 = params["conv1"]
    w2, b2 = params["conv2"]
    wid, bid = params["id_conv"]
    midp = w0.shape[1]
    coutp = w2.shape[1]

    # Public interface stays NCHW (PyTorch convention); kernel works in NHWC so
    # channels sit on the lane axis.
    x_nhwc = jnp.transpose(x_nchw, (0, 2, 3, 1)).astype(compute_dtype)

    act_itemsize = jnp.dtype(compute_dtype).itemsize
    flops = 2 * N * H * W * (Cin * midp + 9 * midp * midp + midp * coutp + Cin * coutp)
    bytes_accessed = int(
        N * H * W * (Cin + coutp) * act_itemsize
        + sum(int(np.prod(a.shape)) * a.dtype.itemsize
              for a in (w0, b0, w1, b1, w2, b2, wid, bid)))

    out = pl.pallas_call(
        _bottleneck_kernel,
        out_shape=jax.ShapeDtypeStruct((N, H, W, coutp), compute_dtype),
        grid=(N,),
        in_specs=[
            pl.BlockSpec((1, H, W, Cin), lambda n: (n, 0, 0, 0)),
            # Folded weights / biases: constant index_maps -> DMA'd once, stay resident.
            pl.BlockSpec(w0.shape, lambda n: (0, 0)),
            pl.BlockSpec(b0.shape, lambda n: (0, 0)),
            pl.BlockSpec(w1.shape, lambda n: (0, 0, 0)),
            pl.BlockSpec(b1.shape, lambda n: (0, 0)),
            pl.BlockSpec(w2.shape, lambda n: (0, 0)),
            pl.BlockSpec(b2.shape, lambda n: (0, 0)),
            pl.BlockSpec(wid.shape, lambda n: (0, 0)),
            pl.BlockSpec(bid.shape, lambda n: (0, 0)),
        ],
        out_specs=pl.BlockSpec((1, H, W, coutp), lambda n: (n, 0, 0, 0)),
        scratch_shapes=[pltpu.VMEM((H + 2, W + 2, midp), compute_dtype)],
        compiler_params=pltpu.CompilerParams(dimension_semantics=("parallel",)),
        cost_estimate=pl.CostEstimate(flops=flops, transcendentals=0,
                                      bytes_accessed=bytes_accessed),
    )(x_nhwc, w0, b0, w1, b1, w2, b2, wid, bid)

    out = out[..., :out_channels].astype(x_nchw.dtype)   # drop channel pad lanes
    return jnp.transpose(out, (0, 3, 1, 2))


# --------------------------- reference (lax conv) ---------------------------- #

def _ref_conv_bn(x, w, gamma, beta, mean, var, padding, relu):
    y = lax.conv_general_dilated(
        x, w, window_strides=(1, 1), padding=[(padding, padding)] * 2,
        dimension_numbers=("NCHW", "OIHW", "NCHW"))
    scale = gamma / jnp.sqrt(var + BN_EPS)
    y = y * scale[None, :, None, None] + (beta - mean * scale)[None, :, None, None]
    return jnp.maximum(y, 0.0) if relu else y


def bottleneck_reference(x, raw):
    h = _ref_conv_bn(x, *raw["conv0"], padding=0, relu=True)
    h = _ref_conv_bn(h, *raw["conv1"], padding=1, relu=True)
    h = _ref_conv_bn(h, *raw["conv2"], padding=0, relu=False)
    ident = _ref_conv_bn(x, *raw["id_conv"], padding=0, relu=False)
    return jnp.maximum(h + ident, 0.0)


# ---------------------------------- main ------------------------------------ #

def _init_conv_bn(key, cout, cin, k, zero_bn=False):
    kw, kg, kb, km, kv = jax.random.split(key, 5)
    w = jax.random.normal(kw, (cout, cin, k, k), jnp.float32) * 0.1
    gamma = (jnp.zeros((cout,), jnp.float32) if zero_bn
             else jax.random.uniform(kg, (cout,), jnp.float32, 0.5, 1.5))
    beta = jax.random.normal(kb, (cout,), jnp.float32) * 0.1
    mean = jax.random.normal(km, (cout,), jnp.float32) * 0.1
    var = jax.random.uniform(kv, (cout,), jnp.float32, 0.5, 1.5)
    return (w, gamma, beta, mean, var)


if __name__ == "__main__":
    in_channels, out_channels, expansion = 4, 8, 4
    mid = out_channels // expansion
    N, H, W = 2, 16, 16

    key = jax.random.PRNGKey(0)
    kx, k0, k1, k2, kid = jax.random.split(key, 5)
    x = jax.random.normal(kx, (N, in_channels, H, W), jnp.float32)

    # (zero_bn, compute_dtype, tolerance).  f32 configs check structure exactly;
    # bf16 configs are the performance dtype (f32 accumulation, looser tolerance).
    configs = [
        (True,  jnp.float32,  1e-4),   # module default (zero_bn=True)
        (False, jnp.float32,  1e-4),   # non-zero conv_2 BN: exercises full main path
        (True,  jnp.bfloat16, 5e-2),
        (False, jnp.bfloat16, 5e-2),
    ]
    for zero_bn, cdt, tol in configs:
        raw = {
            "conv0": _init_conv_bn(k0, mid, in_channels, 1),
            "conv1": _init_conv_bn(k1, mid, mid, 3),
            "conv2": _init_conv_bn(k2, out_channels, mid, 1, zero_bn=zero_bn),
            "id_conv": _init_conv_bn(kid, out_channels, in_channels, 1),
        }
        params = prepare_params(raw, in_channels, mid, out_channels, cdt)
        fwd = jax.jit(functools.partial(bottleneck_forward,
                                        out_channels=out_channels,
                                        compute_dtype=cdt))
        out = jax.block_until_ready(fwd(x, params))
        ref = jax.block_until_ready(bottleneck_reference(x, raw))
        np.testing.assert_allclose(np.asarray(out), np.asarray(ref),
                                   rtol=tol, atol=tol)

    print("KERNEL_OK")
</pallas_src>

<mosaic_0001>
module attributes {stable_mosaic.version = 11 : i64} {
  func.func @_bottleneck_kernel(%arg0: i32, %arg1: memref<1x16x16x4xf32, #tpu.memory_space<vmem>>, %arg2: memref<4x128xf32, #tpu.memory_space<vmem>>, %arg3: memref<1x128xf32, #tpu.memory_space<vmem>>, %arg4: memref<9x128x128xf32, #tpu.memory_space<vmem>>, %arg5: memref<1x128xf32, #tpu.memory_space<vmem>>, %arg6: memref<128x128xf32, #tpu.memory_space<vmem>>, %arg7: memref<1x128xf32, #tpu.memory_space<vmem>>, %arg8: memref<4x128xf32, #tpu.memory_space<vmem>>, %arg9: memref<1x128xf32, #tpu.memory_space<vmem>>, %arg10: memref<1x16x16x128xf32, #tpu.memory_space<vmem>>, %arg11: memref<18x18x128xf32, #tpu.memory_space<vmem>>) attributes {dimension_semantics = [#tpu.dimension_semantics<parallel>], iteration_bounds = array<i64: 2>, scalar_prefetch = 0 : i64, scratch_operands = 1 : i64, tpu.core_type = #tpu.core_type<tc>, window_params = [{transform_indices = @transform_0, window_bounds = array<i64: 1, 16, 16, 4>}, {pipeline_mode = #tpu.pipeline_mode<synchronous>, transform_indices = @transform_1, window_bounds = array<i64: 4, 128>}, {pipeline_mode = #tpu.pipeline_mode<synchronous>, transform_indices = @transform_2, window_bounds = array<i64: 1, 128>}, {pipeline_mode = #tpu.pipeline_mode<synchronous>, transform_indices = @transform_3, window_bounds = array<i64: 9, 128, 128>}, {pipeline_mode = #tpu.pipeline_mode<synchronous>, transform_indices = @transform_4, window_bounds = array<i64: 1, 128>}, {pipeline_mode = #tpu.pipeline_mode<synchronous>, transform_indices = @transform_5, window_bounds = array<i64: 128, 128>}, {pipeline_mode = #tpu.pipeline_mode<synchronous>, transform_indices = @transform_6, window_bounds = array<i64: 1, 128>}, {pipeline_mode = #tpu.pipeline_mode<synchronous>, transform_indices = @transform_7, window_bounds = array<i64: 4, 128>}, {pipeline_mode = #tpu.pipeline_mode<synchronous>, transform_indices = @transform_8, window_bounds = array<i64: 1, 128>}, {transform_indices = @transform_9, window_bounds = array<i64: 1, 16, 16, 128>}]} {
    %c0 = arith.constant 0 : index
    %c0_0 = arith.constant 0 : index
    %c0_1 = arith.constant 0 : index
    %c0_2 = arith.constant 0 : index
    %0 = vector.load %arg1[%c0, %c0_0, %c0_1, %c0_2] : memref<1x16x16x4xf32, #tpu.memory_space<vmem>>, vector<1x16x16x4xf32>
    %1 = vector.shape_cast %0 : vector<1x16x16x4xf32> to vector<256x4xf32>
    %c0_3 = arith.constant 0 : index
    %c0_4 = arith.constant 0 : index
    %2 = vector.load %arg2[%c0_3, %c0_4] : memref<4x128xf32, #tpu.memory_space<vmem>>, vector<4x128xf32>
    %cst = arith.constant dense<0.000000e+00> : vector<256x128xf32>
    %3 = tpu.matmul %1, %2, %cst {dimension_numbers = #tpu.dot_dimension_numbers<[1], [0], [0], [1], [0, 0, 1, 1], [], []>} : vector<256x4xf32>, vector<4x128xf32>, vector<256x128xf32> -> vector<256x128xf32>
    %c0_5 = arith.constant 0 : index
    %c0_6 = arith.constant 0 : index
    %4 = vector.load %arg3[%c0_5, %c0_6] : memref<1x128xf32, #tpu.memory_space<vmem>>, vector<1x128xf32>
    %5 = vector.broadcast %4 : vector<1x128xf32> to vector<256x128xf32>
    %6 = arith.addf %3, %5 : vector<256x128xf32>
    %cst_7 = arith.constant 0.000000e+00 : f32
    %7 = vector.broadcast %cst_7 : f32 to vector<256x128xf32>
    %8 = arith.maximumf %6, %7 : vector<256x128xf32>
    %cst_8 = arith.constant 0.000000e+00 : f32
    %9 = vector.broadcast %cst_8 : f32 to vector<18x18x128xf32>
    %c0_9 = arith.constant 0 : index
    %c0_10 = arith.constant 0 : index
    %c0_11 = arith.constant 0 : index
    %10 = vector.load %arg11[%c0_9, %c0_10, %c0_11] : memref<18x18x128xf32, #tpu.memory_space<vmem>>, vector<18x18x128xf32>
    tpu.vector_store %arg11[%c0_9, %c0_10, %c0_11], %9 {strides = array<i32>} : memref<18x18x128xf32, #tpu.memory_space<vmem>>, vector<18x18x128xf32>,
    %11 = vector.shape_cast %8 : vector<256x128xf32> to vector<16x16x128xf32>
    %c1 = arith.constant 1 : index
    %c1_12 = arith.constant 1 : index
    %c0_13 = arith.constant 0 : index
    %12 = vector.load %arg11[%c1, %c1_12, %c0_13] : memref<18x18x128xf32, #tpu.memory_space<vmem>>, vector<16x16x128xf32>
    tpu.vector_store %arg11[%c1, %c1_12, %c0_13], %11 {strides = array<i32>} : memref<18x18x128xf32, #tpu.memory_space<vmem>>, vector<16x16x128xf32>,
    %cst_14 = arith.constant 0.000000e+00 : f32
    %13 = vector.broadcast %cst_14 : f32 to vector<256x128xf32>
    %c0_15 = arith.constant 0 : index
    %c0_16 = arith.constant 0 : index
    %c0_17 = arith.constant 0 : index
    %14 = vector.load %arg11[%c0_15, %c0_16, %c0_17] : memref<18x18x128xf32, #tpu.memory_space<vmem>>, vector<16x16x128xf32>
    %15 = vector.shape_cast %14 : vector<16x16x128xf32> to vector<256x128xf32>
    %c0_18 = arith.constant 0 : index
    %c0_19 = arith.constant 0 : index
    %c0_20 = arith.constant 0 : index
    %16 = vector.load %arg4[%c0_18, %c0_19, %c0_20] : memref<9x128x128xf32, #tpu.memory_space<vmem>>, vector<1x128x128xf32>
    %17 = vector.shape_cast %16 : vector<1x128x128xf32> to vector<128x128xf32>
    %cst_21 = arith.constant dense<0.000000e+00> : vector<256x128xf32>
    %18 = tpu.matmul %15, %17, %cst_21 {dimension_numbers = #tpu.dot_dimension_numbers<[1], [0], [0], [1], [0, 0, 1, 1], [], []>} : vector<256x128xf32>, vector<128x128xf32>, vector<256x128xf32> -> vector<256x128xf32>
    %19 = arith.addf %13, %18 : vector<256x128xf32>
    %c0_22 = arith.constant 0 : index
    %c1_23 = arith.constant 1 : index
    %c0_24 = arith.constant 0 : index
    %20 = vector.load %arg11[%c0_22, %c1_23, %c0_24] : memref<18x18x128xf32, #tpu.memory_space<vmem>>, vector<16x16x128xf32>
    %21 = vector.shape_cast %20 : vector<16x16x128xf32> to vector<256x128xf32>
    %c1_25 = arith.constant 1 : index
    %c0_26 = arith.constant 0 : index
    %c0_27 = arith.constant 0 : index
    %22 = vector.load %arg4[%c1_25, %c0_26, %c0_27] : memref<9x128x128xf32, #tpu.memory_space<vmem>>, vector<1x128x128xf32>
    %23 = vector.shape_cast %22 : vector<1x128x128xf32> to vector<128x128xf32>
    %cst_28 = arith.constant dense<0.000000e+00> : vector<256x128xf32>
    %24 = tpu.matmul %21, %23, %cst_28 {dimension_numbers = #tpu.dot_dimension_numbers<[1], [0], [0], [1], [0, 0, 1, 1], [], []>} : vector<256x128xf32>, vector<128x128xf32>, vector<256x128xf32> -> vector<256x128xf32>
    %25 = arith.addf %19, %24 : vector<256x128xf32>
    %c0_29 = arith.constant 0 : index
    %c2 = arith.constant 2 : index
    %c0_30 = arith.constant 0 : index
    %26 = vector.load %arg11[%c0_29, %c2, %c0_30] : memref<18x18x128xf32, #tpu.memory_space<vmem>>, vector<16x16x128xf32>
    %27 = vector.shape_cast %26 : vector<16x16x128xf32> to vector<256x128xf32>
    %c2_31 = arith.constant 2 : index
    %c0_32 = arith.constant 0 : index
    %c0_33 = arith.constant 0 : index
    %28 = vector.load %arg4[%c2_31, %c0_32, %c0_33] : memref<9x128x128xf32, #tpu.memory_space<vmem>>, vector<1x128x128xf32>
    %29 = vector.shape_cast %28 : vector<1x128x128xf32> to vector<128x128xf32>
    %cst_34 = arith.constant dense<0.000000e+00> : vector<256x128xf32>
    %30 = tpu.matmul %27, %29, %cst_34 {dimension_numbers = #tpu.dot_dimension_numbers<[1], [0], [0], [1], [0, 0, 1, 1], [], []>} : vector<256x128xf32>, vector<128x128xf32>, vector<256x128xf32> -> vector<256x128xf32>
    %31 = arith.addf %25, %30 : vector<256x128xf32>
    %c1_35 = arith.constant 1 : index
    %c0_36 = arith.constant 0 : index
    %c0_37 = arith.constant 0 : index
    %32 = vector.load %arg11[%c1_35, %c0_36, %c0_37] : memref<18x18x128xf32, #tpu.memory_space<vmem>>, vector<16x16x128xf32>
    %33 = vector.shape_cast %32 : vector<16x16x128xf32> to vector<256x128xf32>
    %c3 = arith.constant 3 : index
    %c0_38 = arith.constant 0 : index
    %c0_39 = arith.constant 0 : index
    %34 = vector.load %arg4[%c3, %c0_38, %c0_39] : memref<9x128x128xf32, #tpu.memory_space<vmem>>, vector<1x128x128xf32>
    %35 = vector.shape_cast %34 : vector<1x128x128xf32> to vector<128x128xf32>
    %cst_40 = arith.constant dense<0.000000e+00> : vector<256x128xf32>
    %36 = tpu.matmul %33, %35, %cst_40 {dimension_numbers = #tpu.dot_dimension_numbers<[1], [0], [0], [1], [0, 0, 1, 1], [], []>} : vector<256x128xf32>, vector<128x128xf32>, vector<256x128xf32> -> vector<256x128xf32>
    %37 = arith.addf %31, %36 : vector<256x128xf32>
    %c1_41 = arith.constant 1 : index
    %c1_42 = arith.constant 1 : index
    %c0_43 = arith.constant 0 : index
    %38 = vector.load %arg11[%c1_41, %c1_42, %c0_43] : memref<18x18x128xf32, #tpu.memory_space<vmem>>, vector<16x16x128xf32>
    %39 = vector.shape_cast %38 : vector<16x16x128xf32> to vector<256x128xf32>
    %c4 = arith.constant 4 : index
    %c0_44 = arith.constant 0 : index
    %c0_45 = arith.constant 0 : index
    %40 = vector.load %arg4[%c4, %c0_44, %c0_45] : memref<9x128x128xf32, #tpu.memory_space<vmem>>, vector<1x128x128xf32>
    %41 = vector.shape_cast %40 : vector<1x128x128xf32> to vector<128x128xf32>
    %cst_46 = arith.constant dense<0.000000e+00> : vector<256x128xf32>
    %42 = tpu.matmul %39, %41, %cst_46 {dimension_numbers = #tpu.dot_dimension_numbers<[1], [0], [0], [1], [0, 0, 1, 1], [], []>} : vector<256x128xf32>, vector<128x128xf32>, vector<256x128xf32> -> vector<256x128xf32>
    %43 = arith.addf %37, %42 : vector<256x128xf32>
    %c1_47 = arith.constant 1 : index
    %c2_48 = arith.constant 2 : index
    %c0_49 = arith.constant 0 : index
    %44 = vector.load %arg11[%c1_47, %c2_48, %c0_49] : memref<18x18x128xf32, #tpu.memory_space<vmem>>, vector<16x16x128xf32>
    %45 = vector.shape_cast %44 : vector<16x16x128xf32> to vector<256x128xf32>
    %c5 = arith.constant 5 : index
    %c0_50 = arith.constant 0 : index
    %c0_51 = arith.constant 0 : index
    %46 = vector.load %arg4[%c5, %c0_50, %c0_51] : memref<9x128x128xf32, #tpu.memory_space<vmem>>, vector<1x128x128xf32>
    %47 = vector.shape_cast %46 : vector<1x128x128xf32> to vector<128x128xf32>
    %cst_52 = arith.constant dense<0.000000e+00> : vector<256x128xf32>
    %48 = tpu.matmul %45, %47, %cst_52 {dimension_numbers = #tpu.dot_dimension_numbers<[1], [0], [0], [1], [0, 0, 1, 1], [], []>} : vector<256x128xf32>, vector<128x128xf32>, vector<256x128xf32> -> vector<256x128xf32>
    %49 = arith.addf %43, %48 : vector<256x128xf32>
    %c2_53 = arith.constant 2 : index
    %c0_54 = arith.constant 0 : index
    %c0_55 = arith.constant 0 : index
    %50 = vector.load %arg11[%c2_53, %c0_54, %c0_55] : memref<18x18x128xf32, #tpu.memory_space<vmem>>, vector<16x16x128xf32>
    %51 = vector.shape_cast %50 : vector<16x16x128xf32> to vector<256x128xf32>
    %c6 = arith.constant 6 : index
    %c0_56 = arith.constant 0 : index
    %c0_57 = arith.constant 0 : index
    %52 = vector.load %arg4[%c6, %c0_56, %c0_57] : memref<9x128x128xf32, #tpu.memory_space<vmem>>, vector<1x128x128xf32>
    %53 = vector.shape_cast %52 : vector<1x128x128xf32> to vector<128x128xf32>
    %cst_58 = arith.constant dense<0.000000e+00> : vector<256x128xf32>
    %54 = tpu.matmul %51, %53, %cst_58 {dimension_numbers = #tpu.dot_dimension_numbers<[1], [0], [0], [1], [0, 0, 1, 1], [], []>} : vector<256x128xf32>, vector<128x128xf32>, vector<256x128xf32> -> vector<256x128xf32>
    %55 = arith.addf %49, %54 : vector<256x128xf32>
    %c2_59 = arith.constant 2 : index
    %c1_60 = arith.constant 1 : index
    %c0_61 = arith.constant 0 : index
    %56 = vector.load %arg11[%c2_59, %c1_60, %c0_61] : memref<18x18x128xf32, #tpu.memory_space<vmem>>, vector<16x16x128xf32>
    %57 = vector.shape_cast %56 : vector<16x16x128xf32> to vector<256x128xf32>
    %c7 = arith.constant 7 : index
    %c0_62 = arith.constant 0 : index
    %c0_63 = arith.constant 0 : index
    %58 = vector.load %arg4[%c7, %c0_62, %c0_63] : memref<9x128x128xf32, #tpu.memory_space<vmem>>, vector<1x128x128xf32>
    %59 = vector.shape_cast %58 : vector<1x128x128xf32> to vector<128x128xf32>
    %cst_64 = arith.constant dense<0.000000e+00> : vector<256x128xf32>
    %60 = tpu.matmul %57, %59, %cst_64 {dimension_numbers = #tpu.dot_dimension_numbers<[1], [0], [0], [1], [0, 0, 1, 1], [], []>} : vector<256x128xf32>, vector<128x128xf32>, vector<256x128xf32> -> vector<256x128xf32>
    %61 = arith.addf %55, %60 : vector<256x128xf32>
    %c2_65 = arith.constant 2 : index
    %c2_66 = arith.constant 2 : index
    %c0_67 = arith.constant 0 : index
    %62 = vector.load %arg11[%c2_65, %c2_66, %c0_67] : memref<18x18x128xf32, #tpu.memory_space<vmem>>, vector<16x16x128xf32>
    %63 = vector.shape_cast %62 : vector<16x16x128xf32> to vector<256x128xf32>
    %c8 = arith.constant 8 : index
    %c0_68 = arith.constant 0 : index
    %c0_69 = arith.constant 0 : index
    %64 = vector.load %arg4[%c8, %c0_68, %c0_69] : memref<9x128x128xf32, #tpu.memory_space<vmem>>, vector<1x128x128xf32>
    %65 = vector.shape_cast %64 : vector<1x128x128xf32> to vector<128x128xf32>
    %cst_70 = arith.constant dense<0.000000e+00> : vector<256x128xf32>
    %66 = tpu.matmul %63, %65, %cst_70 {dimension_numbers = #tpu.dot_dimension_numbers<[1], [0], [0], [1], [0, 0, 1, 1], [], []>} : vector<256x128xf32>, vector<128x128xf32>, vector<256x128xf32> -> vector<256x128xf32>
    %67 = arith.addf %61, %66 : vector<256x128xf32>
    %c0_71 = arith.constant 0 : index
    %c0_72 = arith.constant 0 : index
    %68 = vector.load %arg5[%c0_71, %c0_72] : memref<1x128xf32, #tpu.memory_space<vmem>>, vector<1x128xf32>
    %69 = vector.broadcast %68 : vector<1x128xf32> to vector<256x128xf32>
    %70 = arith.addf %67, %69 : vector<256x128xf32>
    %cst_73 = arith.constant 0.000000e+00 : f32
    %71 = vector.broadcast %cst_73 : f32 to vector<256x128xf32>
    %72 = arith.maximumf %70, %71 : vector<256x128xf32>
    %c0_74 = arith.constant 0 : index
    %c0_75 = arith.constant 0 : index
    %73 = vector.load %arg6[%c0_74, %c0_75] : memref<128x128xf32, #tpu.memory_space<vmem>>, vector<128x128xf32>
    %cst_76 = arith.constant dense<0.000000e+00> : vector<256x128xf32>
    %74 = tpu.matmul %72, %73, %cst_76 {dimension_numbers = #tpu.dot_dimension_numbers<[1], [0], [0], [1], [0, 0, 1, 1], [], []>} : vector<256x128xf32>, vector<128x128xf32>, vector<256x128xf32> -> vector<256x128xf32>
    %c0_77 = arith.constant 0 : index
    %c0_78 = arith.constant 0 : index
    %75 = vector.load %arg7[%c0_77, %c0_78] : memref<1x128xf32, #tpu.memory_space<vmem>>, vector<1x128xf32>
    %76 = vector.broadcast %75 : vector<1x128xf32> to vector<256x128xf32>
    %77 = arith.addf %74, %76 : vector<256x128xf32>
    %c0_79 = arith.constant 0 : index
    %c0_80 = arith.constant 0 : index
    %78 = vector.load %arg8[%c0_79, %c0_80] : memref<4x128xf32, #tpu.memory_space<vmem>>, vector<4x128xf32>
    %cst_81 = arith.constant dense<0.000000e+00> : vector<256x128xf32>
    %79 = tpu.matmul %1, %78, %cst_81 {dimension_numbers = #tpu.dot_dimension_numbers<[1], [0], [0], [1], [0, 0, 1, 1], [], []>} : vector<256x4xf32>, vector<4x128xf32>, vector<256x128xf32> -> vector<256x128xf32>
    %c0_82 = arith.constant 0 : index
    %c0_83 = arith.constant 0 : index
    %80 = vector.load %arg9[%c0_82, %c0_83] : memref<1x128xf32, #tpu.memory_space<vmem>>, vector<1x128xf32>
    %81 = vector.broadcast %80 : vector<1x128xf32> to vector<256x128xf32>
    %82 = arith.addf %79, %81 : vector<256x128xf32>
    %83 = arith.addf %77, %82 : vector<256x128xf32>
    %cst_84 = arith.constant 0.000000e+00 : f32
    %84 = vector.broadcast %cst_84 : f32 to vector<256x128xf32>
    %85 = arith.maximumf %83, %84 : vector<256x128xf32>
    %86 = vector.shape_cast %85 : vector<256x128xf32> to vector<1x16x16x128xf32>
    %c0_85 = arith.constant 0 : index
    %c0_86 = arith.constant 0 : index
    %c0_87 = arith.constant 0 : index
    %c0_88 = arith.constant 0 : index
    %87 = vector.load %arg10[%c0_85, %c0_86, %c0_87, %c0_88] : memref<1x16x16x128xf32, #tpu.memory_space<vmem>>, vector<1x16x16x128xf32>
    tpu.vector_store %arg10[%c0_85, %c0_86, %c0_87, %c0_88], %86 {strides = array<i32>} : memref<1x16x16x128xf32, #tpu.memory_space<vmem>>, vector<1x16x16x128xf32>,
    return
  }
  func.func @transform_0(%arg0: i32) -> (i32, i32, i32, i32) {
    %c0_i32 = arith.constant 0 : i32
    %c0_i32_0 = arith.constant 0 : i32
    %c0_i32_1 = arith.constant 0 : i32
    %c0_i32_2 = arith.constant 0 : i32
    return %arg0, %c0_i32, %c0_i32_0, %c0_i32_1 : i32, i32, i32, i32
  }
  func.func @transform_1(%arg0: i32) -> (i32, i32) {
    %c0_i32 = arith.constant 0 : i32
    %c0_i32_0 = arith.constant 0 : i32
    %c0_i32_1 = arith.constant 0 : i32
    return %c0_i32, %c0_i32_0 : i32, i32
  }
  func.func @transform_2(%arg0: i32) -> (i32, i32) {
    %c0_i32 = arith.constant 0 : i32
    %c0_i32_0 = arith.constant 0 : i32
    %c0_i32_1 = arith.constant 0 : i32
    return %c0_i32, %c0_i32_0 : i32, i32
  }
  func.func @transform_3(%arg0: i32) -> (i32, i32, i32) {
    %c0_i32 = arith.constant 0 : i32
    %c0_i32_0 = arith.constant 0 : i32
    %c0_i32_1 = arith.constant 0 : i32
    %c0_i32_2 = arith.constant 0 : i32
    return %c0_i32, %c0_i32_0, %c0_i32_1 : i32, i32, i32
  }
  func.func @transform_4(%arg0: i32) -> (i32, i32) {
    %c0_i32 = arith.constant 0 : i32
    %c0_i32_0 = arith.constant 0 : i32
    %c0_i32_1 = arith.constant 0 : i32
    return %c0_i32, %c0_i32_0 : i32, i32
  }
  func.func @transform_5(%arg0: i32) -> (i32, i32) {
    %c0_i32 = arith.constant 0 : i32
    %c0_i32_0 = arith.constant 0 : i32
    %c0_i32_1 = arith.constant 0 : i32
    return %c0_i32, %c0_i32_0 : i32, i32
  }
  func.func @transform_6(%arg0: i32) -> (i32, i32) {
    %c0_i32 = arith.constant 0 : i32
    %c0_i32_0 = arith.constant 0 : i32
    %c0_i32_1 = arith.constant 0 : i32
    return %c0_i32, %c0_i32_0 : i32, i32
  }
  func.func @transform_7(%arg0: i32) -> (i32, i32) {
    %c0_i32 = arith.constant 0 : i32
    %c0_i32_0 = arith.constant 0 : i32
    %c0_i32_1 = arith.constant 0 : i32
    return %c0_i32, %c0_i32_0 : i32, i32
  }
  func.func @transform_8(%arg0: i32) -> (i32, i32) {
    %c0_i32 = arith.constant 0 : i32
    %c0_i32_0 = arith.constant 0 : i32
    %c0_i32_1 = arith.constant 0 : i32
    return %c0_i32, %c0_i32_0 : i32, i32
  }
  func.func @transform_9(%arg0: i32) -> (i32, i32, i32, i32) {
    %c0_i32 = arith.constant 0 : i32
    %c0_i32_0 = arith.constant 0 : i32
    %c0_i32_1 = arith.constant 0 : i32
    %c0_i32_2 = arith.constant 0 : i32
    return %arg0, %c0_i32, %c0_i32_0, %c0_i32_1 : i32, i32, i32, i32
  }
}

</mosaic_0001>

<bundles_post_ra>
// kernel: bottleneck_forward.1
= control target key start
LH: loop header
LB: loop body
LE: loop exit
PB: predicated region body
PF: predicated region fallthrough
CT: control target
= control target key end

     0   :  { %14 = vsyncpa [#allocation4], 0  ;;  %s3140_s30 = smov 0   ;;  %s4350_s0 = inlined_call_operand.vmem [shape: f32[2,16,16,4], index: 0, kind: input, shape index: {}]   ;;  %s4351_s1 = inlined_call_operand.vmem [shape: f32[4,128], index: 1, kind: input, shape index: {}]   ;;  %s4352_s2 = inlined_call_operand.vmem [shape: f32[1,128], index: 2, kind: input, shape index: {}]   ;;  %s4353_s3 = inlined_call_operand.hbm [shape: f32[9,128,128], index: 3, kind: input, shape index: {}]   ;;  %s4354_s4 = inlined_call_operand.vmem [shape: f32[1,128], index: 4, kind: input, shape index: {}]   ;;  %s4355_s5 = inlined_call_operand.vmem [shape: f32[128,128], index: 5, kind: input, shape index: {}]   ;;  %s4356_s6 = inlined_call_operand.vmem [shape: f32[1,128], index: 6, kind: input, shape index: {}]   ;;  %s4357_s7 = inlined_call_operand.vmem [shape: f32[4,128], index: 7, kind: input, shape index: {}]   ;;  %s4358_s8 = inlined_call_operand.vmem [shape: f32[1,128], index: 8, kind: input, shape index: {}]   ;;  %s4359_s9 = inlined_call_operand.vmem [shape: f32[2,16,16,128], index: 9, kind: output, shape index: {}]  }
   0x1 LB: > { %s262_s12 = sshll.u32 %s4353_s3, 4  ;;  %s2887_s13 = sadd.s32 4294967295, %s3084_s30   ;;  %s3084_s30 = sphi %s3140_s30, %s20_s30   ;;  %s263_s12 = int_to_ptr.hbm [resolvable:$true] %s262_s12 }
   0x2   : > { %p2889_p0 = scmp.ge.s32.totalorder %s3084_s30, 1  ;;  %p245_p1 = scmp.lt.s32.totalorder %s3084_s30, 3 }
   0x3   : > { %p2992_p2 = scmp.eq.s32.totalorder %s2887_s13, 0  ;;  %s3086_s14 = smov [#allocation3]  }
   0x4   : > { %p246_p3 = pnand %p2889_p0, %p245_p1  ;;  %s264_s15 = sshll.u32 %s3086_s14, 4  ;;  %s265_s15 = int_to_ptr.vmem [resolvable:$true] %s264_s15 }
   0x5   : > { %s3087_s16 = smov 128   ;;  %s3088_s17 = smov 8  }
   0x6   : > { %p2988_p4 = pneg %p246_p3  ;;  %303 = sbr.rel (%p246_p3) target bundleno = 1305 (0x519), region = 56 }
   0x8   : > { %p2989_p5 = pnand %p2992_p2, %p2988_p4 }
   0xa   : > { %2991 = dma.hbm_to_vmem [thread:$0]  (!%p2989_p5), %s263_s12, 18432, %s265_s15, [#allocation4], %s3087_s16, %s3087_s16, %s3088_s17  }
   0xb   : > { %3079 = dma.done.wait (%p2992_p2), [#allocation4], 18432  }
   0xc   : > { %3081 = vsyncadd (%p2992_p2), [#allocation4], 4294948864  ;;  %p340_p6 = scmp.lt.s32.totalorder %s2887_s13, 1  ;;  %vm484_vm0 = vcmask 1043456   ;;  %vm387_vm1 = vcmask 31744   ;;  %v1285_v2 = vld [vmem:[#allocation3 + $0x1f8] sm:$0xff] }
   0xd   : > { %v382_v0 = vld [vmem:[%s4351_s1] sm:$0xf]  ;;  %v1283_v4 = vld [vmem:[#allocation3 + $0x1e8] sm:$0xff]  ;;  %v1282_v7 = vld [vmem:[#allocation3 + $0x1e0] sm:$0xff]  ;;  %v3089_v45 = vmov 0.0  }
   0xe   : > { %s4474_s13 = smov (!%p340_p6, %s2887_s13), 1  ;;  %2898 = vmatpush.msk.msra.mxu0 %vm484_vm0, %v382_v0  ;;  %v1284_v3 = vld [vmem:[#allocation3 + $0x1f0] sm:$0xff]  ;;  %v1281_v10 = vld [vmem:[#allocation3 + $0x1d8] sm:$0xff]  ;;  %v814_v17 = vld [vmem:[#allocation3 + $0xe8] sm:$0xff]  ;;  %633 = vst [vmem:[#allocation2] sm:$0xff] %v3089_v45 }
   0xf   : > { %s2966_s18 = sshll.u32 %s4474_s13, 8  ;;  %v1280_v13 = vld [vmem:[#allocation3 + $0x1d0] sm:$0xff]  ;;  %v816_v14 = vld [vmem:[#allocation3 + $0xf8] sm:$0xff]  ;;  %v813_v20 = vld [vmem:[#allocation3 + $0xe0] sm:$0xff]  ;;  %634 = vst [vmem:[#allocation2 + $0x8] sm:$0xff] %v3089_v45 }
  0x10   : > { %s3159_s21 = scalar_lea.vmem %s4350_s0, %s2966_s18  ;;  %1286 = vmatpush.msrb.mxu0 %v1285_v2  ;;  %817 = vmatpush.msra.mxu1 %v816_v14  ;;  %v815_v15 = vld [vmem:[#allocation3 + $0xf0] sm:$0xff]  ;;  %v767_v18 = vld [vmem:[#allocation3 + $0x78] sm:$0xff]  ;;  %v765_v21 = vld [vmem:[#allocation3 + $0x68] sm:$0xff]  ;;  %635 = vst [vmem:[#allocation2 + $0x10] sm:$0x3] %v3089_v45  ;;  %s4218_s17 = scalar_lea.vmem %s4359_s9, %s2966_s18 }
  0x11   : > { %v350_v1 = vld [vmem:[%s3159_s21] sm:$0xff]  ;;  %v351_v5 = vld [vmem:[%s3159_s21 + $0x8] sm:$0xff]  ;;  %v352_v6 = vld [vmem:[%s3159_s21 + $0x10] sm:$0xff]  ;;  %930 = vmatpush.msra.mxu2 %v767_v18  ;;  %636 = vst [vmem:[#allocation2 + $0x18] sm:$0xff] %v3089_v45 }
  0x12   : > { %2899 = vmatmul.msk.f32.vlgmr.msra.gmra.mxu0 %vm387_vm1, %v350_v1  ;;  %v353_v8 = vld [vmem:[%s3159_s21 + $0x18] sm:$0xff]  ;;  %v354_v9 = vld [vmem:[%s3159_s21 + $0x20] sm:$0xff]  ;;  %v355_v11 = vld [vmem:[%s3159_s21 + $0x28] sm:$0xff]  ;;  %818 = vmatpush.msra.mxu1 %v815_v15  ;;  %637 = vst [vmem:[#allocation2 + $0x20] sm:$0xff] %v3089_v45 }
  0x13   : > { %1287 = vmatpush.msrb.mxu0 %v1284_v3  ;;  %v356_v12 = vld [vmem:[%s3159_s21 + $0x30] sm:$0xff]  ;;  %v357_v16 = vld [vmem:[%s3159_s21 + $0x38] sm:$0xff]  ;;  %v766_v19 = vld [vmem:[#allocation3 + $0x70] sm:$0xff]  ;;  %638 = vst [vmem:[#allocation2 + $0x28] sm:$0x3] %v3089_v45 }
  0x14   : > { %819 = vmatpush.msra.mxu1 %v814_v17  ;;  %v812_v22 = vld [vmem:[#allocation3 + $0xd8] sm:$0xff]  ;;  %931 = vmatpush.msra.mxu2 %v766_v19  ;;  %v811_v23 = vld [vmem:[#allocation3 + $0xd0] sm:$0xff]  ;;  %v810_v25 = vld [vmem:[#allocation3 + $0xc8] sm:$0xff]  ;;  %639 = vst [vmem:[#allocation2 + $0x30] sm:$0xff] %v3089_v45 }
  0x15   : > { %1288 = vmatpush.msrb.mxu0 %v1283_v4  ;;  %v358_v24 = vld [vmem:[%s3159_s21 + $0x40] sm:$0xff]  ;;  %v1279_v26 = vld [vmem:[#allocation3 + $0x1c8] sm:$0xff]  ;;  %v764_v27 = vld [vmem:[#allocation3 + $0x60] sm:$0xff]  ;;  %640 = vst [vmem:[#allocation2 + $0x38] sm:$0xff] %v3089_v45 }
  0x16   : > { %820 = vmatpush.msra.mxu1 %v813_v20  ;;  %932 = vmatpush.msra.mxu2 %v765_v21  ;;  %v763_v28 = vld [vmem:[#allocation3 + $0x58] sm:$0xff]  ;;  %v1090_v30 = vld [vmem:[#allocation3 + $0x170] sm:$0xff]  ;;  %v1089_v32 = vld [vmem:[#allocation3 + $0x168] sm:$0xff]  ;;  %641 = vst [vmem:[#allocation2 + $0x40] sm:$0x3] %v3089_v45 }
  0x17   : > { %1289 = vmatpush.msrb.mxu0 %v1282_v7  ;;  %v1091_v29 = vld [vmem:[#allocation3 + $0x178] sm:$0xff]  ;;  %v762_v31 = vld [vmem:[#allocation3 + $0x50] sm:$0xff]  ;;  %v809_v33 = vld [vmem:[#allocation3 + $0xc0] sm:$0xff]  ;;  %642 = vst [vmem:[#allocation2 + $0x48] sm:$0xff] %v3089_v45 }
  0x18   : > { %821 = vmatpush.msra.mxu1 %v812_v22  ;;  %933 = vmatpush.msra.mxu2 %v764_v27  ;;  %v808_v34 = vld [vmem:[#allocation3 + $0xb8] sm:$0xff]  ;;  %v761_v35 = vld [vmem:[#allocation3 + $0x48] sm:$0xff]  ;;  %v807_v37 = vld [vmem:[#allocation3 + $0xb0] sm:$0xff]  ;;  %643 = vst [vmem:[#allocation2 + $0x50] sm:$0xff] %v3089_v45 }
  0x19   : > { %1290 = vmatpush.msrb.mxu0 %v1281_v10  ;;  %1092 = vmatpush.msra.mxu3 %v1091_v29  ;;  %v359_v36 = vld [vmem:[%s3159_s21 + $0x48] sm:$0xff]  ;;  %v806_v38 = vld [vmem:[#allocation3 + $0xa8] sm:$0xff]  ;;  %v760_v39 = vld [vmem:[#allocation3 + $0x40] sm:$0xff]  ;;  %644 = vst [vmem:[#allocation2 + $0x58] sm:$0x3] %v3089_v45 }
  0x1a   : > { %2900 = vmatmul.msk.f32.gmra.mxu0 %vm387_vm1, %v351_v5  ;;  %822 = vmatpush.msra.mxu1 %v811_v23  ;;  %v1088_v40 = vld [vmem:[#allocation3 + $0x160] sm:$0xff]  ;;  %v759_v41 = vld [vmem:[#allocation3 + $0x38] sm:$0xff]  ;;  %v758_v43 = vld [vmem:[#allocation3 + $0x30] sm:$0xff]  ;;  %645 = vst [vmem:[#allocation2 + $0x60] sm:$0xff] %v3089_v45 }
  0x1b   : > { %1291 = vmatpush.msrb.mxu0 %v1280_v13  ;;  %934 = vmatpush.msra.mxu2 %v763_v28  ;;  %v1087_v42 = vld [vmem:[#allocation3 + $0x158] sm:$0xff]  ;;  %v1086_v44 = vld [vmem:[#allocation3 + $0x150] sm:$0xff]  ;;  %v805_v46 = vld [vmem:[#allocation3 + $0xa0] sm:$0xff]  ;;  %646 = vst [vmem:[#allocation2 + $0x68] sm:$0xff] %v3089_v45 }
  0x1c   : > { %823 = vmatpush.msra.mxu1 %v810_v25  ;;  %1093 = vmatpush.msra.mxu3 %v1090_v30  ;;  %v804_v47 = vld [vmem:[#allocation3 + $0x98] sm:$0xff]  ;;  %v757_v48 = vld [vmem:[#allocation3 + $0x28] sm:$0xff]  ;;  %v360_v50 = vld [vmem:[%s3159_s21 + $0x50] sm:$0xff]  ;;  %647 = vst [vmem:[#allocation2 + $0x70] sm:$0x3] %v3089_v45 }
  0x1d   : > { %1292 = vmatpush.msrb.mxu0 %v1279_v26  ;;  %935 = vmatpush.msra.mxu2 %v762_v31  ;;  %v1085_v49 = vld [vmem:[#allocation3 + $0x148] sm:$0xff]  ;;  %v803_v51 = vld [vmem:[#allocation3 + $0x90] sm:$0xff]  ;;  %v1278_v53 = vld [vmem:[#allocation3 + $0x1c0] sm:$0xff]  ;;  %648 = vst [vmem:[#allocation2 + $0x78] sm:$0xff] %v3089_v45 }
  0x1e   : > { %824 = vmatpush.msra.mxu1 %v809_v33  ;;  %1094 = vmatpush.msra.mxu3 %v1089_v32  ;;  %v802_v52 = vld [vmem:[#allocation3 + $0x88] sm:$0xff]  ;;  %v756_v54 = vld [vmem:[#allocation3 + $0x20] sm:$0xff]  ;;  %v755_v56 = vld [vmem:[#allocation3 + $0x18] sm:$0xff]  ;;  %649 = vst [vmem:[#allocation2 + $0x80] sm:$0xff] %v3089_v45 }
  0x1f   : > { %936 = vmatpush.msra.mxu2 %v761_v35  ;;  %v1084_v55 = vld [vmem:[#allocation3 + $0x140] sm:$0xff]  ;;  %1293 = vmatpush.msrb.mxu0 %v1278_v53  ;;  %v1083_v57 = vld [vmem:[#allocation3 + $0x138] sm:$0xff]  ;;  %v754_v58 = vld [vmem:[#allocation3 + $0x10] sm:$0xff]  ;;  %650 = vst [vmem:[#allocation2 + $0x88] sm:$0x3] %v3089_v45 }
  0x20   : > { %825 = vmatpush.msra.mxu1 %v808_v34  ;;  %1095 = vmatpush.msra.mxu3 %v1088_v40  ;;  %v1082_v59 = vld [vmem:[#allocation3 + $0x130] sm:$0xff]  ;;  %v801_v60 = vld [vmem:[#allocation3 + $0x80] sm:$0xff]  ;;  %v753_v62 = vld [vmem:[#allocation3 + $0x8] sm:$0xff]  ;;  %651 = vst [vmem:[#allocation2 + $0x90] sm:$0xff] %v3089_v45 }
  0x21   : > { %937 = vmatpush.msra.mxu2 %v760_v39  ;;  %v768_v61 = vld [vmem:[#allocation2 + $0x1] sm:$0xff]  ;;  %v361_v63 = vld [vmem:[%s3159_s21 + $0x58] sm:$0xff]  ;;  %v752_v1 = vld [vmem:[#allocation3] sm:$0xff]  ;;  %652 = vst [vmem:[#allocation2 + $0x98] sm:$0xff] %v3089_v45 }
  0x22   : > { %2901 = vmatmul.msk.f32.gmra.mxu0 %vm387_vm1, %v352_v6  ;;  %826 = vmatpush.msra.mxu1 %v807_v37  ;;  %v1081_v0 = vld [vmem:[#allocation3 + $0x128] sm:$0xff]  ;;  %v1080_v2 = vld [vmem:[#allocation3 + $0x120] sm:$0xff]  ;;  %v1079_v3 = vld [vmem:[#allocation3 + $0x118] sm:$0xff]  ;;  %653 = vst [vmem:[#allocation2 + $0xa0] sm:$0x3] %v3089_v45 }
  0x23   : > { %938 = vmatpush.msra.mxu2 %v759_v41  ;;  %1096 = vmatpush.msra.mxu3 %v1087_v42  ;;  %v769_v4 = vld [vmem:[#allocation2 + $0x9] sm:$0xff]  ;;  %v1078_v5 = vld [vmem:[#allocation3 + $0x110] sm:$0xff]  ;;  %v1077_v7 = vld [vmem:[#allocation3 + $0x108] sm:$0xff]  ;;  %654 = vst [vmem:[#allocation2 + $0xa8] sm:$0xff] %v3089_v45 }
  0x24   : > { %827 = vmatpush.msra.mxu1 %v806_v38  ;;  %v362_v6 = vld [vmem:[%s3159_s21 + $0x60] sm:$0xff]  ;;  %655 = vst [vmem:[#allocation2 + $0xb0] sm:$0xff] %v3089_v45  ;;  %v1277_v10 = vld [vmem:[#allocation3 + $0x1b8] sm:$0xff]  ;;  %v364_v13 = vld [vmem:[%s3159_s21 + $0x70] sm:$0xff] }
  0x25   : > { %939 = vmatpush.msra.mxu2 %v758_v43  ;;  %1097 = vmatpush.msra.mxu3 %v1086_v44  ;;  %656 = vst [vmem:[#allocation2 + $0xb8] sm:$0x3] %v3089_v45  ;;  %v1276_v14 = vld [vmem:[#allocation3 + $0x1b0] sm:$0xff]  ;;  %v365_v15 = vld [vmem:[%s3159_s21 + $0x78] sm:$0xff]  ;;  %v367_v23 = vld [vmem:[%s3159_s21 + $0x88] sm:$0xff] }
  0x26   : > { %828 = vmatpush.msra.mxu1 %v805_v46  ;;  %657 = vst [vmem:[#allocation2 + $0xc0] sm:$0xff] %v3089_v45  ;;  %1294 = vmatpush.msrb.mxu0 %v1277_v10  ;;  %v366_v18 = vld [vmem:[%s3159_s21 + $0x80] sm:$0xff]  ;;  %v1275_v21 = vld [vmem:[#allocation3 + $0x1a8] sm:$0xff]  ;;  %v368_v28 = vld [vmem:[%s3159_s21 + $0x90] sm:$0xff] }
  0x27   : > { %940 = vmatpush.msra.mxu2 %v757_v48  ;;  %1098 = vmatpush.msra.mxu3 %v1085_v49  ;;  %658 = vst [vmem:[#allocation2 + $0xc8] sm:$0xff] %v3089_v45  ;;  %v1274_v33 = vld [vmem:[#allocation3 + $0x1a0] sm:$0xff]  ;;  %v369_v35 = vld [vmem:[%s3159_s21 + $0x98] sm:$0xff]  ;;  %v370_v41 = vld [vmem:[%s3159_s21 + $0xa0] sm:$0xff] }
  0x28   : > { %829 = vmatpush.msra.mxu1 %v804_v47  ;;  %659 = vst [vmem:[#allocation2 + $0xd0] sm:$0x3] %v3089_v45  ;;  %1295 = vmatpush.msrb.mxu0 %v1276_v14  ;;  %v1273_v46 = vld [vmem:[#allocation3 + $0x198] sm:$0xff] }
  0x29   : > { %941 = vmatpush.msra.mxu2 %v756_v54  ;;  %1099 = vmatpush.msra.mxu3 %v1084_v55  ;;  %660 = vst [vmem:[#allocation2 + $0xd8] sm:$0xff] %v3089_v45  ;;  %v371_v48 = vld [vmem:[%s3159_s21 + $0xa8] sm:$0xff]  ;;  %v372_v54 = vld [vmem:[%s3159_s21 + $0xb0] sm:$0xff] }
  0x2a   : > { %2902 = vmatmul.msk.f32.gmra.mxu0 %vm387_vm1, %v353_v8  ;;  %830 = vmatpush.msra.mxu1 %v803_v51  ;;  %v1076_v8 = vld [vmem:[#allocation3 + $0x100] sm:$0xff]  ;;  %661 = vst [vmem:[#allocation2 + $0xe0] sm:$0xff] %v3089_v45  ;;  %v375_v10 = vld [vmem:[%s3159_s21 + $0xc8] sm:$0xff] }
  0x2b   : > { %942 = vmatpush.msra.mxu2 %v755_v56  ;;  %1100 = vmatpush.msra.mxu3 %v1083_v57  ;;  %662 = vst [vmem:[#allocation2 + $0xe8] sm:$0x3] %v3089_v45 }
  0x2c   : > { %831 = vmatpush.msra.mxu1 %v802_v52  ;;  %663 = vst [vmem:[#allocation2 + $0xf0] sm:$0xff] %v3089_v45  ;;  %1296 = vmatpush.msrb.mxu0 %v1275_v21 }
  0x2d   : > { %943 = vmatpush.msra.mxu2 %v754_v58  ;;  %1101 = vmatpush.msra.mxu3 %v1082_v59  ;;  %664 = vst [vmem:[#allocation2 + $0xf8] sm:$0xff] %v3089_v45  ;;  %v1272_v59 = vld [vmem:[#allocation3 + $0x190] sm:$0xff] }
  0x2e   : > { %832 = vmatpush.msra.mxu1 %v801_v60  ;;  %665 = vst [vmem:[#allocation2 + $0x100] sm:$0x3] %v3089_v45  ;;  %1297 = vmatpush.msrb.mxu0 %v1274_v33 }
  0x2f   : > { %833 = vmatmul.f32.vlgmr.msra.gmra.mxu1 %v768_v61  ;;  %944 = vmatpush.msra.mxu2 %v753_v62  ;;  %666 = vst [vmem:[#allocation2 + $0x108] sm:$0xff] %v3089_v45  ;;  %v373_v61 = vld [vmem:[%s3159_s21 + $0xb8] sm:$0xff] }
  0x30   : > { %1102 = vmatpush.msra.mxu3 %v1081_v0  ;;  %667 = vst [vmem:[#allocation2 + $0x110] sm:$0xff] %v3089_v45  ;;  %1298 = vmatpush.msrb.mxu0 %v1273_v46  ;;  %v1479_v46 = vld [vmem:[#allocation3 + $0x278] sm:$0xff] }
  0x31   : > { %945 = vmatpush.msra.mxu2 %v752_v1  ;;  %668 = vst [vmem:[#allocation2 + $0x118] sm:$0x3] %v3089_v45  ;;  %1480 = vmatpush.msrb.mxu1 %v1479_v46 }
  0x32   : > { %2903 = vmatmul.msk.f32.gmra.mxu0 %vm387_vm1, %v354_v9  ;;  %1103 = vmatpush.msra.mxu3 %v1080_v2  ;;  %v1043_v9 = vld [vmem:[#allocation2 + $0x2] sm:$0xff]  ;;  %669 = vst [vmem:[#allocation2 + $0x120] sm:$0xff] %v3089_v45 }
  0x33   : > { %946 = vmatmul.f32.vlgmr.msra.gmra.mxu2 %v3089_v45  ;;  %670 = vst [vmem:[#allocation2 + $0x128] sm:$0xff] %v3089_v45  ;;  %1299 = vmatpush.msrb.mxu0 %v1272_v59 }
  0x34   : > { %1104 = vmatpush.msra.mxu3 %v1079_v3  ;;  %671 = vst [vmem:[#allocation2 + $0x130] sm:$0x3] %v3089_v45  ;;  %v374_v3 = vld [vmem:[%s3159_s21 + $0xc0] sm:$0xff] }
  0x35   : > { %672 = vst [vmem:[#allocation2 + $0x138] sm:$0xff] %v3089_v45 }
  0x36   : > { %1105 = vmatpush.msra.mxu3 %v1078_v5  ;;  %673 = vst [vmem:[#allocation2 + $0x140] sm:$0xff] %v3089_v45 }
  0x37   : > { %836 = vmatmul.f32.gmra.mxu1 %v769_v4  ;;  %674 = vst [vmem:[#allocation2 + $0x148] sm:$0x3] %v3089_v45 }
  0x38   : > { %1106 = vmatpush.msra.mxu3 %v1077_v7  ;;  %675 = vst [vmem:[#allocation2 + $0x150] sm:$0xff] %v3089_v45 }
  0x39   : > { %676 = vst [vmem:[#allocation2 + $0x158] sm:$0xff] %v3089_v45 }
  0x3a   : > { %2904 = vmatmul.msk.f32.gmra.mxu0 %vm387_vm1, %v355_v11  ;;  %1107 = vmatpush.msra.mxu3 %v1076_v8  ;;  %v363_v11 = vld [vmem:[%s3159_s21 + $0x68] sm:$0xff]  ;;  %677 = vst [vmem:[#allocation2 + $0x160] sm:$0x3] %v3089_v45  ;;  %v1271_v8 = vld [vmem:[#allocation3 + $0x188] sm:$0xff] }
  0x3b   : > { %949 = vmatmul.f32.gmra.mxu2 %v3089_v45  ;;  %1108 = vmatmul.f32.vlgmr.msra.gmra.mxu3 %v1043_v9  ;;  %678 = vst [vmem:[#allocation2 + $0x168] sm:$0xff] %v3089_v45 }
  0x3c   : > { %679 = vst [vmem:[#allocation2 + $0x170] sm:$0xff] %v3089_v45  ;;  %1300 = vmatpush.msrb.mxu0 %v1271_v8 }
  0x3d   : > { %680 = vst [vmem:[#allocation2 + $0x178] sm:$0x3] %v3089_v45 }
  0x3e   : > { %681 = vst [vmem:[#allocation2 + $0x180] sm:$0xff] %v3089_v45 }
  0x3f   : > { %682 = vst [vmem:[#allocation2 + $0x188] sm:$0xff] %v3089_v45 }
  0x40   : > { %683 = vst [vmem:[#allocation2 + $0x190] sm:$0x3] %v3089_v45 }
  0x41   : > { %684 = vst [vmem:[#allocation2 + $0x198] sm:$0xff] %v3089_v45 }
  0x42   : > { %2905 = vmatmul.msk.f32.gmra.mxu0 %vm387_vm1, %v356_v12  ;;  %v1044_v12 = vld [vmem:[#allocation2 + $0xa] sm:$0xff]  ;;  %685 = vst [vmem:[#allocation2 + $0x1a0] sm:$0xff] %v3089_v45 }
  0x43   : > { %1111 = vmatmul.f32.gmra.mxu3 %v1044_v12  ;;  %686 = vst [vmem:[#allocation2 + $0x1a8] sm:$0x3] %v3089_v45 }
  0x4a   : > { %2906 = vmatmul.msk.f32.gmra.mxu0 %vm387_vm1, %v357_v16  ;;  %v3251_v16 = vld [vmem:[%s4352_s2] ss:$0 sm:$0xff] }
  0x52   : > { %2907 = vmatmul.msk.f32.gmra.mxu0 %vm387_vm1, %v358_v24 }
  0x5a   : > { %2908 = vmatmul.msk.f32.gmra.mxu0 %vm387_vm1, %v359_v36 }
  0x62   : > { %2909 = vmatmul.msk.f32.gmra.mxu0 %vm387_vm1, %v360_v50 }
  0x6a   : > { %2910 = vmatmul.msk.f32.gmra.mxu0 %vm387_vm1, %v361_v63 }
  0x72   : > { %2911 = vmatmul.msk.f32.gmra.mxu0 %vm387_vm1, %v362_v6 }
  0x7a   : > { %2912 = vmatmul.msk.f32.gmra.mxu0 %vm387_vm1, %v363_v11 }
  0x82   : > { %2913 = vmatmul.msk.f32.gmra.mxu0 %vm387_vm1, %v364_v13 }
  0x8a   : > { %2914 = vmatmul.msk.f32.gmra.mxu0 %vm387_vm1, %v365_v15 }
  0x8f   : > { %v505_v17 = vpop.f32.mrf.mxu0 }
  0x90   : > { %v506_v19 = vadd.f32 %v3251_v16, %v505_v17  ;;  %v376_v17 = vld [vmem:[%s3159_s21 + $0xd0] sm:$0xff] }
  0x92   : > { %v601_v20 = vmax.f32 %v506_v19, 0.0  ;;  %2915 = vmatmul.msk.f32.gmra.mxu0 %vm387_vm1, %v366_v18 }
  0x94   : > { %688 = vst [vmem:[#allocation2 + $0x19] sm:$0xff] %v601_v20  ;;  %839 = vmatmul.f32.gmra.mxu1 %v601_v20 }
  0x97   : > { %v508_v22 = vpop.f32.mrf.mxu0 }
  0x98   : > { %v509_v24 = vadd.f32 %v3251_v16, %v508_v22  ;;  %v1270_v22 = vld [vmem:[#allocation3 + $0x180] sm:$0xff] }
  0x99   : > { %1301 = vmatpush.msrb.mxu0 %v1270_v22 }
  0x9a   : > { %v602_v25 = vmax.f32 %v509_v24, 0.0  ;;  %2916 = vmatmul.msk.f32.gmra.mxu0 %vm387_vm1, %v367_v23  ;;  %v377_v24 = vld [vmem:[%s3159_s21 + $0xd8] sm:$0xff] }
  0x9b   : > { %v3264_v26 = vld [vmem:[#allocation2 + $0x18] sm:$0xff] }
  0x9c   : > { %689 = vst [vmem:[#allocation2 + $0x21] sm:$0xff] %v602_v25  ;;  %952 = vmatmul.f32.gmra.mxu2 %v3264_v26  ;;  %842 = vmatmul.f32.gmra.mxu1 %v602_v25 }
  0x9f   : > { %v511_v27 = vpop.f32.mrf.mxu0 }
  0xa0   : > { %v512_v29 = vadd.f32 %v3251_v16, %v511_v27 }
  0xa2   : > { %v603_v30 = vmax.f32 %v512_v29, 0.0  ;;  %2917 = vmatmul.msk.f32.gmra.mxu0 %vm387_vm1, %v368_v28 }
  0xa3   : > { %v3270_v31 = vld [vmem:[#allocation2 + $0x20] sm:$0xff] }
  0xa4   : > { %v1045_v32 = vld [vmem:[#allocation2 + $0x1a] sm:$0xff]  ;;  %690 = vst [vmem:[#allocation2 + $0x31] sm:$0xff] %v603_v30  ;;  %955 = vmatmul.f32.gmra.mxu2 %v3270_v31  ;;  %845 = vmatmul.f32.gmra.mxu1 %v603_v30  ;;  %v1046_v39 = vld [vmem:[#allocation2 + $0x22] sm:$0xff] }
  0xa5   : > { %1114 = vmatmul.f32.gmra.mxu3 %v1045_v32  ;;  %v378_v32 = vld [vmem:[%s3159_s21 + $0xe0] sm:$0xff] }
  0xa7   : > { %v514_v34 = vpop.f32.mrf.mxu0 }
  0xa8   : > { %v515_v36 = vadd.f32 %v3251_v16, %v514_v34 }
  0xaa   : > { %v604_v37 = vmax.f32 %v515_v36, 0.0  ;;  %2918 = vmatmul.msk.f32.gmra.mxu0 %vm387_vm1, %v369_v35 }
  0xab   : > { %v3276_v38 = vld [vmem:[#allocation2 + $0x30] sm:$0xff] }
  0xac   : > { %691 = vst [vmem:[#allocation2 + $0x39] sm:$0xff] %v604_v37  ;;  %958 = vmatmul.f32.gmra.mxu2 %v3276_v38  ;;  %848 = vmatmul.f32.gmra.mxu1 %v604_v37  ;;  %v2062_v37 = vld [vmem:[#allocation3 + $0x3f8] sm:$0xff] }
  0xad   : > { %1117 = vmatmul.f32.gmra.mxu3 %v1046_v39  ;;  %2063 = vmatpush.msra.mxu0 %v2062_v37 }
  0xaf   : > { %v517_v40 = vpop.f32.mrf.mxu0 }
  0xb0   : > { %v518_v42 = vadd.f32 %v3251_v16, %v517_v40  ;;  %v379_v40 = vld [vmem:[%s3159_s21 + $0xe8] sm:$0xff] }
  0xb2   : > { %v605_v43 = vmax.f32 %v518_v42, 0.0  ;;  %2919 = vmatmul.msk.f32.gmra.mxu0 %vm387_vm1, %v370_v41 }
  0xb3   : > { %v3282_v44 = vld [vmem:[#allocation2 + $0x38] sm:$0xff] }
  0xb4   : > { %v1047_v45 = vld [vmem:[#allocation2 + $0x32] sm:$0xff]  ;;  %692 = vst [vmem:[#allocation2 + $0x49] sm:$0xff] %v605_v43  ;;  %961 = vmatmul.f32.gmra.mxu2 %v3282_v44  ;;  %851 = vmatmul.f32.gmra.mxu1 %v605_v43  ;;  %v1048_v52 = vld [vmem:[#allocation2 + $0x3a] sm:$0xff] }
  0xb5   : > { %1120 = vmatmul.f32.gmra.mxu3 %v1047_v45 }
  0xb7   : > { %v520_v47 = vpop.f32.mrf.mxu0 }
  0xb8   : > { %v521_v49 = vadd.f32 %v3251_v16, %v520_v47  ;;  %v3339_v47 = vpop.f32.mrf.mxu1 }
  0xba   : > { %v606_v50 = vmax.f32 %v521_v49, 0.0  ;;  %2920 = vmatmul.msk.f32.gmra.mxu0 %vm387_vm1, %v371_v48  ;;  %v380_v49 = vld [vmem:[%s3159_s21 + $0xf0] sm:$0xff] }
  0xbb   : > { %v3288_v51 = vld [vmem:[#allocation2 + $0x48] sm:$0xff] }
  0xbc   : > { %693 = vst [vmem:[#allocation2 + $0x51] sm:$0xff] %v606_v50  ;;  %964 = vmatmul.f32.gmra.mxu2 %v3288_v51  ;;  %854 = vmatmul.f32.gmra.mxu1 %v606_v50 }
  0xbd   : > { %1123 = vmatmul.f32.gmra.mxu3 %v1048_v52 }
  0xbf   : > { %v523_v53 = vpop.f32.mrf.mxu0 }
  0xc0   : > { %v524_v55 = vadd.f32 %v3251_v16, %v523_v53  ;;  %v3348_v59 = vpop.f32.mrf.mxu1 }
  0xc2   : > { %v607_v56 = vmax.f32 %v524_v55, 0.0  ;;  %2921 = vmatmul.msk.f32.gmra.mxu0 %vm387_vm1, %v372_v54  ;;  %v2061_v55 = vld [vmem:[#allocation3 + $0x3f0] sm:$0xff] }
  0xc3   : > { %v3294_v57 = vld [vmem:[#allocation2 + $0x50] sm:$0xff]  ;;  %2064 = vmatpush.msra.mxu0 %v2061_v55 }
  0xc4   : > { %v1049_v58 = vld [vmem:[#allocation2 + $0x4a] sm:$0xff]  ;;  %694 = vst [vmem:[#allocation2 + $0x61] sm:$0xff] %v607_v56  ;;  %967 = vmatmul.f32.gmra.mxu2 %v3294_v57  ;;  %857 = vmatmul.f32.gmra.mxu1 %v607_v56  ;;  %v1050_v1 = vld [vmem:[#allocation2 + $0x52] sm:$0xff] }
  0xc5   : > { %1126 = vmatmul.f32.gmra.mxu3 %v1049_v58  ;;  %v381_v58 = vld [vmem:[%s3159_s21 + $0xf8] sm:$0xff] }
  0xc7   : > { %v526_v60 = vpop.f32.mrf.mxu0 }
  0xc8   : > { %v527_v62 = vadd.f32 %v3251_v16, %v526_v60 }
  0xca   : > { %v608_v63 = vmax.f32 %v527_v62, 0.0  ;;  %2922 = vmatmul.msk.f32.gmra.mxu0 %vm387_vm1, %v373_v61 }
  0xcb   : > { %v3300_v0 = vld [vmem:[#allocation2 + $0x60] sm:$0xff] }
  0xcc   : > { %695 = vst [vmem:[#allocation2 + $0x69] sm:$0xff] %v608_v63  ;;  %970 = vmatmul.f32.gmra.mxu2 %v3300_v0  ;;  %860 = vmatmul.f32.gmra.mxu1 %v608_v63 }
  0xcd   : > { %1129 = vmatmul.f32.gmra.mxu3 %v1050_v1  ;;  %v3354_v1 = vpop.f32.mrf.mxu2 }
  0xcf   : > { %v529_v2 = vpop.f32.mrf.mxu0 }
  0xd0   : > { %v530_v4 = vadd.f32 %v3251_v16, %v529_v2  ;;  %v1478_v2 = vld [vmem:[#allocation3 + $0x270] sm:$0xff] }
  0xd1   : > { %1481 = vmatpush.msrb.mxu1 %v1478_v2 }
  0xd2   : > { %v609_v5 = vmax.f32 %v530_v4, 0.0  ;;  %2923 = vmatmul.msk.f32.gmra.mxu0 %vm387_vm1, %v374_v3 }
  0xd3   : > { %v3306_v6 = vld [vmem:[#allocation2 + $0x68] sm:$0xff] }
  0xd4   : > { %v1051_v7 = vld [vmem:[#allocation2 + $0x62] sm:$0xff]  ;;  %696 = vst [vmem:[#allocation2 + $0x79] sm:$0xff] %v609_v5  ;;  %973 = vmatmul.f32.gmra.mxu2 %v3306_v6  ;;  %863 = vmatmul.f32.gmra.mxu1 %v609_v5  ;;  %v1052_v14 = vld [vmem:[#allocation2 + $0x6a] sm:$0xff] }
  0xd5   : > { %1132 = vmatmul.f32.gmra.mxu3 %v1051_v7 }
  0xd7   : > { %v532_v9 = vpop.f32.mrf.mxu0 }
  0xd8   : > { %v533_v11 = vadd.f32 %v3251_v16, %v532_v9 }
  0xda   : > { %v610_v12 = vmax.f32 %v533_v11, 0.0  ;;  %2924 = vmatmul.msk.f32.gmra.mxu0 %vm387_vm1, %v375_v10  ;;  %v3362_v10 = vpop.f32.mrf.mxu3  ;;  %v2060_v11 = vld [vmem:[#allocation3 + $0x3e8] sm:$0xff] }
  0xdb   : > { %v3312_v13 = vld [vmem:[#allocation2 + $0x78] sm:$0xff]  ;;  %2065 = vmatpush.msra.mxu0 %v2060_v11 }
  0xdc   : > { %697 = vst [vmem:[#allocation2 + $0x81] sm:$0xff] %v610_v12  ;;  %976 = vmatmul.f32.gmra.mxu2 %v3312_v13  ;;  %866 = vmatmul.f32.gmra.mxu1 %v610_v12  ;;  %v3364_v12 = vpop.f32.mrf.mxu2 }
  0xdd   : > { %1135 = vmatmul.f32.gmra.mxu3 %v1052_v14 }
  0xdf   : > { %v535_v15 = vpop.f32.mrf.mxu0 }
  0xe0   : > { %v536_v18 = vadd.f32 %v3251_v16, %v535_v15 }
  0xe2   : > { %v611_v19 = vmax.f32 %v536_v18, 0.0  ;;  %2925 = vmatmul.msk.f32.gmra.mxu0 %vm387_vm1, %v376_v17  ;;  %v3371_v22 = vpop.f32.mrf.mxu3 }
  0xe3   : > { %v3318_v20 = vld [vmem:[#allocation2 + $0x80] sm:$0xff] }
  0xe4   : > { %v1053_v21 = vld [vmem:[#allocation2 + $0x7a] sm:$0xff]  ;;  %698 = vst [vmem:[#allocation2 + $0x91] sm:$0xff] %v611_v19  ;;  %979 = vmatmul.f32.gmra.mxu2 %v3318_v20  ;;  %869 = vmatmul.f32.gmra.mxu1 %v611_v19  ;;  %v1054_v29 = vld [vmem:[#allocation2 + $0x82] sm:$0xff] }
  0xe5   : > { %1138 = vmatmul.f32.gmra.mxu3 %v1053_v21  ;;  %v1477_v21 = vld [vmem:[#allocation3 + $0x268] sm:$0xff] }
  0xe6   : > { %1482 = vmatpush.msrb.mxu1 %v1477_v21 }
  0xe7   : > { %v538_v23 = vpop.f32.mrf.mxu0 }
  0xe8   : > { %v539_v25 = vadd.f32 %v3251_v16, %v538_v23 }
  0xea   : > { %v612_v27 = vmax.f32 %v539_v25, 0.0  ;;  %2926 = vmatmul.msk.f32.gmra.mxu0 %vm387_vm1, %v377_v24 }
  0xeb   : > { %v3324_v28 = vld [vmem:[#allocation2 + $0x90] sm:$0xff] }
  0xec   : > { %699 = vst [vmem:[#allocation2 + $0x99] sm:$0xff] %v612_v27  ;;  %982 = vmatmul.f32.gmra.mxu2 %v3324_v28  ;;  %872 = vmatmul.f32.gmra.mxu1 %v612_v27 }
  0xed   : > { %1141 = vmatmul.f32.gmra.mxu3 %v1054_v29 }
  0xef   : > { %v541_v30 = vpop.f32.mrf.mxu0 }
  0xf0   : > { %v542_v33 = vadd.f32 %v3251_v16, %v541_v30 }
  0xf2   : > { %v613_v34 = vmax.f32 %v542_v33, 0.0  ;;  %2927 = vmatmul.msk.f32.gmra.mxu0 %vm387_vm1, %v378_v32  ;;  %v2059_v33 = vld [vmem:[#allocation3 + $0x3e0] sm:$0xff] }
  0xf3   : > { %v3330_v35 = vld [vmem:[#allocation2 + $0x98] sm:$0xff]  ;;  %2066 = vmatpush.msra.mxu0 %v2059_v33 }
  0xf4   : > { %v1055_v36 = vld [vmem:[#allocation2 + $0x92] sm:$0xff]  ;;  %700 = vst [vmem:[#allocation2 + $0xa9] sm:$0xff] %v613_v34  ;;  %985 = vmatmul.f32.gmra.mxu2 %v3330_v35  ;;  %875 = vmatmul.f32.gmra.mxu1 %v613_v34  ;;  %v1056_v45 = vld [vmem:[#allocation2 + $0x9a] sm:$0xff] }
  0xf5   : > { %1144 = vmatmul.f32.gmra.mxu3 %v1055_v36 }
  0xf7   : > { %v544_v39 = vpop.f32.mrf.mxu0 }
  0xf8   : > { %v545_v41 = vadd.f32 %v3251_v16, %v544_v39 }
  0xfa   : > { %v614_v42 = vmax.f32 %v545_v41, 0.0  ;;  %2928 = vmatmul.msk.f32.gmra.mxu0 %vm387_vm1, %v379_v40 }
  0xfb   : > { %v3336_v43 = vld [vmem:[#allocation2 + $0xa8] sm:$0xff] }
  0xfc   : > { %701 = vst [vmem:[#allocation2 + $0xb1] sm:$0xff] %v614_v42  ;;  %988 = vmatmul.f32.gmra.mxu2 %v3336_v43  ;;  %878 = vmatmul.f32.gmra.mxu1 %v614_v42 }
  0xfd   : > { %1147 = vmatmul.f32.gmra.mxu3 %v1056_v45 }
  0xff   : > { %v547_v48 = vpop.f32.mrf.mxu0 }
 0x100   : > { %v548_v50 = vadd.f32 %v3251_v16, %v547_v48  ;;  %v1476_v48 = vld [vmem:[#allocation3 + $0x260] sm:$0xff] }
 0x101   : > { %1483 = vmatpush.msrb.mxu1 %v1476_v48  ;;  %v1474_v48 = vld [vmem:[#allocation3 + $0x250] sm:$0xff] }
 0x102   : > { %v615_v52 = vmax.f32 %v548_v50, 0.0  ;;  %2929 = vmatmul.msk.f32.gmra.mxu0 %vm387_vm1, %v380_v49 }
 0x103   : > { %v3344_v53 = vld [vmem:[#allocation2 + $0xb0] sm:$0xff] }
 0x104   : > { %v1057_v54 = vld [vmem:[#allocation2 + $0xaa] sm:$0xff]  ;;  %702 = vst [vmem:[#allocation2 + $0xc1] sm:$0xff] %v615_v52  ;;  %991 = vmatmul.f32.gmra.mxu2 %v3344_v53  ;;  %881 = vmatmul.f32.gmra.mxu1 %v615_v52  ;;  %v1058_v63 = vld [vmem:[#allocation2 + $0xb2] sm:$0xff] }
 0x105   : > { %1150 = vmatmul.f32.gmra.mxu3 %v1057_v54 }
 0x107   : > { %v550_v56 = vpop.f32.mrf.mxu0 }
 0x108   : > { %v551_v60 = vadd.f32 %v3251_v16, %v550_v56 }
 0x10a   : > { %v616_v61 = vmax.f32 %v551_v60, 0.0  ;;  %2930 = vmatmul.msk.f32.gmra.mxu0 %vm387_vm1, %v381_v58 }
 0x10b   : > { %v3352_v62 = vld [vmem:[#allocation2 + $0xc0] sm:$0xff] }
 0x10c   : > { %703 = vst [vmem:[#allocation2 + $0xc9] sm:$0xff] %v616_v61  ;;  %994 = vmatmul.f32.gmra.mxu2 %v3352_v62  ;;  %884 = vmatmul.f32.gmra.mxu1 %v616_v61 }
 0x10d   : > { %1153 = vmatmul.f32.gmra.mxu3 %v1058_v63  ;;  %v2058_v63 = vld [vmem:[#allocation3 + $0x3d8] sm:$0xff] }
 0x10e   : > { %2067 = vmatpush.msra.mxu0 %v2058_v63  ;;  %v1473_v63 = vld [vmem:[#allocation3 + $0x248] sm:$0xff] }
 0x10f   : > { %v553_v3 = vpop.f32.mrf.mxu0 }
 0x110   : > { %v554_v4 = vadd.f32 %v3251_v16, %v553_v3 }
 0x111   : > { %v840_v5 = vpop.f32.mrf.mxu1 }
 0x112   : > { %v617_v7 = vmax.f32 %v554_v4, 0.0  ;;  %1302 = vmatmul.f32.vlgmr.msrb.gmra.mxu0 %v3264_v26 }
 0x113   : > { %v3359_v8 = vld [vmem:[#allocation2 + $0xc8] sm:$0xff] }
 0x114   : > { %v1059_v9 = vld [vmem:[#allocation2 + $0xc2] sm:$0xff]  ;;  %704 = vst [vmem:[#allocation2 + $0xd9] sm:$0xff] %v617_v7  ;;  %997 = vmatmul.f32.gmra.mxu2 %v3359_v8  ;;  %887 = vmatmul.f32.gmra.mxu1 %v617_v7  ;;  %v1060_v19 = vld [vmem:[#allocation2 + $0xca] sm:$0xff] }
 0x115   : > { %1156 = vmatmul.f32.gmra.mxu3 %v1059_v9 }
 0x117   : > { %v556_v14 = vpop.f32.mrf.mxu0 }
 0x118   : > { %v557_v15 = vadd.f32 %v3251_v16, %v556_v14 }
 0x119   : > { %v843_v17 = vpop.f32.mrf.mxu1 }
 0x11a   : > { %v618_v18 = vmax.f32 %v557_v15, 0.0  ;;  %1305 = vmatmul.f32.gmra.mxu0 %v3270_v31 }
 0x11b   : > { %v3368_v26 = vld [vmem:[#allocation2 + $0xd8] sm:$0xff] }
 0x11c   : > { %705 = vst [vmem:[#allocation2 + $0xe1] sm:$0xff] %v618_v18  ;;  %1000 = vmatmul.f32.gmra.mxu2 %v3368_v26  ;;  %890 = vmatmul.f32.gmra.mxu1 %v618_v18 }
 0x11d   : > { %1159 = vmatmul.f32.gmra.mxu3 %v1060_v19 }
 0x11f   : > { %v559_v23 = vpop.f32.mrf.mxu0  ;;  %v953_v24 = vpop.f32.mrf.mxu2 }
 0x120   : > { %v560_v25 = vadd.f32 %v3251_v16, %v559_v23  ;;  %v954_v27 = vadd.f32 %v953_v24, %v840_v5 }
 0x121   : > { %v846_v31 = vpop.f32.mrf.mxu1 }
 0x122   : > { %v619_v29 = vmax.f32 %v560_v25, 0.0  ;;  %1308 = vmatmul.f32.gmra.mxu0 %v3276_v38 }
 0x123   : > { %v3375_v30 = vld [vmem:[#allocation2 + $0xe0] sm:$0xff] }
 0x124   : > { %v1061_v32 = vld [vmem:[#allocation2 + $0xda] sm:$0xff]  ;;  %706 = vst [vmem:[#allocation2 + $0xf1] sm:$0xff] %v619_v29  ;;  %1003 = vmatmul.f32.gmra.mxu2 %v3375_v30  ;;  %893 = vmatmul.f32.gmra.mxu1 %v619_v29  ;;  %v1062_v46 = vld [vmem:[#allocation2 + $0xe2] sm:$0xff] }
 0x125   : > { %1162 = vmatmul.f32.gmra.mxu3 %v1061_v32  ;;  %v2057_v32 = vld [vmem:[#allocation3 + $0x3d0] sm:$0xff] }
 0x126   : > { %2068 = vmatpush.msra.mxu0 %v2057_v32 }
 0x127   : > { %v562_v34 = vpop.f32.mrf.mxu0  ;;  %v956_v36 = vpop.f32.mrf.mxu2 }
 0x128   : > { %v563_v37 = vadd.f32 %v3251_v16, %v562_v34  ;;  %v957_v39 = vadd.f32 %v956_v36, %v843_v17  ;;  %v1115_v40 = vpop.f32.mrf.mxu3  ;;  %v1475_v17 = vld [vmem:[#allocation3 + $0x258] sm:$0xff] }
 0x129   : > { %v3379_v41 = vadd.f32 %v1115_v40, %v954_v27  ;;  %v849_v42 = vpop.f32.mrf.mxu1  ;;  %1484 = vmatpush.msrb.mxu1 %v1475_v17  ;;  %v1472_v17 = vld [vmem:[#allocation3 + $0x240] sm:$0xff] }
 0x12a   : > { %v620_v38 = vmax.f32 %v563_v37, 0.0  ;;  %1311 = vmatmul.f32.gmra.mxu0 %v3282_v44 }
 0x12b   : > { %v3382_v45 = vld [vmem:[#allocation2 + $0xf0] sm:$0xff]  ;;  %1485 = vmatpush.msrb.mxu1 %v1474_v48 }
 0x12c   : > { %707 = vst [vmem:[#allocation2 + $0xf9] sm:$0xff] %v620_v38  ;;  %1006 = vmatmul.f32.gmra.mxu2 %v3382_v45  ;;  %896 = vmatmul.f32.gmra.mxu1 %v620_v38  ;;  %v1666_v48 = vld [vmem:[#allocation3 + $0x2c0] sm:$0xff] }
 0x12d   : > { %1165 = vmatmul.f32.gmra.mxu3 %v1062_v46  ;;  %1486 = vmatpush.msrb.mxu1 %v1473_v63  ;;  %v1664_v63 = vld [vmem:[#allocation3 + $0x2b0] sm:$0xff] }
 0x12f   : > { %v565_v49 = vpop.f32.mrf.mxu0  ;;  %v959_v50 = vpop.f32.mrf.mxu2  ;;  %1487 = vmatpush.msrb.mxu1 %v1472_v17 }
 0x130   : > { %v566_v52 = vadd.f32 %v3251_v16, %v565_v49  ;;  %v960_v54 = vadd.f32 %v959_v50, %v846_v31  ;;  %v1118_v55 = vpop.f32.mrf.mxu3  ;;  %v1673_v49 = vld [vmem:[#allocation3 + $0x2f8] sm:$0xff] }
 0x131   : > { %v3386_v56 = vadd.f32 %v1118_v55, %v957_v39  ;;  %v852_v58 = vpop.f32.mrf.mxu1  ;;  %1674 = vmatpush.msrb.mxu2 %v1673_v49  ;;  %v1864_v49 = vld [vmem:[#allocation3 + $0x358] sm:$0xff] }
 0x132   : > { %v621_v44 = vmax.f32 %v566_v52, 0.0  ;;  %1314 = vmatmul.f32.gmra.mxu0 %v3288_v51 }
 0x133   : > { %v3389_v60 = vld [vmem:[#allocation2 + $0xf8] sm:$0xff] }
 0x134   : > { %v1063_v61 = vld [vmem:[#allocation2 + $0xf2] sm:$0xff]  ;;  %708 = vst [vmem:[#allocation2 + $0x109] sm:$0xff] %v621_v44  ;;  %1009 = vmatmul.f32.gmra.mxu2 %v3389_v60  ;;  %899 = vmatmul.f32.gmra.mxu1 %v621_v44  ;;  %v1064_v15 = vld [vmem:[#allocation2 + $0xfa] sm:$0xff] }
 0x135   : > { %1168 = vmatmul.f32.gmra.mxu3 %v1063_v61  ;;  %v1671_v61 = vld [vmem:[#allocation3 + $0x2e8] sm:$0xff] }
 0x137   : > { %v568_v2 = vpop.f32.mrf.mxu0  ;;  %v962_v3 = vpop.f32.mrf.mxu2 }
 0x138   : > { %v569_v4 = vadd.f32 %v3251_v16, %v568_v2  ;;  %v963_v5 = vadd.f32 %v962_v3, %v849_v42  ;;  %v1121_v7 = vpop.f32.mrf.mxu3 }
 0x139   : > { %v3393_v9 = vadd.f32 %v1121_v7, %v960_v54  ;;  %v855_v11 = vpop.f32.mrf.mxu1  ;;  %v1672_v54 = vld [vmem:[#allocation3 + $0x2f0] sm:$0xff]  ;;  %v2056_v7 = vld [vmem:[#allocation3 + $0x3c8] sm:$0xff] }
 0x13a   : > { %v622_v51 = vmax.f32 %v569_v4, 0.0  ;;  %1317 = vmatmul.f32.gmra.mxu0 %v3294_v57  ;;  %1675 = vmatpush.msrb.mxu2 %v1672_v54 }
 0x13b   : > { %v3396_v14 = vld [vmem:[#allocation2 + $0x108] sm:$0xff]  ;;  %2069 = vmatpush.msra.mxu0 %v2056_v7 }
 0x13c   : > { %709 = vst [vmem:[#allocation2 + $0x111] sm:$0xff] %v622_v51  ;;  %1012 = vmatmul.f32.gmra.mxu2 %v3396_v14  ;;  %902 = vmatmul.f32.gmra.mxu1 %v622_v51  ;;  %v1670_v51 = vld [vmem:[#allocation3 + $0x2e0] sm:$0xff] }
 0x13d   : > { %1171 = vmatmul.f32.gmra.mxu3 %v1064_v15  ;;  %1676 = vmatpush.msrb.mxu2 %v1671_v61  ;;  %v1868_v15 = vld [vmem:[#allocation3 + $0x378] sm:$0xff] }
 0x13e   : > { %1869 = vmatpush.msrb.mxu3 %v1868_v15 }
 0x13f   : > { %v571_v18 = vpop.f32.mrf.mxu0  ;;  %v965_v19 = vpop.f32.mrf.mxu2  ;;  %1677 = vmatpush.msrb.mxu2 %v1670_v51 }
 0x140   : > { %v572_v21 = vadd.f32 %v3251_v16, %v571_v18  ;;  %v966_v23 = vadd.f32 %v965_v19, %v852_v58  ;;  %v1124_v24 = vpop.f32.mrf.mxu3 }
 0x141   : > { %v3400_v25 = vadd.f32 %v1124_v24, %v963_v5  ;;  %v858_v27 = vpop.f32.mrf.mxu1 }
 0x142   : > { %v623_v57 = vmax.f32 %v572_v21, 0.0  ;;  %1320 = vmatmul.f32.gmra.mxu0 %v3300_v0  ;;  %v1668_v21 = vld [vmem:[#allocation3 + $0x2d0] sm:$0xff] }
 0x143   : > { %v3403_v29 = vld [vmem:[#allocation2 + $0x110] sm:$0xff] }
 0x144   : > { %v1065_v31 = vld [vmem:[#allocation2 + $0x10a] sm:$0xff]  ;;  %710 = vst [vmem:[#allocation2 + $0x121] sm:$0xff] %v623_v57  ;;  %1015 = vmatmul.f32.gmra.mxu2 %v3403_v29  ;;  %905 = vmatmul.f32.gmra.mxu1 %v623_v57  ;;  %v1066_v46 = vld [vmem:[#allocation2 + $0x112] sm:$0xff] }
 0x145   : > { %1174 = vmatmul.f32.gmra.mxu3 %v1065_v31  ;;  %v1470_v31 = vld [vmem:[#allocation3 + $0x230] sm:$0xff] }
 0x147   : > { %v574_v33 = vpop.f32.mrf.mxu0  ;;  %v968_v34 = vpop.f32.mrf.mxu2 }
 0x148   : > { %v575_v36 = vadd.f32 %v3251_v16, %v574_v33  ;;  %v969_v37 = vadd.f32 %v968_v34, %v855_v11  ;;  %v1127_v39 = vpop.f32.mrf.mxu3  ;;  %v1669_v11 = vld [vmem:[#allocation3 + $0x2d8] sm:$0xff]  ;;  %v1866_v33 = vld [vmem:[#allocation3 + $0x368] sm:$0xff] }
 0x149   : > { %v3407_v40 = vadd.f32 %v1127_v39, %v966_v23  ;;  %v861_v38 = vpop.f32.mrf.mxu1  ;;  %v1867_v23 = vld [vmem:[#allocation3 + $0x370] sm:$0xff]  ;;  %1678 = vmatpush.msrb.mxu2 %v1669_v11  ;;  %v1667_v39 = vld [vmem:[#allocation3 + $0x2c8] sm:$0xff] }
 0x14a   : > { %v624_v0 = vmax.f32 %v575_v36, 0.0  ;;  %1323 = vmatmul.f32.gmra.mxu0 %v3306_v6  ;;  %1870 = vmatpush.msrb.mxu3 %v1867_v23  ;;  %v1663_v11 = vld [vmem:[#allocation3 + $0x2a8] sm:$0xff] }
 0x14b   : > { %v3410_v42 = vld [vmem:[#allocation2 + $0x120] sm:$0xff]  ;;  %1679 = vmatpush.msrb.mxu2 %v1668_v21  ;;  %v1861_v21 = vld [vmem:[#allocation3 + $0x340] sm:$0xff]  ;;  %v1465_v23 = vld [vmem:[#allocation3 + $0x208] sm:$0xff] }
 0x14c   : > { %711 = vst [vmem:[#allocation2 + $0x129] sm:$0xff] %v624_v0  ;;  %1018 = vmatmul.f32.gmra.mxu2 %v3410_v42  ;;  %908 = vmatmul.f32.gmra.mxu1 %v624_v0 }
 0x14d   : > { %1177 = vmatmul.f32.gmra.mxu3 %v1066_v46  ;;  %v1865_v46 = vld [vmem:[#allocation3 + $0x360] sm:$0xff]  ;;  %1680 = vmatpush.msrb.mxu2 %v1667_v39 }
 0x14e   : > { %1871 = vmatpush.msrb.mxu3 %v1866_v33  ;;  %v1464_v39 = vld [vmem:[#allocation3 + $0x200] sm:$0xff] }
 0x14f   : > { %v577_v50 = vpop.f32.mrf.mxu0  ;;  %v971_v52 = vpop.f32.mrf.mxu2  ;;  %1681 = vmatpush.msrb.mxu2 %v1666_v48 }
 0x150   : > { %v578_v55 = vadd.f32 %v3251_v16, %v577_v50  ;;  %v972_v44 = vadd.f32 %v971_v52, %v858_v27  ;;  %v1130_v6 = vpop.f32.mrf.mxu3  ;;  %v1468_v50 = vld [vmem:[#allocation3 + $0x220] sm:$0xff]  ;;  %1872 = vmatpush.msrb.mxu3 %v1865_v46 }
 0x151   : > { %v3414_v58 = vadd.f32 %v1130_v6, %v969_v37  ;;  %v864_v3 = vpop.f32.mrf.mxu1 }
 0x152   : > { %v625_v2 = vmax.f32 %v578_v55, 0.0  ;;  %1326 = vmatmul.f32.gmra.mxu0 %v3312_v13  ;;  %v1471_v13 = vld [vmem:[#allocation3 + $0x238] sm:$0xff]  ;;  %v1863_v55 = vld [vmem:[#allocation3 + $0x350] sm:$0xff]  ;;  %1873 = vmatpush.msrb.mxu3 %v1864_v49 }
 0x153   : > { %v3417_v4 = vld [vmem:[#allocation2 + $0x128] sm:$0xff]  ;;  %1488 = vmatpush.msrb.mxu1 %v1471_v13  ;;  %v1862_v13 = vld [vmem:[#allocation3 + $0x348] sm:$0xff]  ;;  %v1859_v49 = vld [vmem:[#allocation3 + $0x330] sm:$0xff] }
 0x154   : > { %v1067_v5 = vld [vmem:[#allocation2 + $0x122] sm:$0xff]  ;;  %712 = vst [vmem:[#allocation2 + $0x139] sm:$0xff] %v625_v2  ;;  %1021 = vmatmul.f32.gmra.mxu2 %v3417_v4  ;;  %911 = vmatmul.f32.gmra.mxu1 %v625_v2  ;;  %v1068_v36 = vld [vmem:[#allocation2 + $0x12a] sm:$0xff] }
 0x155   : > { %1180 = vmatmul.f32.gmra.mxu3 %v1067_v5  ;;  %1489 = vmatpush.msrb.mxu1 %v1470_v31  ;;  %v1467_v2 = vld [vmem:[#allocation3 + $0x218] sm:$0xff] }
 0x156   : > { %1874 = vmatpush.msrb.mxu3 %v1863_v55  ;;  %v1857_v55 = vld [vmem:[#allocation3 + $0x320] sm:$0xff] }
 0x157   : > { %v580_v18 = vpop.f32.mrf.mxu0  ;;  %v974_v19 = vpop.f32.mrf.mxu2 }
 0x158   : > { %v581_v24 = vadd.f32 %v3251_v16, %v580_v18  ;;  %v975_v57 = vadd.f32 %v974_v19, %v861_v38  ;;  %v1133_v27 = vpop.f32.mrf.mxu3  ;;  %v1469_v38 = vld [vmem:[#allocation3 + $0x228] sm:$0xff]  ;;  %v1662_v18 = vld [vmem:[#allocation3 + $0x2a0] sm:$0xff]  ;;  %v1466_v19 = vld [vmem:[#allocation3 + $0x210] sm:$0xff]  ;;  %1875 = vmatpush.msrb.mxu3 %v1862_v13 }
 0x159   : > { %v3421_v32 = vadd.f32 %v1133_v27, %v972_v44  ;;  %v867_v37 = vpop.f32.mrf.mxu1  ;;  %1490 = vmatpush.msrb.mxu1 %v1469_v38  ;;  %v1860_v27 = vld [vmem:[#allocation3 + $0x338] sm:$0xff]  ;;  %v1855_v13 = vld [vmem:[#allocation3 + $0x310] sm:$0xff] }
 0x15a   : > { %v626_v34 = vmax.f32 %v581_v24, 0.0  ;;  %1329 = vmatmul.f32.gmra.mxu0 %v3318_v20  ;;  %v1665_v20 = vld [vmem:[#allocation3 + $0x2b8] sm:$0xff]  ;;  %1876 = vmatpush.msrb.mxu3 %v1861_v21  ;;  %v1853_v21 = vld [vmem:[#allocation3 + $0x300] sm:$0xff] }
 0x15b   : > { %v3424_v0 = vld [vmem:[#allocation2 + $0x138] sm:$0xff]  ;;  %1491 = vmatpush.msrb.mxu1 %v1468_v50  ;;  %1682 = vmatpush.msrb.mxu2 %v1665_v20 }
 0x15c   : > { %713 = vst [vmem:[#allocation2 + $0x141] sm:$0xff] %v626_v34  ;;  %1024 = vmatmul.f32.gmra.mxu2 %v3424_v0  ;;  %914 = vmatmul.f32.gmra.mxu1 %v626_v34 }
 0x15d   : > { %1183 = vmatmul.f32.gmra.mxu3 %v1068_v36  ;;  %1683 = vmatpush.msrb.mxu2 %v1664_v63  ;;  %v1660_v36 = vld [vmem:[#allocation3 + $0x290] sm:$0xff] }
 0x15e   : > { %1492 = vmatpush.msrb.mxu1 %v1467_v2  ;;  %1877 = vmatpush.msrb.mxu3 %v1860_v27  ;;  %v1856_v2 = vld [vmem:[#allocation3 + $0x318] sm:$0xff] }
 0x15f   : > { %v583_v52 = vpop.f32.mrf.mxu0  ;;  %v977_v54 = vpop.f32.mrf.mxu2  ;;  %1684 = vmatpush.msrb.mxu2 %v1663_v11 }
 0x160   : > { %v584_v44 = vadd.f32 %v3251_v16, %v583_v52  ;;  %v978_v6 = vadd.f32 %v977_v54, %v864_v3  ;;  %v1136_v61 = vpop.f32.mrf.mxu3  ;;  %v2055_v3 = vld [vmem:[#allocation3 + $0x3c0] sm:$0xff]  ;;  %1493 = vmatpush.msrb.mxu1 %v1466_v19  ;;  %v1659_v52 = vld [vmem:[#allocation3 + $0x288] sm:$0xff]  ;;  %1878 = vmatpush.msrb.mxu3 %v1859_v49 }
 0x161   : > { %v3428_v5 = vadd.f32 %v1136_v61, %v975_v57  ;;  %v870_v51 = vpop.f32.mrf.mxu1  ;;  %2070 = vmatpush.msra.mxu0 %v2055_v3  ;;  %1685 = vmatpush.msrb.mxu2 %v1662_v18  ;;  %v1658_v54 = vld [vmem:[#allocation3 + $0x280] sm:$0xff]  ;;  %v2054_v3 = vld [vmem:[#allocation3 + $0x3b8] sm:$0xff] }
 0x162   : > { %v627_v7 = vmax.f32 %v584_v44, 0.0  ;;  %1332 = vmatmul.f32.gmra.mxu0 %v3324_v28  ;;  %v1661_v28 = vld [vmem:[#allocation3 + $0x298] sm:$0xff]  ;;  %1494 = vmatpush.msrb.mxu1 %v1465_v23 }
 0x163   : > { %v3431_v15 = vld [vmem:[#allocation2 + $0x140] sm:$0xff]  ;;  %1686 = vmatpush.msrb.mxu2 %v1661_v28  ;;  %2071 = vmatpush.msra.mxu0 %v2054_v3 }
 0x164   : > { %v1069_v17 = vld [vmem:[#allocation2 + $0x13a] sm:$0xff]  ;;  %714 = vst [vmem:[#allocation2 + $0x151] sm:$0xff] %v627_v7  ;;  %1027 = vmatmul.f32.gmra.mxu2 %v3431_v15  ;;  %917 = vmatmul.f32.gmra.mxu1 %v627_v7  ;;  %v1070_v20 = vld [vmem:[#allocation2 + $0x142] sm:$0xff] }
 0x165   : > { %1186 = vmatmul.f32.gmra.mxu3 %v1069_v17  ;;  %1687 = vmatpush.msrb.mxu2 %v1660_v36 }
 0x166   : > { %1495 = vmatpush.msrb.mxu1 %v1464_v39 }
 0x167   : > { %v586_v24 = vpop.f32.mrf.mxu0  ;;  %v980_v57 = vpop.f32.mrf.mxu2  ;;  %1688 = vmatpush.msrb.mxu2 %v1659_v52 }
 0x168   : > { %v587_v31 = vadd.f32 %v3251_v16, %v586_v24  ;;  %v981_v33 = vadd.f32 %v980_v57, %v867_v37  ;;  %v1139_v34 = vpop.f32.mrf.mxu3  ;;  %v1858_v37 = vld [vmem:[#allocation3 + $0x328] sm:$0xff] }
 0x169   : > { %v3435_v46 = vadd.f32 %v1139_v34, %v978_v6  ;;  %v873_v48 = vpop.f32.mrf.mxu1  ;;  %1879 = vmatpush.msrb.mxu3 %v1858_v37  ;;  %1689 = vmatpush.msrb.mxu2 %v1658_v54  ;;  %v2053_v54 = vld [vmem:[#allocation3 + $0x3b0] sm:$0xff] }
 0x16a   : > { %v628_v38 = vmax.f32 %v587_v31, 0.0  ;;  %1335 = vmatmul.f32.gmra.mxu0 %v3330_v35 }
 0x16b   : > { %v3438_v50 = vld [vmem:[#allocation2 + $0x150] sm:$0xff]  ;;  %1880 = vmatpush.msrb.mxu3 %v1857_v55  ;;  %2072 = vmatpush.msra.mxu0 %v2053_v54  ;;  %v3484_v54 = vld [vmem:[#allocation2 + $0x39] sm:$0xff] }
 0x16c   : > { %715 = vst [vmem:[#allocation2 + $0x159] sm:$0xff] %v628_v38  ;;  %1030 = vmatmul.f32.gmra.mxu2 %v3438_v50  ;;  %920 = vmatmul.f32.gmra.mxu1 %v628_v38 }
 0x16d   : > { %1189 = vmatmul.f32.gmra.mxu3 %v1070_v20 }
 0x16e   : > { %1881 = vmatpush.msrb.mxu3 %v1856_v2 }
 0x16f   : > { %v589_v35 = vpop.f32.mrf.mxu0  ;;  %v983_v44 = vpop.f32.mrf.mxu2 }
 0x170   : > { %v590_v6 = vadd.f32 %v3251_v16, %v589_v35  ;;  %v984_v61 = vadd.f32 %v983_v44, %v870_v51  ;;  %v1142_v63 = vpop.f32.mrf.mxu3  ;;  %v1854_v51 = vld [vmem:[#allocation3 + $0x308] sm:$0xff]  ;;  %1882 = vmatpush.msrb.mxu3 %v1855_v13 }
 0x171   : > { %v3442_v7 = vadd.f32 %v1142_v63, %v981_v33  ;;  %v876_v17 = vpop.f32.mrf.mxu1  ;;  %v1431_v44 = vld [vmem:[#allocation2 + $0x19] sm:$0xff] }
 0x172   : > { %v629_v11 = vmax.f32 %v590_v6, 0.0  ;;  %1338 = vmatmul.f32.gmra.mxu0 %v3336_v43  ;;  %1883 = vmatpush.msrb.mxu3 %v1854_v51  ;;  %v1432_v51 = vld [vmem:[#allocation2 + $0x21] sm:$0xff] }
 0x173   : > { %v3445_v18 = vld [vmem:[#allocation2 + $0x158] sm:$0xff] }
 0x174   : > { %v1071_v19 = vld [vmem:[#allocation2 + $0x152] sm:$0xff]  ;;  %716 = vst [vmem:[#allocation2 + $0x169] sm:$0xff] %v629_v11  ;;  %1033 = vmatmul.f32.gmra.mxu2 %v3445_v18  ;;  %923 = vmatmul.f32.gmra.mxu1 %v629_v11  ;;  %v1072_v36 = vld [vmem:[#allocation2 + $0x15a] sm:$0xff] }
 0x175   : > { %1192 = vmatmul.f32.gmra.mxu3 %v1071_v19  ;;  %v1625_v19 = vld [vmem:[#allocation2 + $0x1a] sm:$0xff] }
 0x176   : > { %1884 = vmatpush.msrb.mxu3 %v1853_v21 }
 0x177   : > { %v592_v28 = vpop.f32.mrf.mxu0  ;;  %v986_v23 = vpop.f32.mrf.mxu2 }
 0x178   : > { %v593_v43 = vadd.f32 %v3251_v16, %v592_v28  ;;  %v987_v24 = vadd.f32 %v986_v23, %v873_v48  ;;  %v1145_v57 = vpop.f32.mrf.mxu3 }
 0x179   : > { %v3449_v27 = vadd.f32 %v1145_v57, %v984_v61  ;;  %v879_v33 = vpop.f32.mrf.mxu1  ;;  %v3010_v61 = vld [vmem:[%s4352_s2] ss:$0 sm:$0xff]  ;;  %v2052_v57 = vld [vmem:[#allocation3 + $0x3a8] sm:$0xff] }
 0x17a   : > { %v630_v31 = vmax.f32 %v593_v43, 0.0  ;;  %1341 = vmatmul.f32.gmra.mxu0 %v3344_v53 }
 0x17b   : > { %v3452_v34 = vld [vmem:[#allocation2 + $0x168] sm:$0xff]  ;;  %2073 = vmatpush.msra.mxu0 %v2052_v57  ;;  %v3506_v57 = vld [vmem:[#allocation2 + $0x51] sm:$0xff] }
 0x17c   : > { %717 = vst [vmem:[#allocation2 + $0x171] sm:$0xff] %v630_v31  ;;  %1036 = vmatmul.f32.gmra.mxu2 %v3452_v34  ;;  %926 = vmatmul.f32.gmra.mxu1 %v630_v31  ;;  %v1626_v31 = vld [vmem:[#allocation2 + $0x22] sm:$0xff] }
 0x17d   : > { %1195 = vmatmul.f32.gmra.mxu3 %v1072_v36  ;;  %v3476_v36 = vld [vmem:[#allocation2 + $0x31] sm:$0xff] }
 0x17f   : > { %v595_v39 = vpop.f32.mrf.mxu0  ;;  %v989_v38 = vpop.f32.mrf.mxu2 }
 0x180   : > { %v596_v48 = vadd.f32 %v3251_v16, %v595_v39  ;;  %v990_v49 = vadd.f32 %v989_v38, %v876_v17  ;;  %v1148_v20 = vpop.f32.mrf.mxu3 }
 0x181   : > { %v3456_v52 = vadd.f32 %v1148_v20, %v987_v24  ;;  %v882_v53 = vpop.f32.mrf.mxu1 }
 0x182   : > { %v631_v37 = vmax.f32 %v596_v48, 0.0  ;;  %1344 = vmatmul.f32.gmra.mxu0 %v3352_v62 }
 0x183   : > { %v3459_v55 = vld [vmem:[#allocation2 + $0x170] sm:$0xff] }
 0x184   : > { %v1073_v35 = vld [vmem:[#allocation2 + $0x16a] sm:$0xff]  ;;  %718 = vst [vmem:[#allocation2 + $0x181] sm:$0xff] %v631_v37  ;;  %1039 = vmatmul.f32.gmra.mxu2 %v3459_v55  ;;  %1496 = vmatmul.f32.vlgmr.msrb.gmra.mxu1 %v1431_v44  ;;  %v3468_v3 = vld [vmem:[#allocation2 + $0x172] sm:$0xff] }
 0x185   : > { %1198 = vmatmul.f32.gmra.mxu3 %v1073_v35  ;;  %v1627_v37 = vld [vmem:[#allocation2 + $0x32] sm:$0xff] }
 0x187   : > { %v598_v16 = vpop.f32.mrf.mxu0  ;;  %v992_v6 = vpop.f32.mrf.mxu2 }
 0x188   : > { %v599_v63 = vadd.f32 %v3010_v61, %v598_v16  ;;  %v993_v62 = vadd.f32 %v992_v6, %v879_v33  ;;  %v1151_v2 = vpop.f32.mrf.mxu3  ;;  %v1820_v33 = vld [vmem:[#allocation2 + $0x30] sm:$0xff] }
 0x189   : > { %v3465_v11 = vadd.f32 %v1151_v2, %v990_v49  ;;  %v885_v13 = vpop.f32.mrf.mxu1  ;;  %v1822_v2 = vld [vmem:[#allocation2 + $0x48] sm:$0xff] }
 0x18a   : > { %v632_v17 = vmax.f32 %v599_v63, 0.0  ;;  %1347 = vmatmul.f32.gmra.mxu0 %v3359_v8 }
 0x18c   : > { %719 = vst [vmem:[#allocation2 + $0x189] sm:$0xff] %v632_v17  ;;  %1690 = vmatmul.f32.vlgmr.msrb.gmra.mxu2 %v1625_v19  ;;  %1499 = vmatmul.f32.gmra.mxu1 %v1432_v51  ;;  %v3495_v17 = vld [vmem:[#allocation2 + $0x49] sm:$0xff] }
 0x18d   : > { %1201 = vmatmul.f32.gmra.mxu3 %v3468_v3 }
 0x18f   : > { %v995_v21 = vpop.f32.mrf.mxu2  ;;  %v3471_v28 = vpop.f32.mrf.mxu0 }
 0x190   : > { %v996_v23 = vadd.f32 %v995_v21, %v882_v53  ;;  %v1154_v43 = vpop.f32.mrf.mxu3  ;;  %v1821_v53 = vld [vmem:[#allocation2 + $0x38] sm:$0xff] }
 0x191   : > { %v3473_v24 = vadd.f32 %v1154_v43, %v993_v62  ;;  %v888_v8 = vpop.f32.mrf.mxu1  ;;  %v3492_v62 = vld [vmem:[#allocation2 + $0x3a] sm:$0xff]  ;;  %v3503_v43 = vld [vmem:[#allocation2 + $0x4a] sm:$0xff] }
 0x192   : > { %1350 = vmatmul.f32.gmra.mxu0 %v3368_v26  ;;  %4382 = vst [vmem:[#allocation9_spill] sm:$0xff] %v3492_v62 }
 0x193   : > { %4379 = vst [vmem:[#allocation6_spill] sm:$0xff] %v3473_v24  ;;  %v3636_v24 = vld [vmem:[#allocation2 + $0x188] sm:$0xff] }
 0x194   : > { %1693 = vmatmul.f32.gmra.mxu2 %v1626_v31  ;;  %1502 = vmatmul.f32.gmra.mxu1 %v3476_v36  ;;  %4384 = vst [vmem:[#allocation11_spill] sm:$0xff] %v3503_v43 }
 0x195   : > { %1885 = vmatmul.f32.vlgmr.msrb.gmra.mxu3 %v1820_v33 }
 0x197   : > { %v998_v39 = vpop.f32.mrf.mxu2  ;;  %v3479_v38 = vpop.f32.mrf.mxu0 }
 0x198   : > { %v999_v48 = vadd.f32 %v998_v39, %v885_v13  ;;  %v1157_v49 = vpop.f32.mrf.mxu3 }
 0x199   : > { %v3481_v20 = vadd.f32 %v1157_v49, %v996_v23  ;;  %v891_v26 = vpop.f32.mrf.mxu1 }
 0x19a   : > { %1353 = vmatmul.f32.gmra.mxu0 %v3375_v30  ;;  %v2051_v30 = vld [vmem:[#allocation3 + $0x3a0] sm:$0xff] }
 0x19b   : > { %4380 = vst [vmem:[#allocation7_spill] sm:$0xff] %v3481_v20  ;;  %2074 = vmatpush.msra.mxu0 %v2051_v30 }
 0x19c   : > { %1696 = vmatmul.f32.gmra.mxu2 %v1627_v37  ;;  %1505 = vmatmul.f32.gmra.mxu1 %v3484_v54  ;;  %v3514_v37 = vld [vmem:[#allocation2 + $0x52] sm:$0xff] }
 0x19d   : > { %1888 = vmatmul.f32.gmra.mxu3 %v1821_v53  ;;  %4386 = vst [vmem:[#allocation13_spill] sm:$0xff] %v3514_v37  ;;  %v1824_v53 = vld [vmem:[#allocation2 + $0x60] sm:$0xff] }
 0x19f   : > { %v1001_v35 = vpop.f32.mrf.mxu2  ;;  %v3487_v44 = vpop.f32.mrf.mxu0 }
 0x1a0   : > { %v1002_v16 = vadd.f32 %v1001_v35, %v888_v8  ;;  %v1160_v6 = vpop.f32.mrf.mxu3  ;;  %v1823_v8 = vld [vmem:[#allocation2 + $0x50] sm:$0xff]  ;;  %v3517_v35 = vld [vmem:[#allocation2 + $0x61] sm:$0xff] }
 0x1a1   : > { %v3489_v61 = vadd.f32 %v1160_v6, %v999_v48  ;;  %v894_v63 = vpop.f32.mrf.mxu1 }
 0x1a2   : > { %1356 = vmatmul.f32.gmra.mxu0 %v3382_v45 }
 0x1a3   : > { %4381 = vst [vmem:[#allocation8_spill] sm:$0xff] %v3489_v61 }
 0x1a4   : > { %1699 = vmatmul.f32.gmra.mxu2 %v3492_v62  ;;  %1508 = vmatmul.f32.gmra.mxu1 %v3495_v17 }
 0x1a5   : > { %1891 = vmatmul.f32.gmra.mxu3 %v1822_v2 }
 0x1a7   : > { %v1004_v13 = vpop.f32.mrf.mxu2  ;;  %v3498_v19 = vpop.f32.mrf.mxu0 }
 0x1a8   : > { %v1005_v51 = vadd.f32 %v1004_v13, %v891_v26  ;;  %v1163_v21 = vpop.f32.mrf.mxu3  ;;  %v2050_v26 = vld [vmem:[#allocation3 + $0x398] sm:$0xff] }
 0x1a9   : > { %v3500_v23 = vadd.f32 %v1163_v21, %v1002_v16  ;;  %v897_v45 = vpop.f32.mrf.mxu1  ;;  %2075 = vmatpush.msra.mxu0 %v2050_v26  ;;  %v3525_v13 = vld [vmem:[#allocation2 + $0x62] sm:$0xff] }
 0x1aa   : > { %1359 = vmatmul.f32.gmra.mxu0 %v3389_v60  ;;  %4388 = vst [vmem:[#allocation15_spill] sm:$0xff] %v3525_v13  ;;  %v3528_v21 = vld [vmem:[#allocation2 + $0x69] sm:$0xff]  ;;  %v2049_v26 = vld [vmem:[#allocation3 + $0x390] sm:$0xff] }
 0x1ab   : > { %4383 = vst [vmem:[#allocation10_spill] sm:$0xff] %v3500_v23  ;;  %2076 = vmatpush.msra.mxu0 %v2049_v26  ;;  %v1827_v26 = vld [vmem:[#allocation2 + $0x80] sm:$0xff] }
 0x1ac   : > { %1702 = vmatmul.f32.gmra.mxu2 %v3503_v43  ;;  %1511 = vmatmul.f32.gmra.mxu1 %v3506_v57  ;;  %v3626_v43 = vld [vmem:[#allocation2 + $0xca] sm:$0xff] }
 0x1ad   : > { %1894 = vmatmul.f32.gmra.mxu3 %v1823_v8  ;;  %4407 = vst [vmem:[#allocation34_spill] sm:$0xff] %v3626_v43 }
 0x1af   : > { %v1007_v31 = vpop.f32.mrf.mxu2  ;;  %v3509_v33 = vpop.f32.mrf.mxu0 }
 0x1b0   : > { %v1008_v39 = vadd.f32 %v1007_v31, %v894_v63  ;;  %v1166_v48 = vpop.f32.mrf.mxu3 }
 0x1b1   : > { %v3511_v49 = vadd.f32 %v1166_v48, %v1005_v51  ;;  %v900_v60 = vpop.f32.mrf.mxu1  ;;  %v1825_v51 = vld [vmem:[#allocation2 + $0x68] sm:$0xff] }
 0x1b2   : > { %1362 = vmatmul.f32.gmra.mxu0 %v3396_v14 }
 0x1b3   : > { %4385 = vst [vmem:[#allocation12_spill] sm:$0xff] %v3511_v49 }
 0x1b4   : > { %1705 = vmatmul.f32.gmra.mxu2 %v3514_v37  ;;  %1514 = vmatmul.f32.gmra.mxu1 %v3517_v35  ;;  %v1832_v37 = vld [vmem:[#allocation2 + $0xc0] sm:$0xff] }
 0x1b5   : > { %1897 = vmatmul.f32.gmra.mxu3 %v1824_v53  ;;  %v3536_v53 = vld [vmem:[#allocation2 + $0x6a] sm:$0xff] }
 0x1b6   : > { %4390 = vst [vmem:[#allocation17_spill] sm:$0xff] %v3536_v53 }
 0x1b7   : > { %v1010_v16 = vpop.f32.mrf.mxu2  ;;  %v3520_v6 = vpop.f32.mrf.mxu0 }
 0x1b8   : > { %v1011_v63 = vadd.f32 %v1010_v16, %v897_v45  ;;  %v1169_v30 = vpop.f32.mrf.mxu3  ;;  %v1826_v16 = vld [vmem:[#allocation2 + $0x78] sm:$0xff] }
 0x1b9   : > { %v3522_v2 = vadd.f32 %v1169_v30, %v1008_v39  ;;  %v903_v14 = vpop.f32.mrf.mxu1  ;;  %v3539_v30 = vld [vmem:[#allocation2 + $0x79] sm:$0xff] }
 0x1ba   : > { %1365 = vmatmul.f32.gmra.mxu0 %v3403_v29 }
 0x1bb   : > { %4387 = vst [vmem:[#allocation14_spill] sm:$0xff] %v3522_v2 }
 0x1bc   : > { %1708 = vmatmul.f32.gmra.mxu2 %v3525_v13  ;;  %1517 = vmatmul.f32.gmra.mxu1 %v3528_v21  ;;  %v1830_v13 = vld [vmem:[#allocation2 + $0xa8] sm:$0xff] }
 0x1bd   : > { %1900 = vmatmul.f32.gmra.mxu3 %v1825_v51 }
 0x1bf   : > { %v1013_v8 = vpop.f32.mrf.mxu2  ;;  %v3531_v31 = vpop.f32.mrf.mxu0 }
 0x1c0   : > { %v1014_v45 = vadd.f32 %v1013_v8, %v900_v60  ;;  %v1172_v48 = vpop.f32.mrf.mxu3 }
 0x1c1   : > { %v3533_v39 = vadd.f32 %v1172_v48, %v1011_v63  ;;  %v906_v29 = vpop.f32.mrf.mxu1 }
 0x1c2   : > { %1368 = vmatmul.f32.gmra.mxu0 %v3410_v42 }
 0x1c3   : > { %4389 = vst [vmem:[#allocation16_spill] sm:$0xff] %v3533_v39  ;;  %v3547_v39 = vld [vmem:[#allocation2 + $0x7a] sm:$0xff] }
 0x1c4   : > { %1711 = vmatmul.f32.gmra.mxu2 %v3536_v53  ;;  %1520 = vmatmul.f32.gmra.mxu1 %v3539_v30  ;;  %4392 = vst [vmem:[#allocation19_spill] sm:$0xff] %v3547_v39  ;;  %v1828_v53 = vld [vmem:[#allocation2 + $0x90] sm:$0xff] }
 0x1c5   : > { %1903 = vmatmul.f32.gmra.mxu3 %v1826_v16  ;;  %v3550_v16 = vld [vmem:[#allocation2 + $0x81] sm:$0xff] }
 0x1c7   : > { %v1016_v51 = vpop.f32.mrf.mxu2  ;;  %v3542_v60 = vpop.f32.mrf.mxu0 }
 0x1c8   : > { %v1017_v63 = vadd.f32 %v1016_v51, %v903_v14  ;;  %v1175_v8 = vpop.f32.mrf.mxu3 }
 0x1c9   : > { %v3544_v48 = vadd.f32 %v1175_v8, %v1014_v45  ;;  %v909_v42 = vpop.f32.mrf.mxu1  ;;  %v2048_v8 = vld [vmem:[#allocation3 + $0x388] sm:$0xff] }
 0x1ca   : > { %1371 = vmatmul.f32.gmra.mxu0 %v3417_v4 }
 0x1cb   : > { %4391 = vst [vmem:[#allocation18_spill] sm:$0xff] %v3544_v48  ;;  %v3558_v48 = vld [vmem:[#allocation2 + $0x82] sm:$0xff]  ;;  %2077 = vmatpush.msra.mxu0 %v2048_v8  ;;  %v1829_v8 = vld [vmem:[#allocation2 + $0x98] sm:$0xff] }
 0x1cc   : > { %1714 = vmatmul.f32.gmra.mxu2 %v3547_v39  ;;  %1523 = vmatmul.f32.gmra.mxu1 %v3550_v16  ;;  %4394 = vst [vmem:[#allocation21_spill] sm:$0xff] %v3558_v48 }
 0x1cd   : > { %1906 = vmatmul.f32.gmra.mxu3 %v1827_v26  ;;  %v3561_v26 = vld [vmem:[#allocation2 + $0x91] sm:$0xff] }
 0x1cf   : > { %v1019_v2 = vpop.f32.mrf.mxu2  ;;  %v3553_v49 = vpop.f32.mrf.mxu0 }
 0x1d0   : > { %v1020_v14 = vadd.f32 %v1019_v2, %v906_v29  ;;  %v1178_v51 = vpop.f32.mrf.mxu3 }
 0x1d1   : > { %v3555_v45 = vadd.f32 %v1178_v51, %v1017_v63  ;;  %v912_v4 = vpop.f32.mrf.mxu1 }
 0x1d2   : > { %1374 = vmatmul.f32.gmra.mxu0 %v3424_v0 }
 0x1d3   : > { %4393 = vst [vmem:[#allocation20_spill] sm:$0xff] %v3555_v45  ;;  %v3569_v45 = vld [vmem:[#allocation2 + $0x92] sm:$0xff] }
 0x1d4   : > { %1717 = vmatmul.f32.gmra.mxu2 %v3558_v48  ;;  %1526 = vmatmul.f32.gmra.mxu1 %v3561_v26  ;;  %4396 = vst [vmem:[#allocation23_spill] sm:$0xff] %v3569_v45 }
 0x1d5   : > { %1909 = vmatmul.f32.gmra.mxu3 %v1828_v53  ;;  %v3572_v53 = vld [vmem:[#allocation2 + $0x99] sm:$0xff] }
 0x1d7   : > { %v1022_v39 = vpop.f32.mrf.mxu2  ;;  %v3564_v2 = vpop.f32.mrf.mxu0 }
 0x1d8   : > { %v1023_v29 = vadd.f32 %v1022_v39, %v909_v42  ;;  %v1181_v63 = vpop.f32.mrf.mxu3 }
 0x1d9   : > { %v3566_v51 = vadd.f32 %v1181_v63, %v1020_v14  ;;  %v915_v0 = vpop.f32.mrf.mxu1  ;;  %v2047_v63 = vld [vmem:[#allocation3 + $0x380] sm:$0xff] }
 0x1da   : > { %1377 = vmatmul.f32.gmra.mxu0 %v3431_v15 }
 0x1db   : > { %4395 = vst [vmem:[#allocation22_spill] sm:$0xff] %v3566_v51  ;;  %v3580_v51 = vld [vmem:[#allocation2 + $0x9a] sm:$0xff]  ;;  %2078 = vmatpush.msra.mxu0 %v2047_v63  ;;  %v1831_v63 = vld [vmem:[#allocation2 + $0xb0] sm:$0xff] }
 0x1dc   : > { %1720 = vmatmul.f32.gmra.mxu2 %v3569_v45  ;;  %1529 = vmatmul.f32.gmra.mxu1 %v3572_v53  ;;  %4398 = vst [vmem:[#allocation25_spill] sm:$0xff] %v3580_v51 }
 0x1dd   : > { %1912 = vmatmul.f32.gmra.mxu3 %v1829_v8  ;;  %v3583_v8 = vld [vmem:[#allocation2 + $0xa9] sm:$0xff] }
 0x1df   : > { %v1025_v48 = vpop.f32.mrf.mxu2  ;;  %v3575_v23 = vpop.f32.mrf.mxu0 }
 0x1e0   : > { %v1026_v39 = vadd.f32 %v1025_v48, %v912_v4  ;;  %v1184_v42 = vpop.f32.mrf.mxu3 }
 0x1e1   : > { %v3577_v14 = vadd.f32 %v1184_v42, %v1023_v29  ;;  %v918_v15 = vpop.f32.mrf.mxu1 }
 0x1e2   : > { %1380 = vmatmul.f32.gmra.mxu0 %v3438_v50 }
 0x1e3   : > { %4397 = vst [vmem:[#allocation24_spill] sm:$0xff] %v3577_v14  ;;  %v3591_v14 = vld [vmem:[#allocation2 + $0xaa] sm:$0xff] }
 0x1e4   : > { %1723 = vmatmul.f32.gmra.mxu2 %v3580_v51  ;;  %1532 = vmatmul.f32.gmra.mxu1 %v3583_v8  ;;  %4400 = vst [vmem:[#allocation27_spill] sm:$0xff] %v3591_v14 }
 0x1e5   : > { %1915 = vmatmul.f32.gmra.mxu3 %v1830_v13  ;;  %v3594_v13 = vld [vmem:[#allocation2 + $0xb1] sm:$0xff] }
 0x1e7   : > { %v1028_v45 = vpop.f32.mrf.mxu2  ;;  %v3586_v48 = vpop.f32.mrf.mxu0 }
 0x1e8   : > { %v1029_v4 = vadd.f32 %v1028_v45, %v915_v0  ;;  %v1187_v29 = vpop.f32.mrf.mxu3 }
 0x1e9   : > { %v3588_v42 = vadd.f32 %v1187_v29, %v1026_v39  ;;  %v921_v50 = vpop.f32.mrf.mxu1  ;;  %v2256_v29 = vld [vmem:[#allocation3 + $0x478] sm:$0xff] }
 0x1ea   : > { %1383 = vmatmul.f32.gmra.mxu0 %v3445_v18  ;;  %2968 = vmatpush.msra.mxu1 %v2256_v29 }
 0x1eb   : > { %4399 = vst [vmem:[#allocation26_spill] sm:$0xff] %v3588_v42  ;;  %v3602_v42 = vld [vmem:[#allocation2 + $0xb2] sm:$0xff]  ;;  %2257 = vmatpush.msrb.mxu0 %v2256_v29  ;;  %v1833_v29 = vld [vmem:[#allocation2 + $0xc8] sm:$0xff] }
 0x1ec   : > { %1726 = vmatmul.f32.gmra.mxu2 %v3591_v14  ;;  %1535 = vmatmul.f32.gmra.mxu1 %v3594_v13  ;;  %4402 = vst [vmem:[#allocation29_spill] sm:$0xff] %v3602_v42  ;;  %v3613_v14 = vld [vmem:[#allocation2 + $0xc2] sm:$0xff] }
 0x1ed   : > { %1918 = vmatmul.f32.gmra.mxu3 %v1831_v63  ;;  %v3605_v63 = vld [vmem:[#allocation2 + $0xc1] sm:$0xff]  ;;  %4404 = vst [vmem:[#allocation31_spill] sm:$0xff] %v3613_v14 }
 0x1ef   : > { %v1031_v51 = vpop.f32.mrf.mxu2  ;;  %v3597_v61 = vpop.f32.mrf.mxu0 }
 0x1f0   : > { %v1032_v45 = vadd.f32 %v1031_v51, %v918_v15  ;;  %v1190_v0 = vpop.f32.mrf.mxu3 }
 0x1f1   : > { %v3599_v39 = vadd.f32 %v1190_v0, %v1029_v4  ;;  %v924_v18 = vpop.f32.mrf.mxu1 }
 0x1f2   : > { %1386 = vmatmul.f32.gmra.mxu0 %v3452_v34 }
 0x1f3   : > { %4401 = vst [vmem:[#allocation28_spill] sm:$0xff] %v3599_v39 }
 0x1f4   : > { %1729 = vmatmul.f32.gmra.mxu2 %v3602_v42  ;;  %1538 = vmatmul.f32.gmra.mxu1 %v3605_v63 }
 0x1f5   : > { %1921 = vmatmul.f32.gmra.mxu3 %v1832_v37  ;;  %v3616_v37 = vld [vmem:[#allocation2 + $0xc9] sm:$0xff] }
 0x1f7   : > { %v1034_v51 = vpop.f32.mrf.mxu2  ;;  %v3608_v15 = vpop.f32.mrf.mxu0 }
 0x1f8   : > { %v1035_v4 = vadd.f32 %v1034_v51, %v921_v50  ;;  %v1193_v0 = vpop.f32.mrf.mxu3 }
 0x1f9   : > { %v3610_v34 = vadd.f32 %v1193_v0, %v1032_v45  ;;  %v927_v39 = vpop.f32.mrf.mxu1  ;;  %v3623_v0 = vld [vmem:[#allocation2 + $0x180] sm:$0xff] }
 0x1fa   : > { %1389 = vmatmul.f32.gmra.mxu0 %v3459_v55 }
 0x1fb   : > { %4403 = vst [vmem:[#allocation30_spill] sm:$0xff] %v3610_v34  ;;  %v2255_v34 = vld [vmem:[#allocation3 + $0x470] sm:$0xff] }
 0x1fc   : > { %1732 = vmatmul.f32.gmra.mxu2 %v3613_v14  ;;  %1541 = vmatmul.f32.gmra.mxu1 %v3616_v37  ;;  %v3629_v14 = vld [vmem:[#allocation2 + $0xd9] sm:$0xff] }
 0x1fd   : > { %1924 = vmatmul.f32.gmra.mxu3 %v1833_v29  ;;  %v1834_v29 = vld [vmem:[#allocation2 + $0xd8] sm:$0xff]  ;;  %2258 = vmatpush.msrb.mxu0 %v2255_v34 }
 0x1fe   : > { %2969 = vmatpush.msra.mxu1 %v2255_v34  ;;  %v948_v34 = vadd.f32 %v3354_v1, %v3339_v47  ;;  %v2254_v1 = vld [vmem:[#allocation3 + $0x468] sm:$0xff] }
 0x1ff   : > { %v1037_v42 = vpop.f32.mrf.mxu2  ;;  %v3619_v20 = vpop.f32.mrf.mxu0  ;;  %2259 = vmatpush.msrb.mxu0 %v2254_v1 }
 0x200   : > { %4405 = vst [vmem:[#allocation32_spill] sm:$0xff] %v3619_v20  ;;  %v1038_v50 = vadd.f32 %v1037_v42, %v924_v18  ;;  %v1196_v51 = vpop.f32.mrf.mxu3  ;;  %v3644_v20 = vld [vmem:[#allocation2 + $0xe1] sm:$0xff]  ;;  %2970 = vmatpush.msra.mxu1 %v2254_v1 }
 0x201   : > { %v3621_v45 = vadd.f32 %v1196_v51, %v1035_v4  ;;  %v1497_v55 = vpop.f32.mrf.mxu1  ;;  %4411 = vst [vmem:[#allocation38_spill] sm:$0xff] %v3644_v20 }
 0x202   : > { %1392 = vmatmul.f32.gmra.mxu0 %v3623_v0 }
 0x203   : > { %4406 = vst [vmem:[#allocation33_spill] sm:$0xff] %v3621_v45 }
 0x204   : > { %1735 = vmatmul.f32.gmra.mxu2 %v3626_v43  ;;  %1544 = vmatmul.f32.gmra.mxu1 %v3629_v14  ;;  %v1835_v43 = vld [vmem:[#allocation2 + $0xe0] sm:$0xff] }
 0x205   : > { %1927 = vmatmul.f32.gmra.mxu3 %v1834_v29  ;;  %v3641_v29 = vld [vmem:[#allocation2 + $0xda] sm:$0xff] }
 0x206   : > { %4410 = vst [vmem:[#allocation37_spill] sm:$0xff] %v3641_v29 }
 0x207   : > { %v1040_v42 = vpop.f32.mrf.mxu2  ;;  %v3632_v18 = vpop.f32.mrf.mxu0 }
 0x208   : > { %4408 = vst [vmem:[#allocation35_spill] sm:$0xff] %v3632_v18  ;;  %v1041_v4 = vadd.f32 %v1040_v42, %v927_v39  ;;  %v1199_v51 = vpop.f32.mrf.mxu3  ;;  %v1205_v39 = vadd.f32 %v3362_v10, %v948_v34  ;;  %v3656_v18 = vld [vmem:[#allocation2 + $0xe2] sm:$0xff]  ;;  %v3659_v10 = vld [vmem:[#allocation2 + $0xf1] sm:$0xff] }
 0x209   : > { %v3634_v45 = vadd.f32 %v1199_v51, %v1038_v50  ;;  %v1500_v62 = vpop.f32.mrf.mxu1 }
 0x20a   : > { %1395 = vmatmul.f32.gmra.mxu0 %v3636_v24 }
 0x20b   : > { %4409 = vst [vmem:[#allocation36_spill] sm:$0xff] %v3634_v45 }
 0x20c   : > { %1738 = vmatmul.f32.gmra.mxu2 %v3641_v29  ;;  %1547 = vmatmul.f32.gmra.mxu1 %v3644_v20  ;;  %v951_v29 = vadd.f32 %v3364_v12, %v3348_v59  ;;  %v1836_v20 = vld [vmem:[#allocation2 + $0xf0] sm:$0xff] }
 0x20d   : > { %1930 = vmatmul.f32.gmra.mxu3 %v1835_v43  ;;  %v1399_v43 = vadd.f32 %v3471_v28, %v1205_v39 }
 0x20f   : > { %v3648_v50 = vpop.f32.mrf.mxu0  ;;  %v1691_v42 = vpop.f32.mrf.mxu2 }
 0x210   : > { %v1202_v51 = vpop.f32.mrf.mxu3 }
 0x211   : > { %v3650_v45 = vadd.f32 %v1202_v51, %v1041_v4  ;;  %v1503_v47 = vpop.f32.mrf.mxu1  ;;  %v1593_v4 = vadd.f32 %v1497_v55, %v1399_v43  ;;  %v1401_v55 = vadd.f32 %v3487_v44, %v3379_v41  ;;  %v2253_v44 = vld [vmem:[#allocation3 + $0x460] sm:$0xff] }
 0x212   : > { %2079 = vmatmul.f32.vlgmr.msra.gmra.mxu0 %v3476_v36  ;;  %v1206_v36 = vadd.f32 %v3371_v22, %v951_v29  ;;  %v3674_v22 = vld [vmem:[#allocation2 + $0xf9] sm:$0xff]  ;;  %2971 = vmatpush.msra.mxu1 %v2253_v44 }
 0x213   : > { %4412 = vst [vmem:[#allocation39_spill] sm:$0xff] %v3650_v45  ;;  %v1787_v34 = vadd.f32 %v1691_v42, %v1593_v4  ;;  %v1837_v45 = vld [vmem:[#allocation2 + $0xf8] sm:$0xff]  ;;  %v1595_v42 = vadd.f32 %v1503_v47, %v1401_v55  ;;  %2260 = vmatpush.msrb.mxu0 %v2253_v44  ;;  %v3687_v47 = vld [vmem:[#allocation2 + $0x109] sm:$0xff] }
 0x214   : > { %1741 = vmatmul.f32.gmra.mxu2 %v3656_v18  ;;  %1550 = vmatmul.f32.gmra.mxu1 %v3659_v10  ;;  %v1400_v1 = vadd.f32 %v3479_v38, %v1206_v36 }
 0x215   : > { %1933 = vmatmul.f32.gmra.mxu3 %v1836_v20  ;;  %v3669_v20 = vld [vmem:[#allocation2 + $0xf2] sm:$0xff] }
 0x216   : > { %v1594_v29 = vadd.f32 %v1500_v62, %v1400_v1  ;;  %v1402_v62 = vadd.f32 %v3498_v19, %v3386_v56  ;;  %v1839_v56 = vld [vmem:[#allocation2 + $0x110] sm:$0xff]  ;;  %v1403_v19 = vadd.f32 %v3509_v33, %v3393_v9  ;;  %v1840_v33 = vld [vmem:[#allocation2 + $0x120] sm:$0xff] }
 0x217   : > { %v3663_v51 = vpop.f32.mrf.mxu0  ;;  %v1694_v59 = vpop.f32.mrf.mxu2  ;;  %v3708_v9 = vld [vmem:[#allocation2 + $0x112] sm:$0xff] }
 0x218   : > { %v1886_v12 = vpop.f32.mrf.mxu3  ;;  %v1788_v43 = vadd.f32 %v1694_v59, %v1594_v29 }
 0x219   : > { %v3665_v28 = vadd.f32 %v1886_v12, %v1787_v34  ;;  %v1506_v39 = vpop.f32.mrf.mxu1  ;;  %v3682_v12 = vld [vmem:[#allocation2 + $0xfa] sm:$0xff] }
 0x21a   : > { %2082 = vmatmul.f32.gmra.mxu0 %v3484_v54  ;;  %v1596_v59 = vadd.f32 %v1506_v39, %v1402_v62  ;;  %v3700_v39 = vld [vmem:[#allocation2 + $0x111] sm:$0xff] }
 0x21b   : > { %4413 = vst [vmem:[#allocation40_spill] sm:$0xff] %v3665_v28 }
 0x21c   : > { %1744 = vmatmul.f32.gmra.mxu2 %v3669_v20  ;;  %1553 = vmatmul.f32.gmra.mxu1 %v3674_v22 }
 0x21d   : > { %1936 = vmatmul.f32.gmra.mxu3 %v1837_v45  ;;  %v1838_v45 = vld [vmem:[#allocation2 + $0x108] sm:$0xff] }
 0x21f   : > { %v3677_v54 = vpop.f32.mrf.mxu0  ;;  %v1697_v4 = vpop.f32.mrf.mxu2 }
 0x220   : > { %v1789_v38 = vadd.f32 %v1697_v4, %v1595_v42  ;;  %v1889_v36 = vpop.f32.mrf.mxu3  ;;  %v3695_v4 = vld [vmem:[#allocation2 + $0x10a] sm:$0xff] }
 0x221   : > { %v3679_v34 = vadd.f32 %v1889_v36, %v1788_v43  ;;  %v1509_v41 = vpop.f32.mrf.mxu1 }
 0x222   : > { %2085 = vmatmul.f32.gmra.mxu0 %v3495_v17  ;;  %v1597_v36 = vadd.f32 %v1509_v41, %v1403_v19  ;;  %v3713_v41 = vld [vmem:[#allocation2 + $0x121] sm:$0xff] }
 0x223   : > { %4414 = vst [vmem:[#allocation41_spill] sm:$0xff] %v3679_v34  ;;  %v2241_v34 = vld [vmem:[#allocation3 + $0x400] sm:$0xff] }
 0x224   : > { %1747 = vmatmul.f32.gmra.mxu2 %v3682_v12  ;;  %1556 = vmatmul.f32.gmra.mxu1 %v3687_v47 }
 0x225   : > { %1939 = vmatmul.f32.gmra.mxu3 %v1838_v45 }
 0x227   : > { %v3690_v1 = vpop.f32.mrf.mxu0  ;;  %v1700_v17 = vpop.f32.mrf.mxu2 }
 0x228   : > { %v1790_v55 = vadd.f32 %v1700_v17, %v1596_v59  ;;  %v1892_v29 = vpop.f32.mrf.mxu3  ;;  %v2252_v17 = vld [vmem:[#allocation3 + $0x458] sm:$0xff] }
 0x229   : > { %v3692_v42 = vadd.f32 %v1892_v29, %v1789_v38  ;;  %v1512_v43 = vpop.f32.mrf.mxu1  ;;  %2261 = vmatpush.msrb.mxu0 %v2252_v17  ;;  %2972 = vmatpush.msra.mxu1 %v2252_v17  ;;  %v1404_v29 = vadd.f32 %v3520_v6, %v3400_v25  ;;  %v3721_v17 = vld [vmem:[#allocation2 + $0x122] sm:$0xff]  ;;  %v1405_v6 = vadd.f32 %v3531_v31, %v3407_v40  ;;  %v3734_v40 = vld [vmem:[#allocation2 + $0x12a] sm:$0xff]  ;;  %v1842_v31 = vld [vmem:[#allocation2 + $0x138] sm:$0xff] }
 0x22a   : > { %2088 = vmatmul.f32.gmra.mxu0 %v3506_v57  ;;  %v1841_v25 = vld [vmem:[#allocation2 + $0x128] sm:$0xff] }
 0x22b   : > { %4415 = vst [vmem:[#allocation42_spill] sm:$0xff] %v3692_v42 }
 0x22c   : > { %1750 = vmatmul.f32.gmra.mxu2 %v3695_v4  ;;  %1559 = vmatmul.f32.gmra.mxu1 %v3700_v39 }
 0x22d   : > { %1942 = vmatmul.f32.gmra.mxu3 %v1839_v56 }
 0x22f   : > { %v3703_v44 = vpop.f32.mrf.mxu0  ;;  %v1703_v38 = vpop.f32.mrf.mxu2 }
 0x230   : > { %v1791_v45 = vadd.f32 %v1703_v38, %v1597_v36  ;;  %v1895_v57 = vpop.f32.mrf.mxu3 }
 0x231   : > { %v3705_v62 = vadd.f32 %v1895_v57, %v1790_v55  ;;  %v1515_v59 = vpop.f32.mrf.mxu1  ;;  %v1598_v55 = vadd.f32 %v1512_v43, %v1404_v29  ;;  %v3726_v43 = vld [vmem:[#allocation2 + $0x129] sm:$0xff] }
 0x232   : > { %2091 = vmatmul.f32.gmra.mxu0 %v3517_v35 }
 0x233   : > { %4416 = vst [vmem:[#allocation43_spill] sm:$0xff] %v3705_v62 }
 0x234   : > { %1753 = vmatmul.f32.gmra.mxu2 %v3708_v9  ;;  %1562 = vmatmul.f32.gmra.mxu1 %v3713_v41 }
 0x235   : > { %1945 = vmatmul.f32.gmra.mxu3 %v1840_v33  ;;  %v1599_v33 = vadd.f32 %v1515_v59, %v1405_v6  ;;  %v3739_v59 = vld [vmem:[#allocation2 + $0x139] sm:$0xff] }
 0x237   : > { %v3716_v56 = vpop.f32.mrf.mxu0  ;;  %v1706_v35 = vpop.f32.mrf.mxu2 }
 0x238   : > { %v1792_v19 = vadd.f32 %v1706_v35, %v1598_v55  ;;  %v1898_v36 = vpop.f32.mrf.mxu3 }
 0x239   : > { %v3718_v38 = vadd.f32 %v1898_v36, %v1791_v45  ;;  %v1518_v57 = vpop.f32.mrf.mxu1 }
 0x23a   : > { %2094 = vmatmul.f32.gmra.mxu0 %v3528_v21 }
 0x23b   : > { %4417 = vst [vmem:[#allocation44_spill] sm:$0xff] %v3718_v38  ;;  %v2251_v38 = vld [vmem:[#allocation3 + $0x450] sm:$0xff] }
 0x23c   : > { %1756 = vmatmul.f32.gmra.mxu2 %v3721_v17  ;;  %1565 = vmatmul.f32.gmra.mxu1 %v3726_v43 }
 0x23d   : > { %1948 = vmatmul.f32.gmra.mxu3 %v1841_v25  ;;  %2262 = vmatpush.msrb.mxu0 %v2251_v38  ;;  %v1406_v25 = vadd.f32 %v3542_v60, %v3414_v58  ;;  %v1843_v58 = vld [vmem:[#allocation2 + $0x140] sm:$0xff] }
 0x23e   : > { %2973 = vmatpush.msra.mxu1 %v2251_v38  ;;  %v3750_v60 = vld [vmem:[#allocation2 + $0x141] sm:$0xff] }
 0x23f   : > { %v3729_v29 = vpop.f32.mrf.mxu0  ;;  %v1709_v45 = vpop.f32.mrf.mxu2 }
 0x240   : > { %v1793_v55 = vadd.f32 %v1709_v45, %v1599_v33  ;;  %v1901_v21 = vpop.f32.mrf.mxu3 }
 0x241   : > { %v3731_v35 = vadd.f32 %v1901_v21, %v1792_v19  ;;  %v1521_v36 = vpop.f32.mrf.mxu1  ;;  %v1600_v19 = vadd.f32 %v1518_v57, %v1406_v25 }
 0x242   : > { %2097 = vmatmul.f32.gmra.mxu0 %v3539_v30 }
 0x243   : > { %4418 = vst [vmem:[#allocation45_spill] sm:$0xff] %v3731_v35  ;;  %v3747_v35 = vld [vmem:[#allocation2 + $0x13a] sm:$0xff] }
 0x244   : > { %1759 = vmatmul.f32.gmra.mxu2 %v3734_v40  ;;  %1568 = vmatmul.f32.gmra.mxu1 %v3739_v59 }
 0x245   : > { %1951 = vmatmul.f32.gmra.mxu3 %v1842_v31 }
 0x247   : > { %v3742_v6 = vpop.f32.mrf.mxu0  ;;  %v1712_v30 = vpop.f32.mrf.mxu2 }
 0x248   : > { %v1794_v33 = vadd.f32 %v1712_v30, %v1600_v19  ;;  %v1904_v45 = vpop.f32.mrf.mxu3  ;;  %v1407_v30 = vadd.f32 %v3553_v49, %v3421_v32  ;;  %v2248_v49 = vld [vmem:[#allocation3 + $0x438] sm:$0xff] }
 0x249   : > { %v3744_v21 = vadd.f32 %v1904_v45, %v1793_v55  ;;  %v1524_v38 = vpop.f32.mrf.mxu1  ;;  %v2250_v55 = vld [vmem:[#allocation3 + $0x448] sm:$0xff]  ;;  %v3760_v45 = vld [vmem:[#allocation2 + $0x142] sm:$0xff] }
 0x24a   : > { %2100 = vmatmul.f32.gmra.mxu0 %v3550_v16  ;;  %2974 = vmatpush.msra.mxu1 %v2250_v55  ;;  %v1601_v62 = vadd.f32 %v1521_v36, %v1407_v30  ;;  %v1408_v36 = vadd.f32 %v3564_v2, %v3428_v5  ;;  %v3773_v30 = vld [vmem:[#allocation2 + $0x152] sm:$0xff] }
 0x24b   : > { %4419 = vst [vmem:[#allocation46_spill] sm:$0xff] %v3744_v21  ;;  %2263 = vmatpush.msrb.mxu0 %v2250_v55  ;;  %v3763_v21 = vld [vmem:[#allocation2 + $0x151] sm:$0xff] }
 0x24c   : > { %1762 = vmatmul.f32.gmra.mxu2 %v3747_v35  ;;  %1571 = vmatmul.f32.gmra.mxu1 %v3750_v60  ;;  %v2245_v2 = vld [vmem:[#allocation3 + $0x420] sm:$0xff] }
 0x24d   : > { %1954 = vmatmul.f32.gmra.mxu3 %v1843_v58  ;;  %v1844_v58 = vld [vmem:[#allocation2 + $0x150] sm:$0xff] }
 0x24f   : > { %v3753_v57 = vpop.f32.mrf.mxu0  ;;  %v1715_v31 = vpop.f32.mrf.mxu2 }
 0x250   : > { %v1907_v25 = vpop.f32.mrf.mxu3 }
 0x251   : > { %v3755_v19 = vadd.f32 %v1907_v25, %v1794_v33  ;;  %v1527_v16 = vpop.f32.mrf.mxu1  ;;  %v1795_v33 = vadd.f32 %v1715_v31, %v1601_v62  ;;  %v1845_v62 = vld [vmem:[#allocation2 + $0x158] sm:$0xff]  ;;  %v2247_v31 = vld [vmem:[#allocation3 + $0x430] sm:$0xff] }
 0x252   : > { %2103 = vmatmul.f32.gmra.mxu0 %v3561_v26 }
 0x253   : > { %4420 = vst [vmem:[#allocation47_spill] sm:$0xff] %v3755_v19  ;;  %v2249_v19 = vld [vmem:[#allocation3 + $0x440] sm:$0xff] }
 0x254   : > { %1765 = vmatmul.f32.gmra.mxu2 %v3760_v45  ;;  %1574 = vmatmul.f32.gmra.mxu1 %v3763_v21 }
 0x255   : > { %1957 = vmatmul.f32.gmra.mxu3 %v1844_v58  ;;  %2975 = vmatpush.msra.mxu1 %v2249_v19  ;;  %v3776_v58 = vld [vmem:[#allocation2 + $0x159] sm:$0xff] }
 0x256   : > { %2264 = vmatpush.msrb.mxu0 %v2249_v19  ;;  %v2246_v19 = vld [vmem:[#allocation3 + $0x428] sm:$0xff] }
 0x257   : > { %v3766_v26 = vpop.f32.mrf.mxu0  ;;  %v1718_v25 = vpop.f32.mrf.mxu2  ;;  %2976 = vmatpush.msra.mxu1 %v2248_v49 }
 0x258   : > { %v1910_v42 = vpop.f32.mrf.mxu3  ;;  %2265 = vmatpush.msrb.mxu0 %v2248_v49 }
 0x259   : > { %v3768_v32 = vadd.f32 %v1910_v42, %v1795_v33  ;;  %v1530_v55 = vpop.f32.mrf.mxu1  ;;  %v1602_v42 = vadd.f32 %v1524_v38, %v1408_v36  ;;  %2977 = vmatpush.msra.mxu1 %v2247_v31  ;;  %v2244_v38 = vld [vmem:[#allocation3 + $0x418] sm:$0xff]  ;;  %v1409_v36 = vadd.f32 %v3575_v23, %v3435_v46 }
 0x25a   : > { %2106 = vmatmul.f32.gmra.mxu0 %v3572_v53 }
 0x25b   : > { %4421 = vst [vmem:[#allocation48_spill] sm:$0xff] %v3768_v32  ;;  %2266 = vmatpush.msrb.mxu0 %v2247_v31  ;;  %v1796_v53 = vadd.f32 %v1718_v25, %v1602_v42  ;;  %2978 = vmatpush.msra.mxu1 %v2246_v19  ;;  %v3786_v31 = vld [vmem:[#allocation2 + $0x15a] sm:$0xff]  ;;  %v1846_v25 = vld [vmem:[#allocation2 + $0x168] sm:$0xff] }
 0x25c   : > { %1768 = vmatmul.f32.gmra.mxu2 %v3773_v30  ;;  %1577 = vmatmul.f32.gmra.mxu1 %v3776_v58  ;;  %4422 = vst [vmem:[#allocation49_spill] sm:$0xff] %v3786_v31  ;;  %v3789_v42 = vld [vmem:[#allocation2 + $0x169] sm:$0xff] }
 0x25d   : > { %1960 = vmatmul.f32.gmra.mxu3 %v1845_v62  ;;  %2267 = vmatpush.msrb.mxu0 %v2246_v19  ;;  %v1603_v19 = vadd.f32 %v1527_v16, %v1409_v36  ;;  %v1410_v16 = vadd.f32 %v3586_v48, %v3442_v7  ;;  %v3802_v36 = vld [vmem:[#allocation2 + $0x171] sm:$0xff] }
 0x25e   : > { %2979 = vmatpush.msra.mxu1 %v2245_v2  ;;  %v2485_v48 = vld [vmem:[%s4355_s5 + $0x78] sm:$0xff] }
 0x25f   : > { %v3779_v33 = vpop.f32.mrf.mxu0  ;;  %v1721_v5 = vpop.f32.mrf.mxu2  ;;  %2268 = vmatpush.msrb.mxu0 %v2245_v2  ;;  %2490 = vmatpush.msra.mxu2 %v2485_v48 }
 0x260   : > { %v1913_v32 = vpop.f32.mrf.mxu3  ;;  %2980 = vmatpush.msra.mxu1 %v2244_v38 }
 0x261   : > { %v3781_v49 = vadd.f32 %v1913_v32, %v1796_v53  ;;  %v1533_v62 = vpop.f32.mrf.mxu1  ;;  %2269 = vmatpush.msrb.mxu0 %v2244_v38  ;;  %v2243_v32 = vld [vmem:[#allocation3 + $0x410] sm:$0xff]  ;;  %v1797_v53 = vadd.f32 %v1721_v5, %v1603_v19  ;;  %v3799_v38 = vld [vmem:[#allocation2 + $0x16a] sm:$0xff] }
 0x262   : > { %2109 = vmatmul.f32.gmra.mxu0 %v3583_v8  ;;  %v2242_v8 = vld [vmem:[#allocation3 + $0x408] sm:$0xff]  ;;  %2981 = vmatpush.msra.mxu1 %v2243_v32  ;;  %4423 = vst [vmem:[#allocation50_spill] sm:$0xff] %v3799_v38  ;;  %v1847_v5 = vld [vmem:[#allocation2 + $0x170] sm:$0xff] }
 0x263   : > { %2270 = vmatpush.msrb.mxu0 %v2243_v32  ;;  %v1604_v32 = vadd.f32 %v1530_v55, %v1410_v16  ;;  %v2603_v55 = vld [vmem:[%s4357_s7] sm:$0xf] }
 0x264   : > { %1771 = vmatmul.f32.gmra.mxu2 %v3786_v31  ;;  %1580 = vmatmul.f32.gmra.mxu1 %v3789_v42  ;;  %v4431_v31 = vld [vmem:[#allocation11_spill] sm:$0xff] }
 0x265   : > { %1963 = vmatmul.f32.gmra.mxu3 %v1846_v25  ;;  %2271 = vmatpush.msrb.mxu0 %v2242_v8 }
 0x266   : > { %2982 = vmatpush.msra.mxu1 %v2242_v8  ;;  %2931 = vmatpush.msk.msra.mxu3 %vm484_vm0, %v2603_v55 }
 0x267   : > { %v3792_v2 = vpop.f32.mrf.mxu0  ;;  %v1724_v46 = vpop.f32.mrf.mxu2  ;;  %2272 = vmatpush.msrb.mxu0 %v2241_v34 }
 0x268   : > { %v1916_v23 = vpop.f32.mrf.mxu3  ;;  %2983 = vmatpush.msra.mxu1 %v2241_v34  ;;  %v1798_v19 = vadd.f32 %v1724_v46, %v1604_v32  ;;  %v1411_v34 = vadd.f32 %v3597_v61, %v3449_v27  ;;  %v3831_v61 = vld [vmem:[#allocation2 + $0x182] sm:$0xff] }
 0x269   : > { %v3794_v28 = vadd.f32 %v1916_v23, %v1797_v53  ;;  %v1536_v25 = vpop.f32.mrf.mxu1  ;;  %4424 = vst [vmem:[#allocation51_spill] sm:$0xff] %v3831_v61 }
 0x26a   : > { %2112 = vmatmul.f32.gmra.mxu0 %v3594_v13  ;;  %v1605_v46 = vadd.f32 %v1533_v62, %v1411_v34 }
 0x26c   : > { %1774 = vmatmul.f32.gmra.mxu2 %v3799_v38  ;;  %1583 = vmatmul.f32.gmra.mxu1 %v3802_v36 }
 0x26d   : > { %1966 = vmatmul.f32.gmra.mxu3 %v1847_v5 }
 0x26f   : > { %v3805_v53 = vpop.f32.mrf.mxu0  ;;  %v1727_v13 = vpop.f32.mrf.mxu2 }
 0x270   : > { %v1919_v8 = vpop.f32.mrf.mxu3  ;;  %v1799_v16 = vadd.f32 %v1727_v13, %v1605_v46 }
 0x271   : > { %v3807_v23 = vadd.f32 %v1919_v8, %v1798_v19  ;;  %v1539_v7 = vpop.f32.mrf.mxu1 }
 0x272   : > { %2115 = vmatmul.f32.gmra.mxu0 %v3605_v63  ;;  %v3821_v63 = vld [vmem:[#allocation2 + $0x181] sm:$0xff] }
 0x274   : > { %1777 = vmatmul.f32.gmra.mxu2 %v3468_v3  ;;  %1586 = vmatmul.f32.gmra.mxu1 %v3821_v63  ;;  %v1412_v3 = vadd.f32 %v3608_v15, %v3456_v52  ;;  %v2484_v15 = vld [vmem:[%s4355_s5 + $0x70] sm:$0xff] }
 0x275   : > { %1969 = vmatmul.f32.gmra.mxu3 %v3623_v0  ;;  %v3835_v0 = vld [vmem:[#allocation2 + $0x189] sm:$0xff]  ;;  %2491 = vmatpush.msra.mxu2 %v2484_v15  ;;  %v4430_v15 = vld [vmem:[#allocation35_spill] sm:$0xff] }
 0x276   : > { %v1606_v62 = vadd.f32 %v1536_v25, %v1412_v3  ;;  %v3848_v25 = vld [vmem:[#allocation2 + $0x18a] sm:$0xff] }
 0x277   : > { %v3824_v5 = vpop.f32.mrf.mxu0  ;;  %v1730_v32 = vpop.f32.mrf.mxu2 }
 0x278   : > { %v1922_v19 = vpop.f32.mrf.mxu3  ;;  %v1800_v13 = vadd.f32 %v1730_v32, %v1606_v62 }
 0x279   : > { %v3826_v8 = vadd.f32 %v1922_v19, %v1799_v16  ;;  %v1542_v27 = vpop.f32.mrf.mxu1  ;;  %v3011_v16 = vld [vmem:[#allocation2] sm:$0xff]  ;;  %v4427_v19 = vld [vmem:[#allocation9_spill] sm:$0xff] }
 0x27a   : > { %2118 = vmatmul.f32.gmra.mxu0 %v3616_v37 }
 0x27c   : > { %1780 = vmatmul.f32.gmra.mxu2 %v3831_v61  ;;  %1589 = vmatmul.f32.gmra.mxu1 %v3835_v0  ;;  %v4428_v61 = vld [vmem:[#allocation38_spill] sm:$0xff] }
 0x27d   : > { %1972 = vmatmul.f32.gmra.mxu3 %v3636_v24  ;;  %v4425_v24 = vld [vmem:[#allocation32_spill] sm:$0xff] }
 0x27e   : > { %v1413_v46 = vadd.f32 %v4425_v24, %v3465_v11  ;;  %4426 = vst [vmem:[#allocation32_spill] sm:$0xff] %v3848_v25  ;;  %v4429_v24 = vld [vmem:[#allocation6_spill] sm:$0xff] }
 0x27f   : > { %v3838_v48 = vpop.f32.mrf.mxu0  ;;  %v1733_v55 = vpop.f32.mrf.mxu2  ;;  %v1414_v38 = vadd.f32 %v4430_v15, %v4429_v24 }
 0x280   : > { %v1925_v37 = vpop.f32.mrf.mxu3  ;;  %v1607_v32 = vadd.f32 %v1539_v7, %v1413_v46 }
 0x281   : > { %v3840_v34 = vadd.f32 %v1925_v37, %v1800_v13  ;;  %v1545_v52 = vpop.f32.mrf.mxu1 }
 0x282   : > { %2121 = vmatmul.f32.gmra.mxu0 %v3629_v14  ;;  %v1801_v3 = vadd.f32 %v1733_v55, %v1607_v32 }
 0x284   : > { %1783 = vmatmul.f32.gmra.mxu2 %v3848_v25  ;;  %2276 = vmatmul.f32.vlgmr.msra.gmra.mxu1 %v4427_v19  ;;  %v1608_v25 = vadd.f32 %v1542_v27, %v1414_v38 }
 0x285   : > { %1975 = vmatmul.f32.gmra.mxu3 %v3011_v16 }
 0x287   : > { %v3852_v14 = vpop.f32.mrf.mxu0  ;;  %v1736_v62 = vpop.f32.mrf.mxu2 }
 0x288   : > { %v1928_v13 = vpop.f32.mrf.mxu3  ;;  %v1802_v7 = vadd.f32 %v1736_v62, %v1608_v25  ;;  %v4433_v25 = vld [vmem:[#allocation13_spill] sm:$0xff] }
 0x289   : > { %v3854_v37 = vadd.f32 %v1928_v13, %v1801_v3  ;;  %v1548_v11 = vpop.f32.mrf.mxu1  ;;  %v4432_v13 = vld [vmem:[#allocation7_spill] sm:$0xff] }
 0x28a   : > { %2124 = vmatmul.f32.gmra.mxu0 %v4428_v61  ;;  %v2483_v61 = vld [vmem:[%s4355_s5 + $0x68] sm:$0xff]  ;;  %v1415_v38 = vadd.f32 %v3648_v50, %v4432_v13  ;;  %v4435_v13 = vld [vmem:[#allocation15_spill] sm:$0xff] }
 0x28b   : > { %2492 = vmatpush.msra.mxu2 %v2483_v61  ;;  %v3013_v61 = vld [vmem:[%s3159_s21 + $0x8] sm:$0xff] }
 0x28c   : > { %2279 = vmatmul.f32.gmra.mxu1 %v4431_v31  ;;  %v3012_v31 = vld [vmem:[%s3159_s21] sm:$0xff]  ;;  %v1609_v27 = vadd.f32 %v1545_v52, %v1415_v38 }
 0x28d   : > { %1978 = vmatmul.f32.gmra.mxu3 %v3011_v16 }
 0x28f   : > { %v1739_v46 = vpop.f32.mrf.mxu2  ;;  %v3860_v55 = vpop.f32.mrf.mxu0 }
 0x290   : > { %v1931_v32 = vpop.f32.mrf.mxu3  ;;  %v1803_v16 = vadd.f32 %v1739_v46, %v1609_v27 }
 0x291   : > { %v3862_v19 = vadd.f32 %v1931_v32, %v1802_v7  ;;  %v1551_v3 = vpop.f32.mrf.mxu1  ;;  %v4434_v32 = vld [vmem:[#allocation8_spill] sm:$0xff] }
 0x292   : > { %2127 = vmatmul.f32.gmra.mxu0 %v3659_v10  ;;  %v1416_v50 = vadd.f32 %v3663_v51, %v4434_v32  ;;  %v2482_v51 = vld [vmem:[%s4355_s5 + $0x60] sm:$0xff]  ;;  %v4437_v32 = vld [vmem:[#allocation17_spill] sm:$0xff] }
 0x293   : > { %2493 = vmatpush.msra.mxu2 %v2482_v51  ;;  %v3015_v51 = vld [vmem:[%s3159_s21 + $0x18] sm:$0xff] }
 0x294   : > { %2282 = vmatmul.f32.gmra.mxu1 %v4433_v25  ;;  %v1610_v52 = vadd.f32 %v1548_v11, %v1416_v50 }
 0x295   : > { %2932 = vmatmul.msk.f32.vlgmr.msra.gmra.mxu3 %vm387_vm1, %v3012_v31 }
 0x297   : > { %v1742_v62 = vpop.f32.mrf.mxu2  ;;  %v3873_v24 = vpop.f32.mrf.mxu0 }
 0x298   : > { %v1934_v10 = vpop.f32.mrf.mxu3  ;;  %v1804_v46 = vadd.f32 %v1742_v62, %v1610_v52 }
 0x299   : > { %v3875_v15 = vadd.f32 %v1934_v10, %v1803_v16  ;;  %v1554_v7 = vpop.f32.mrf.mxu1  ;;  %v4436_v16 = vld [vmem:[#allocation10_spill] sm:$0xff] }
 0x29a   : > { %2130 = vmatmul.f32.gmra.mxu0 %v3674_v22  ;;  %v1417_v11 = vadd.f32 %v3677_v54, %v4436_v16  ;;  %v3014_v10 = vld [vmem:[%s3159_s21 + $0x10] sm:$0xff]  ;;  %v4439_v16 = vld [vmem:[#allocation19_spill] sm:$0xff] }
 0x29c   : > { %2285 = vmatmul.f32.gmra.mxu1 %v4435_v13  ;;  %v1611_v62 = vadd.f32 %v1551_v3, %v1417_v11 }
 0x29d   : > { %2933 = vmatmul.msk.f32.gmra.mxu3 %vm387_vm1, %v3013_v61 }
 0x29f   : > { %v1745_v38 = vpop.f32.mrf.mxu2  ;;  %v3883_v31 = vpop.f32.mrf.mxu0 }
 0x2a0   : > { %v1937_v27 = vpop.f32.mrf.mxu3  ;;  %v1805_v50 = vadd.f32 %v1745_v38, %v1611_v62 }
 0x2a1   : > { %v3885_v25 = vadd.f32 %v1937_v27, %v1804_v46  ;;  %v1557_v22 = vpop.f32.mrf.mxu1  ;;  %v4438_v27 = vld [vmem:[#allocation12_spill] sm:$0xff] }
 0x2a2   : > { %2133 = vmatmul.f32.gmra.mxu0 %v3687_v47  ;;  %v1418_v54 = vadd.f32 %v3690_v1, %v4438_v27  ;;  %v2481_v1 = vld [vmem:[%s4355_s5 + $0x58] sm:$0xff]  ;;  %v4441_v27 = vld [vmem:[#allocation21_spill] sm:$0xff] }
 0x2a3   : > { %2494 = vmatpush.msra.mxu2 %v2481_v1  ;;  %v3017_v1 = vld [vmem:[%s3159_s21 + $0x28] sm:$0xff] }
 0x2a4   : > { %2288 = vmatmul.f32.gmra.mxu1 %v4437_v32  ;;  %v1612_v3 = vadd.f32 %v1554_v7, %v1418_v54 }
 0x2a5   : > { %2934 = vmatmul.msk.f32.gmra.mxu3 %vm387_vm1, %v3014_v10 }
 0x2a7   : > { %v1748_v61 = vpop.f32.mrf.mxu2  ;;  %v3896_v52 = vpop.f32.mrf.mxu0 }
 0x2a8   : > { %v1940_v47 = vpop.f32.mrf.mxu3  ;;  %v1806_v38 = vadd.f32 %v1748_v61, %v1612_v3 }
 0x2a9   : > { %v3898_v13 = vadd.f32 %v1940_v47, %v1805_v50  ;;  %v1560_v46 = vpop.f32.mrf.mxu1  ;;  %v4440_v50 = vld [vmem:[#allocation14_spill] sm:$0xff]  ;;  %v3016_v47 = vld [vmem:[%s3159_s21 + $0x20] sm:$0xff] }
 0x2aa   : > { %2136 = vmatmul.f32.gmra.mxu0 %v3700_v39  ;;  %v1419_v7 = vadd.f32 %v3703_v44, %v4440_v50  ;;  %v4443_v50 = vld [vmem:[#allocation23_spill] sm:$0xff] }
 0x2ac   : > { %2291 = vmatmul.f32.gmra.mxu1 %v4439_v16  ;;  %v1613_v61 = vadd.f32 %v1557_v22, %v1419_v7 }
 0x2ad   : > { %2935 = vmatmul.msk.f32.gmra.mxu3 %vm387_vm1, %v3015_v51 }
 0x2af   : > { %v1751_v11 = vpop.f32.mrf.mxu2  ;;  %v3906_v10 = vpop.f32.mrf.mxu0 }
 0x2b0   : > { %v1943_v62 = vpop.f32.mrf.mxu3  ;;  %v1807_v54 = vadd.f32 %v1751_v11, %v1613_v61 }
 0x2b1   : > { %v3908_v32 = vadd.f32 %v1943_v62, %v1806_v38  ;;  %v1563_v39 = vpop.f32.mrf.mxu1  ;;  %v4442_v38 = vld [vmem:[#allocation16_spill] sm:$0xff] }
 0x2b2   : > { %2139 = vmatmul.f32.gmra.mxu0 %v3713_v41  ;;  %v1420_v44 = vadd.f32 %v3716_v56, %v4442_v38  ;;  %v2480_v56 = vld [vmem:[%s4355_s5 + $0x50] sm:$0xff] }
 0x2b3   : > { %2495 = vmatpush.msra.mxu2 %v2480_v56  ;;  %v4447_v56 = vld [vmem:[#allocation27_spill] sm:$0xff] }
 0x2b4   : > { %2294 = vmatmul.f32.gmra.mxu1 %v4441_v27  ;;  %v1614_v22 = vadd.f32 %v1560_v46, %v1420_v44  ;;  %v3018_v46 = vld [vmem:[%s3159_s21 + $0x30] sm:$0xff] }
 0x2b5   : > { %2936 = vmatmul.msk.f32.gmra.mxu3 %vm387_vm1, %v3016_v47 }
 0x2b7   : > { %v1754_v51 = vpop.f32.mrf.mxu2  ;;  %v3919_v3 = vpop.f32.mrf.mxu0 }
 0x2b8   : > { %v1946_v41 = vpop.f32.mrf.mxu3  ;;  %v1808_v11 = vadd.f32 %v1754_v51, %v1614_v22 }
 0x2b9   : > { %v3921_v16 = vadd.f32 %v1946_v41, %v1807_v54  ;;  %v1566_v62 = vpop.f32.mrf.mxu1  ;;  %v4445_v41 = vld [vmem:[#allocation25_spill] sm:$0xff] }
 0x2ba   : > { %2142 = vmatmul.f32.gmra.mxu0 %v3726_v43  ;;  %v4444_v43 = vld [vmem:[#allocation18_spill] sm:$0xff] }
 0x2bb   : > { %v1421_v54 = vadd.f32 %v3729_v29, %v4444_v43 }
 0x2bc   : > { %2297 = vmatmul.f32.gmra.mxu1 %v4443_v50 }
 0x2bd   : > { %2937 = vmatmul.msk.f32.gmra.mxu3 %vm387_vm1, %v3017_v1  ;;  %v1615_v51 = vadd.f32 %v1563_v39, %v1421_v54 }
 0x2bf   : > { %v1757_v7 = vpop.f32.mrf.mxu2  ;;  %v3929_v47 = vpop.f32.mrf.mxu0 }
 0x2c0   : > { %v1949_v61 = vpop.f32.mrf.mxu3  ;;  %v1809_v44 = vadd.f32 %v1757_v7, %v1615_v51 }
 0x2c1   : > { %v3931_v27 = vadd.f32 %v1949_v61, %v1808_v11  ;;  %v1569_v38 = vpop.f32.mrf.mxu1  ;;  %v4446_v11 = vld [vmem:[#allocation20_spill] sm:$0xff]  ;;  %v3019_v61 = vld [vmem:[%s3159_s21 + $0x38] sm:$0xff] }
 0x2c2   : > { %2145 = vmatmul.f32.gmra.mxu0 %v3739_v59  ;;  %v1422_v29 = vadd.f32 %v3742_v6, %v4446_v11  ;;  %v2479_v6 = vld [vmem:[%s4355_s5 + $0x48] sm:$0xff] }
 0x2c3   : > { %2496 = vmatpush.msra.mxu2 %v2479_v6  ;;  %v3021_v6 = vld [vmem:[%s3159_s21 + $0x48] sm:$0xff] }
 0x2c4   : > { %2300 = vmatmul.f32.gmra.mxu1 %v4445_v41  ;;  %v1616_v39 = vadd.f32 %v1566_v62, %v1422_v29 }
 0x2c5   : > { %2938 = vmatmul.msk.f32.gmra.mxu3 %vm387_vm1, %v3018_v46 }
 0x2c7   : > { %v1760_v1 = vpop.f32.mrf.mxu2  ;;  %v3942_v22 = vpop.f32.mrf.mxu0 }
 0x2c8   : > { %v1952_v59 = vpop.f32.mrf.mxu3  ;;  %v1810_v43 = vadd.f32 %v1760_v1, %v1616_v39 }
 0x2c9   : > { %v3944_v50 = vadd.f32 %v1952_v59, %v1809_v44  ;;  %v1572_v51 = vpop.f32.mrf.mxu1  ;;  %v3020_v44 = vld [vmem:[%s3159_s21 + $0x40] sm:$0xff]  ;;  %v4449_v59 = vld [vmem:[#allocation29_spill] sm:$0xff] }
 0x2ca   : > { %2148 = vmatmul.f32.gmra.mxu0 %v3750_v60  ;;  %v4448_v60 = vld [vmem:[#allocation22_spill] sm:$0xff] }
 0x2cb   : > { %v1423_v62 = vadd.f32 %v3753_v57, %v4448_v60  ;;  %v4450_v57 = vld [vmem:[#allocation24_spill] sm:$0xff] }
 0x2cc   : > { %2303 = vmatmul.f32.gmra.mxu1 %v4447_v56 }
 0x2cd   : > { %2939 = vmatmul.msk.f32.gmra.mxu3 %vm387_vm1, %v3019_v61  ;;  %v1617_v1 = vadd.f32 %v1569_v38, %v1423_v62 }
 0x2cf   : > { %v1763_v7 = vpop.f32.mrf.mxu2  ;;  %v3952_v54 = vpop.f32.mrf.mxu0 }
 0x2d0   : > { %v1955_v46 = vpop.f32.mrf.mxu3  ;;  %v1811_v11 = vadd.f32 %v1763_v7, %v1617_v1  ;;  %v4451_v7 = vld [vmem:[#allocation31_spill] sm:$0xff] }
 0x2d1   : > { %v3954_v41 = vadd.f32 %v1955_v46, %v1810_v43  ;;  %v1575_v43 = vpop.f32.mrf.mxu1  ;;  %v1424_v46 = vadd.f32 %v3766_v26, %v4450_v57  ;;  %v2478_v26 = vld [vmem:[%s4355_s5 + $0x40] sm:$0xff] }
 0x2d2   : > { %2151 = vmatmul.f32.gmra.mxu0 %v3763_v21  ;;  %2497 = vmatpush.msra.mxu2 %v2478_v26 }
 0x2d3   : > { %v1618_v38 = vadd.f32 %v1572_v51, %v1424_v46 }
 0x2d4   : > { %2306 = vmatmul.f32.gmra.mxu1 %v4449_v59 }
 0x2d5   : > { %2940 = vmatmul.msk.f32.gmra.mxu3 %vm387_vm1, %v3020_v44 }
 0x2d7   : > { %v1766_v29 = vpop.f32.mrf.mxu2  ;;  %v2107_v61 = vpop.f32.mrf.mxu0 }
 0x2d8   : > { %v1958_v39 = vpop.f32.mrf.mxu3  ;;  %v3966_v21 = vadd.f32 %v2107_v61, %v3781_v49  ;;  %v1812_v60 = vadd.f32 %v1766_v29, %v1618_v38  ;;  %v3022_v29 = vld [vmem:[%s3159_s21 + $0x50] sm:$0xff] }
 0x2d9   : > { %v3968_v56 = vadd.f32 %v1958_v39, %v1811_v11  ;;  %v1578_v11 = vpop.f32.mrf.mxu1 }
 0x2da   : > { %2154 = vmatmul.f32.gmra.mxu0 %v3776_v58  ;;  %v4452_v58 = vld [vmem:[#allocation26_spill] sm:$0xff] }
 0x2db   : > { %v1425_v51 = vadd.f32 %v3779_v33, %v4452_v58  ;;  %v4454_v33 = vld [vmem:[#allocation28_spill] sm:$0xff] }
 0x2dc   : > { %2309 = vmatmul.f32.gmra.mxu1 %v4451_v7  ;;  %v1426_v7 = vadd.f32 %v3792_v2, %v4454_v33  ;;  %v2477_v2 = vld [vmem:[%s4355_s5 + $0x38] sm:$0xff] }
 0x2dd   : > { %2941 = vmatmul.msk.f32.gmra.mxu3 %vm387_vm1, %v3021_v6  ;;  %v1619_v61 = vadd.f32 %v1575_v43, %v1425_v51  ;;  %2498 = vmatpush.msra.mxu2 %v2477_v2  ;;  %v3026_v2 = vld [vmem:[%s3159_s21 + $0x70] sm:$0xff] }
 0x2de   : > { %v1620_v43 = vadd.f32 %v1578_v11, %v1426_v7 }
 0x2df   : > { %v1769_v62 = vpop.f32.mrf.mxu2  ;;  %v2110_v44 = vpop.f32.mrf.mxu0 }
 0x2e0   : > { %v1961_v49 = vpop.f32.mrf.mxu3  ;;  %v3977_v1 = vadd.f32 %v2110_v44, %v3794_v28  ;;  %v4453_v28 = vld [vmem:[#allocation34_spill] sm:$0xff]  ;;  %v1813_v39 = vadd.f32 %v1769_v62, %v1619_v61  ;;  %v4455_v44 = vld [vmem:[#allocation37_spill] sm:$0xff]  ;;  %v3024_v61 = vld [vmem:[%s3159_s21 + $0x60] sm:$0xff] }
 0x2e1   : > { %v3979_v59 = vadd.f32 %v1961_v49, %v1812_v60  ;;  %v3023_v60 = vld [vmem:[%s3159_s21 + $0x58] sm:$0xff]  ;;  %v1581_v62 = vpop.f32.mrf.mxu1 }
 0x2e2   : > { %2157 = vmatmul.f32.gmra.mxu0 %v3789_v42 }
 0x2e4   : > { %2312 = vmatmul.f32.gmra.mxu1 %v4453_v28 }
 0x2e5   : > { %2942 = vmatmul.msk.f32.gmra.mxu3 %vm387_vm1, %v3022_v29 }
 0x2e7   : > { %v1772_v57 = vpop.f32.mrf.mxu2  ;;  %v2113_v46 = vpop.f32.mrf.mxu0 }
 0x2e8   : > { %v1964_v42 = vpop.f32.mrf.mxu3  ;;  %v3991_v6 = vadd.f32 %v2113_v46, %v3807_v23  ;;  %v1814_v49 = vadd.f32 %v1772_v57, %v1620_v43 }
 0x2e9   : > { %v3993_v38 = vadd.f32 %v1964_v42, %v1813_v39  ;;  %v1584_v57 = vpop.f32.mrf.mxu1 }
 0x2ea   : > { %2160 = vmatmul.f32.gmra.mxu0 %v3802_v36  ;;  %v4456_v36 = vld [vmem:[#allocation30_spill] sm:$0xff] }
 0x2eb   : > { %v1427_v11 = vadd.f32 %v3805_v53, %v4456_v36  ;;  %v4457_v53 = vld [vmem:[#allocation33_spill] sm:$0xff] }
 0x2ec   : > { %2315 = vmatmul.f32.gmra.mxu1 %v4455_v44  ;;  %v1428_v7 = vadd.f32 %v3824_v5, %v4457_v53 }
 0x2ed   : > { %2943 = vmatmul.msk.f32.gmra.mxu3 %vm387_vm1, %v3023_v60  ;;  %v1621_v28 = vadd.f32 %v1581_v62, %v1427_v11  ;;  %v3025_v60 = vld [vmem:[%s3159_s21 + $0x68] sm:$0xff]  ;;  %v2044_v62 = vld [vmem:[#allocation2 + $0x199] sm:$0xff] }
 0x2ef   : > { %v2116_v26 = vpop.f32.mrf.mxu0  ;;  %v1775_v58 = vpop.f32.mrf.mxu2 }
 0x2f0   : > { %v1967_v23 = vpop.f32.mrf.mxu3  ;;  %v4002_v51 = vadd.f32 %v2116_v26, %v3826_v8  ;;  %v1815_v8 = vadd.f32 %v1775_v58, %v1621_v28  ;;  %v4458_v58 = vld [vmem:[#allocation36_spill] sm:$0xff] }
 0x2f1   : > { %v4004_v29 = vadd.f32 %v1967_v23, %v1814_v49  ;;  %v1587_v5 = vpop.f32.mrf.mxu1 }
 0x2f2   : > { %2163 = vmatmul.f32.gmra.mxu0 %v3821_v63 }
 0x2f4   : > { %2318 = vmatmul.f32.gmra.mxu1 %v3656_v18  ;;  %v1622_v18 = vadd.f32 %v1584_v57, %v1428_v7 }
 0x2f5   : > { %2944 = vmatmul.msk.f32.gmra.mxu3 %vm387_vm1, %v3024_v61  ;;  %v2045_v61 = vld [vmem:[#allocation2 + $0x1a1] sm:$0xff] }
 0x2f7   : > { %v2119_v39 = vpop.f32.mrf.mxu0  ;;  %v1778_v33 = vpop.f32.mrf.mxu2 }
 0x2f8   : > { %v1970_v46 = vpop.f32.mrf.mxu3  ;;  %v4016_v63 = vadd.f32 %v2119_v39, %v3840_v34  ;;  %v1816_v43 = vadd.f32 %v1778_v33, %v1622_v18  ;;  %v3028_v33 = vld [vmem:[%s3159_s21 + $0x80] sm:$0xff] }
 0x2f9   : > { %v4018_v42 = vadd.f32 %v1970_v46, %v1815_v8  ;;  %v2475_v46 = vld [vmem:[%s4355_s5 + $0x28] sm:$0xff]  ;;  %v2474_v18 = vld [vmem:[%s4355_s5 + $0x20] sm:$0xff] }
 0x2fa   : > { %2166 = vmatmul.f32.gmra.mxu0 %v3835_v0  ;;  %v2476_v0 = vld [vmem:[%s4355_s5 + $0x30] sm:$0xff] }
 0x2fb   : > { %2499 = vmatpush.msra.mxu2 %v2476_v0 }
 0x2fc   : > { %2321 = vmatmul.f32.gmra.mxu1 %v3669_v20  ;;  %v1429_v20 = vadd.f32 %v3838_v48, %v4458_v58  ;;  %v3027_v48 = vld [vmem:[%s3159_s21 + $0x78] sm:$0xff] }
 0x2fd   : > { %2945 = vmatmul.msk.f32.gmra.mxu3 %vm387_vm1, %v3025_v60  ;;  %2500 = vmatpush.msra.mxu2 %v2475_v46 }
 0x2fe   : > { %v1623_v36 = vadd.f32 %v1587_v5, %v1429_v20  ;;  %v3033_v5 = vld [vmem:[%s3159_s21 + $0xa8] sm:$0xff]  ;;  %v2472_v20 = vld [vmem:[%s4355_s5 + $0x10] sm:$0xff] }
 0x2ff   : > { %v2122_v44 = vpop.f32.mrf.mxu0  ;;  %v1781_v23 = vpop.f32.mrf.mxu2  ;;  %2501 = vmatpush.msra.mxu2 %v2474_v18  ;;  %v4462_v18 = vld [vmem:[#allocation32_spill] sm:$0xff] }
 0x300   : > { %v1973_v34 = vpop.f32.mrf.mxu3  ;;  %v4027_v49 = vadd.f32 %v2122_v44, %v3854_v37  ;;  %v1817_v37 = vadd.f32 %v1781_v23, %v1623_v36  ;;  %v3034_v23 = vld [vmem:[%s3159_s21 + $0xb0] sm:$0xff] }
 0x301   : > { %v4032_v26 = vadd.f32 %v1973_v34, %v1816_v43  ;;  %v2473_v34 = vld [vmem:[%s4355_s5 + $0x18] sm:$0xff] }
 0x302   : > { %2169 = vmatmul.f32.gmra.mxu0 %v2044_v62  ;;  %2502 = vmatpush.msra.mxu2 %v2473_v34 }
 0x304   : > { %2324 = vmatmul.f32.gmra.mxu1 %v3682_v12  ;;  %2503 = vmatpush.msra.mxu2 %v2472_v20  ;;  %v4463_v20 = vld [vmem:[#allocation39_spill] sm:$0xff] }
 0x305   : > { %2946 = vmatmul.msk.f32.gmra.mxu3 %vm387_vm1, %v3026_v2 }
 0x307   : > { %v2125_v11 = vpop.f32.mrf.mxu0 }
 0x308   : > { %v1976_v28 = vpop.f32.mrf.mxu3  ;;  %v4040_v8 = vadd.f32 %v2125_v11, %v3862_v19  ;;  %v2208_v19 = vld [vmem:[#allocation2 + $0x32] sm:$0xff] }
 0x309   : > { %v4042_v39 = vadd.f32 %v1976_v28, %v1817_v37  ;;  %v3035_v37 = vld [vmem:[%s3159_s21 + $0xb8] sm:$0xff]  ;;  %v4460_v11 = vld [vmem:[#allocation50_spill] sm:$0xff] }
 0x30a   : > { %2172 = vmatmul.f32.gmra.mxu0 %v2045_v61 }
 0x30c   : > { %2327 = vmatmul.f32.gmra.mxu1 %v3695_v4 }
 0x30d   : > { %2947 = vmatmul.msk.f32.gmra.mxu3 %vm387_vm1, %v3027_v48  ;;  %v2471_v48 = vld [vmem:[%s4355_s5 + $0x8] sm:$0xff] }
 0x30e   : > { %2504 = vmatpush.msra.mxu2 %v2471_v48  ;;  %v4464_v48 = vld [vmem:[#allocation40_spill] sm:$0xff] }
 0x30f   : > { %v2128_v57 = vpop.f32.mrf.mxu0 }
 0x310   : > { %v4048_v12 = vadd.f32 %v2128_v57, %v3875_v15  ;;  %v3029_v15 = vld [vmem:[%s3159_s21 + $0x88] sm:$0xff]  ;;  %v2235_v57 = vld [vmem:[#allocation2 + $0x172] sm:$0xff] }
 0x312   : > { %2273 = vmatmul.f32.vlgmr.msrb.gmra.mxu0 %v2208_v19 }
 0x314   : > { %2330 = vmatmul.f32.gmra.mxu1 %v3708_v9  ;;  %v3030_v9 = vld [vmem:[%s3159_s21 + $0x90] sm:$0xff] }
 0x315   : > { %2948 = vmatmul.msk.f32.gmra.mxu3 %vm387_vm1, %v3028_v33  ;;  %v4461_v33 = vld [vmem:[#allocation51_spill] sm:$0xff] }
 0x317   : > { %v2131_v53 = vpop.f32.mrf.mxu0 }
 0x318   : > { %v4057_v4 = vadd.f32 %v2131_v53, %v3885_v25 }
 0x31c   : > { %2333 = vmatmul.f32.gmra.mxu1 %v3721_v17  ;;  %v3031_v17 = vld [vmem:[%s3159_s21 + $0x98] sm:$0xff] }
 0x31d   : > { %2949 = vmatmul.msk.f32.gmra.mxu3 %vm387_vm1, %v3029_v15 }
 0x31f   : > { %v2134_v7 = vpop.f32.mrf.mxu0 }
 0x320   : > { %v4063_v60 = vadd.f32 %v2134_v7, %v3898_v13  ;;  %v1590_v13 = vpop.f32.mrf.mxu1 }
 0x324   : > { %2336 = vmatmul.f32.gmra.mxu1 %v3734_v40  ;;  %v3032_v40 = vld [vmem:[%s3159_s21 + $0xa0] sm:$0xff] }
 0x325   : > { %2950 = vmatmul.msk.f32.gmra.mxu3 %vm387_vm1, %v3030_v9 }
 0x327   : > { %v2137_v25 = vpop.f32.mrf.mxu0 }
 0x328   : > { %v4072_v43 = vadd.f32 %v2137_v25, %v3908_v32 }
 0x32c   : > { %2339 = vmatmul.f32.gmra.mxu1 %v3747_v35  ;;  %v2277_v35 = vpop.f32.mrf.mxu1 }
 0x32d   : > { %2951 = vmatmul.msk.f32.gmra.mxu3 %vm387_vm1, %v3031_v17 }
 0x32f   : > { %v2140_v44 = vpop.f32.mrf.mxu0 }
 0x330   : > { %v4078_v62 = vadd.f32 %v2140_v44, %v3921_v16 }
 0x334   : > { %2342 = vmatmul.f32.gmra.mxu1 %v3760_v45  ;;  %v2280_v45 = vpop.f32.mrf.mxu1 }
 0x335   : > { %2952 = vmatmul.msk.f32.gmra.mxu3 %vm387_vm1, %v3032_v40 }
 0x337   : > { %v2143_v32 = vpop.f32.mrf.mxu0 }
 0x338   : > { %v4087_v0 = vadd.f32 %v2143_v32, %v3931_v27  ;;  %v4459_v27 = vld [vmem:[#allocation49_spill] sm:$0xff] }
 0x33c   : > { %2345 = vmatmul.f32.gmra.mxu1 %v3773_v30  ;;  %v1979_v30 = vpop.f32.mrf.mxu3 }
 0x33d   : > { %2953 = vmatmul.msk.f32.gmra.mxu3 %vm387_vm1, %v3033_v5 }
 0x33f   : > { %v2146_v16 = vpop.f32.mrf.mxu0 }
 0x340   : > { %v4093_v58 = vadd.f32 %v2146_v16, %v3944_v50  ;;  %v2283_v50 = vpop.f32.mrf.mxu1 }
 0x344   : > { %2348 = vmatmul.f32.gmra.mxu1 %v4459_v27  ;;  %v1784_v27 = vpop.f32.mrf.mxu2 }
 0x345   : > { %2954 = vmatmul.msk.f32.gmra.mxu3 %vm387_vm1, %v3034_v23  ;;  %v1430_v23 = vadd.f32 %v3852_v14, %v4463_v20 }
 0x347   : > { %v2149_v2 = vpop.f32.mrf.mxu0 }
 0x348   : > { %v4102_v36 = vadd.f32 %v2149_v2, %v3954_v41  ;;  %v2286_v41 = vpop.f32.mrf.mxu1  ;;  %v1624_v2 = vadd.f32 %v1590_v13, %v1430_v23 }
 0x34c   : > { %2351 = vmatmul.f32.gmra.mxu1 %v4460_v11 }
 0x34d   : > { %2955 = vmatmul.msk.f32.gmra.mxu3 %vm387_vm1, %v3035_v37  ;;  %v1818_v37 = vadd.f32 %v1784_v27, %v1624_v2  ;;  %v4468_v27 = vld [vmem:[#allocation44_spill] sm:$0xff] }
 0x34e   : > { %v2180_v2 = vadd.f32 %v3906_v10, %v4468_v27 }
 0x34f   : > { %v2152_v61 = vpop.f32.mrf.mxu0  ;;  %v2013_v11 = vadd.f32 %v1979_v30, %v1818_v37 }
 0x350   : > { %v4108_v28 = vadd.f32 %v2152_v61, %v3968_v56  ;;  %v2470_v56 = vld [vmem:[%s4355_s5] sm:$0xff]  ;;  %v2289_v7 = vpop.f32.mrf.mxu1  ;;  %v2374_v37 = vadd.f32 %v2286_v41, %v2180_v2 }
 0x351   : > { %2505 = vmatpush.msra.mxu2 %v2470_v56 }
 0x354   : > { %2354 = vmatmul.f32.gmra.mxu1 %v2235_v57  ;;  %v2176_v57 = vadd.f32 %v3860_v55, %v4464_v48 }
 0x357   : > { %v2155_v46 = vpop.f32.mrf.mxu0 }
 0x358   : > { %v4114_v19 = vadd.f32 %v2155_v46, %v3979_v59  ;;  %v2238_v59 = vld [vmem:[#allocation2 + $0x19a] sm:$0xff]  ;;  %v2292_v17 = vpop.f32.mrf.mxu1 }
 0x35c   : > { %2357 = vmatmul.f32.gmra.mxu1 %v4461_v33  ;;  %v4465_v33 = vld [vmem:[#allocation41_spill] sm:$0xff] }
 0x35f   : > { %v2158_v53 = vpop.f32.mrf.mxu0 }
 0x360   : > { %v4118_v15 = vadd.f32 %v2158_v53, %v3993_v38  ;;  %v2239_v38 = vld [vmem:[#allocation2 + $0x1a2] sm:$0xff]  ;;  %v2295_v40 = vpop.f32.mrf.mxu1 }
 0x364   : > { %2360 = vmatmul.f32.gmra.mxu1 %v4462_v18  ;;  %v4466_v18 = vld [vmem:[#allocation42_spill] sm:$0xff] }
 0x365   : > { %v2178_v55 = vadd.f32 %v3883_v31, %v4466_v18  ;;  %v4472_v18 = vld [vmem:[#allocation48_spill] sm:$0xff] }
 0x367   : > { %v2161_v9 = vpop.f32.mrf.mxu0 }
 0x368   : > { %v4125_v25 = vadd.f32 %v2161_v9, %v4004_v29  ;;  %v2298_v9 = vpop.f32.mrf.mxu1 }
 0x36c   : > { %2363 = vmatmul.f32.gmra.mxu1 %v2238_v59  ;;  %v2372_v59 = vadd.f32 %v2280_v45, %v2178_v55  ;;  %v2184_v55 = vadd.f32 %v3952_v54, %v4472_v18  ;;  %v4200_v18 = vld [vmem:[%s4358_s8] ss:$0 sm:$0xff] }
 0x36f   : > { %v2164_v44 = vpop.f32.mrf.mxu0 }
 0x370   : > { %v4128_v34 = vadd.f32 %v2164_v44, %v4018_v42  ;;  %v2301_v23 = vpop.f32.mrf.mxu1 }
 0x374   : > { %2366 = vmatmul.f32.gmra.mxu1 %v2239_v38 }
 0x377   : > { %v2167_v32 = vpop.f32.mrf.mxu0 }
 0x378   : > { %v4131_v5 = vadd.f32 %v2167_v32, %v4032_v26  ;;  %v4145_v26 = vld [vmem:[%s4354_s4] ss:$0 sm:$0xff]  ;;  %v4467_v32 = vld [vmem:[#allocation43_spill] sm:$0xff]  ;;  %v2304_v45 = vpop.f32.mrf.mxu1 }
 0x379   : > { %v2408_v38 = vadd.f32 %v4145_v26, %v2372_v59  ;;  %v2378_v59 = vadd.f32 %v2298_v9, %v2184_v55 }
 0x37b   : > { %v2440_v20 = vmax.f32 %v2408_v38, 0.0 }
 0x37f   : > { %v2170_v16 = vpop.f32.mrf.mxu0 }
 0x380   : > { %v4136_v29 = vadd.f32 %v2170_v16, %v4042_v39  ;;  %v2177_v39 = vadd.f32 %v3873_v24, %v4465_v33  ;;  %v2179_v16 = vadd.f32 %v3896_v52, %v4467_v32  ;;  %v2379_v32 = vadd.f32 %v2301_v23, %v3966_v21 }
 0x382   : > { %v2371_v53 = vadd.f32 %v2277_v35, %v2177_v39  ;;  %v2373_v24 = vadd.f32 %v2283_v50, %v2179_v16 }
 0x384   : > { %v2407_v56 = vadd.f32 %v4145_v26, %v2371_v53  ;;  %v2409_v35 = vadd.f32 %v4145_v26, %v2373_v24  ;;  %v2380_v24 = vadd.f32 %v2304_v45, %v3977_v1 }
 0x386   : > { %v2439_v44 = vmax.f32 %v2407_v56, 0.0  ;;  %v2441_v31 = vmax.f32 %v2409_v35, 0.0 }
 0x387   : > { %v2173_v42 = vpop.f32.mrf.mxu0 }
 0x388   : > { %v4138_v61 = vadd.f32 %v2173_v42, %v2013_v11  ;;  %v2410_v11 = vadd.f32 %v4145_v26, %v2374_v37  ;;  %v4469_v42 = vld [vmem:[#allocation45_spill] sm:$0xff] }
 0x389   : > { %v2181_v48 = vadd.f32 %v3919_v3, %v4469_v42  ;;  %v2628_v42 = vpop.f32.mrf.mxu3 }
 0x38a   : > { %v2442_v52 = vmax.f32 %v2410_v11, 0.0 }
 0x38f   : > { %v2274_v46 = vpop.f32.mrf.mxu0 }
 0x390   : > { %v2370_v14 = vadd.f32 %v2274_v46, %v2176_v57  ;;  %v2375_v57 = vadd.f32 %v2289_v7, %v2181_v48  ;;  %v2307_v46 = vpop.f32.mrf.mxu1 }
 0x391   : > { %v2381_v35 = vadd.f32 %v2307_v46, %v3991_v6  ;;  %v3036_v6 = vld [vmem:[%s3159_s21 + $0xc0] sm:$0xff]  ;;  %v3037_v46 = vld [vmem:[%s3159_s21 + $0xc8] sm:$0xff] }
 0x392   : > { %v2406_v13 = vadd.f32 %v4145_v26, %v2370_v14  ;;  %v2411_v50 = vadd.f32 %v4145_v26, %v2375_v57  ;;  %v4470_v14 = vld [vmem:[#allocation46_spill] sm:$0xff]  ;;  %2956 = vmatmul.msk.f32.gmra.mxu3 %vm387_vm1, %v3036_v6 }
 0x393   : > { %v2182_v33 = vadd.f32 %v3929_v47, %v4470_v14  ;;  %v2417_v27 = vadd.f32 %v4145_v26, %v2381_v35  ;;  %v3041_v35 = vld [vmem:[%s3159_s21 + $0xe8] sm:$0xff]  ;;  %v3042_v6 = vld [vmem:[%s3159_s21 + $0xf0] sm:$0xff] }
 0x394   : > { %v2438_v30 = vmax.f32 %v2406_v13, 0.0  ;;  %v2443_v10 = vmax.f32 %v2411_v50, 0.0  ;;  %v4471_v13 = vld [vmem:[#allocation47_spill] sm:$0xff]  ;;  %v2631_v50 = vpop.f32.mrf.mxu3 }
 0x395   : > { %v2376_v39 = vadd.f32 %v2292_v17, %v2182_v33  ;;  %v2183_v53 = vadd.f32 %v3942_v22, %v4471_v13  ;;  %v2414_v17 = vadd.f32 %v4145_v26, %v2378_v59  ;;  %v2449_v21 = vmax.f32 %v2417_v27, 0.0 }
 0x396   : > { %2506 = vmatmul.f32.vlgmr.msra.gmra.mxu2 %v2438_v30  ;;  %v2629_v59 = vadd.f32 %v4200_v18, %v2628_v42 }
 0x397   : > { %v2412_v41 = vadd.f32 %v4145_v26, %v2376_v39  ;;  %v2377_v56 = vadd.f32 %v2295_v40, %v2183_v53  ;;  %v2446_v38 = vmax.f32 %v2414_v17, 0.0  ;;  %v2415_v40 = vadd.f32 %v4145_v26, %v2379_v32 }
 0x398   : > { %v2310_v30 = vpop.f32.mrf.mxu1 }
 0x399   : > { %v2444_v3 = vmax.f32 %v2412_v41, 0.0  ;;  %v2413_v7 = vadd.f32 %v4145_v26, %v2377_v56  ;;  %v2447_v16 = vmax.f32 %v2415_v40, 0.0  ;;  %v2382_v23 = vadd.f32 %v2310_v30, %v4002_v51  ;;  %v3038_v41 = vld [vmem:[%s3159_s21 + $0xd0] sm:$0xff]  ;;  %v3039_v56 = vld [vmem:[%s3159_s21 + $0xd8] sm:$0xff] }
 0x39a   : > { %2957 = vmatmul.msk.f32.gmra.mxu3 %vm387_vm1, %v3037_v46 }
 0x39b   : > { %v2418_v37 = vadd.f32 %v4145_v26, %v2382_v23 }
 0x39d   : > { %v2450_v1 = vmax.f32 %v2418_v37, 0.0 }
 0x39e   : > { %2509 = vmatmul.f32.gmra.mxu2 %v2439_v44  ;;  %v2445_v44 = vmax.f32 %v2413_v7, 0.0 }
 0x3a0   : > { %v2313_v47 = vpop.f32.mrf.mxu1 }
 0x3a6   : > { %2512 = vmatmul.f32.gmra.mxu2 %v2440_v20  ;;  %v2416_v20 = vadd.f32 %v4145_v26, %v2380_v24 }
 0x3a8   : > { %v2316_v22 = vpop.f32.mrf.mxu1  ;;  %v2448_v9 = vmax.f32 %v2416_v20, 0.0  ;;  %v2632_v20 = vadd.f32 %v4200_v18, %v2631_v50 }
 0x3a9   : > { %v2384_v57 = vadd.f32 %v2316_v22, %v4027_v49 }
 0x3ae   : > { %2515 = vmatmul.f32.gmra.mxu2 %v2441_v31  ;;  %v2383_v31 = vadd.f32 %v2313_v47, %v4016_v63 }
 0x3b0   : > { %v2319_v54 = vpop.f32.mrf.mxu1  ;;  %v2419_v11 = vadd.f32 %v4145_v26, %v2383_v31 }
 0x3b1   : > { %v2385_v14 = vadd.f32 %v2319_v54, %v4040_v8 }
 0x3b2   : > { %v2451_v48 = vmax.f32 %v2419_v11, 0.0 }
 0x3b3   : > { %v2421_v33 = vadd.f32 %v4145_v26, %v2385_v14 }
 0x3b5   : > { %v2453_v49 = vmax.f32 %v2421_v33, 0.0 }
 0x3b6   : > { %2518 = vmatmul.f32.gmra.mxu2 %v2442_v52  ;;  %v2420_v52 = vadd.f32 %v4145_v26, %v2384_v57 }
 0x3b8   : > { %v2322_v2 = vpop.f32.mrf.mxu1  ;;  %v2452_v63 = vmax.f32 %v2420_v52, 0.0 }
 0x3b9   : > { %v2386_v13 = vadd.f32 %v2322_v2, %v4048_v12  ;;  %v4205_v12 = vld [vmem:[%s4356_s6] ss:$0 sm:$0xff] }
 0x3bb   : > { %v2422_v53 = vadd.f32 %v4145_v26, %v2386_v13 }
 0x3be   : > { %2521 = vmatmul.f32.gmra.mxu2 %v2443_v10  ;;  %v2634_v10 = vpop.f32.mrf.mxu3  ;;  %2958 = vmatmul.msk.f32.gmra.mxu3 %vm387_vm1, %v3038_v41 }
 0x3bf   : > { %v2635_v31 = vadd.f32 %v4200_v18, %v2634_v10 }
 0x3c0   : > { %v2325_v45 = vpop.f32.mrf.mxu1 }
 0x3c1   : > { %v2387_v7 = vadd.f32 %v2325_v45, %v4057_v4  ;;  %v3040_v4 = vld [vmem:[%s3159_s21 + $0xe0] sm:$0xff] }
 0x3c3   : > { %v2423_v55 = vadd.f32 %v4145_v26, %v2387_v7 }
 0x3c6   : > { %2524 = vmatmul.f32.gmra.mxu2 %v2444_v3  ;;  %v2637_v30 = vpop.f32.mrf.mxu3  ;;  %2959 = vmatmul.msk.f32.gmra.mxu3 %vm387_vm1, %v3039_v56  ;;  %v2454_v3 = vmax.f32 %v2422_v53, 0.0 }
 0x3c7   : > { %v2638_v50 = vadd.f32 %v4200_v18, %v2637_v30 }
 0x3c8   : > { %v2328_v51 = vpop.f32.mrf.mxu1 }
 0x3c9   : > { %v2388_v32 = vadd.f32 %v2328_v51, %v4063_v60 }
 0x3cb   : > { %v2424_v24 = vadd.f32 %v4145_v26, %v2388_v32 }
 0x3cd   : > { %v2456_v27 = vmax.f32 %v2424_v24, 0.0 }
 0x3ce   : > { %2527 = vmatmul.f32.gmra.mxu2 %v2445_v44  ;;  %v2640_v17 = vpop.f32.mrf.mxu3  ;;  %2960 = vmatmul.msk.f32.gmra.mxu3 %vm387_vm1, %v3040_v4 }
 0x3cf   : > { %v2641_v53 = vadd.f32 %v4200_v18, %v2640_v17 }
 0x3d0   : > { %v2331_v39 = vpop.f32.mrf.mxu1 }
 0x3d1   : > { %v2389_v2 = vadd.f32 %v2331_v39, %v4072_v43  ;;  %v3043_v39 = vld [vmem:[%s3159_s21 + $0xf8] sm:$0xff] }
 0x3d6   : > { %2530 = vmatmul.f32.gmra.mxu2 %v2446_v38  ;;  %v2455_v38 = vmax.f32 %v2423_v55, 0.0 }
 0x3d8   : > { %v2334_v8 = vpop.f32.mrf.mxu1 }
 0x3d9   : > { %v2390_v43 = vadd.f32 %v2334_v8, %v4078_v62 }
 0x3db   : > { %v2426_v52 = vadd.f32 %v4145_v26, %v2390_v43 }
 0x3dd   : > { %v2458_v10 = vmax.f32 %v2426_v52, 0.0 }
 0x3de   : > { %2533 = vmatmul.f32.gmra.mxu2 %v2447_v16 }
 0x3e0   : > { %v2337_v40 = vpop.f32.mrf.mxu1 }
 0x3e1   : > { %v2391_v62 = vadd.f32 %v2337_v40, %v4087_v0 }
 0x3e3   : > { %v2427_v13 = vadd.f32 %v4145_v26, %v2391_v62 }
 0x3e5   : > { %v2459_v7 = vmax.f32 %v2427_v13, 0.0 }
 0x3e6   : > { %2536 = vmatmul.f32.gmra.mxu2 %v2448_v9  ;;  %v2643_v9 = vpop.f32.mrf.mxu3  ;;  %2961 = vmatmul.msk.f32.gmra.mxu3 %vm387_vm1, %v3041_v35 }
 0x3e8   : > { %v2340_v37 = vpop.f32.mrf.mxu1 }
 0x3e9   : > { %v2392_v55 = vadd.f32 %v2340_v37, %v4093_v58 }
 0x3ee   : > { %2539 = vmatmul.f32.gmra.mxu2 %v2449_v21  ;;  %v2646_v42 = vpop.f32.mrf.mxu3  ;;  %2962 = vmatmul.msk.f32.gmra.mxu3 %vm387_vm1, %v3042_v6 }
 0x3f0   : > { %v2343_v46 = vpop.f32.mrf.mxu1 }
 0x3f6   : > { %2542 = vmatmul.f32.gmra.mxu2 %v2450_v1  ;;  %v2425_v1 = vadd.f32 %v4145_v26, %v2389_v2  ;;  %v2649_v33 = vpop.f32.mrf.mxu3  ;;  %2963 = vmatmul.msk.f32.gmra.mxu3 %vm387_vm1, %v3043_v39 }
 0x3f7   : > { %v2650_v37 = vadd.f32 %v4200_v18, %v2649_v33 }
 0x3fe   : > { %2545 = vmatmul.f32.gmra.mxu2 %v2451_v48  ;;  %v2457_v48 = vmax.f32 %v2425_v1, 0.0  ;;  %v2652_v8 = vpop.f32.mrf.mxu3 }
 0x3ff   : > { %v2653_v43 = vadd.f32 %v4200_v18, %v2652_v8 }
 0x406   : > { %2548 = vmatmul.f32.gmra.mxu2 %v2452_v63 }
 0x40e   : > { %2551 = vmatmul.f32.gmra.mxu2 %v2453_v49 }
 0x416   : > { %2554 = vmatmul.f32.gmra.mxu2 %v2454_v3  ;;  %v2346_v3 = vpop.f32.mrf.mxu1 }
 0x419   : > { %v2507_v44 = vpop.f32.mrf.mxu2 }
 0x41a   : > { %v2508_v47 = vadd.f32 %v4205_v12, %v2507_v44  ;;  %v2428_v44 = vadd.f32 %v4145_v26, %v2392_v55 }
 0x41c   : > { %v2724_v22 = vadd.f32 %v2629_v59, %v2508_v47  ;;  %v2644_v47 = vadd.f32 %v4200_v18, %v2643_v9  ;;  %v2460_v32 = vmax.f32 %v2428_v44, 0.0 }
 0x41e   : > { %v2756_v16 = vmax.f32 %v2724_v22, 0.0  ;;  %2557 = vmatmul.f32.gmra.mxu2 %v2455_v38  ;;  %v2655_v38 = vpop.f32.mrf.mxu3  ;;  %v2393_v22 = vadd.f32 %v2343_v46, %v4102_v36 }
 0x41f   : > { %v2656_v39 = vadd.f32 %v4200_v18, %v2655_v38 }
 0x420   : > { %2788 = vst [vmem:[%s4218_s17] sm:$0xff] %v2756_v16  ;;  %v2349_v16 = vpop.f32.mrf.mxu1  ;;  %v2429_v24 = vadd.f32 %v4145_v26, %v2393_v22 }
 0x421   : > { %v2510_v54 = vpop.f32.mrf.mxu2 }
 0x422   : > { %v2511_v60 = vadd.f32 %v4205_v12, %v2510_v54  ;;  %v2461_v35 = vmax.f32 %v2429_v24, 0.0 }
 0x424   : > { %v2725_v21 = vadd.f32 %v2632_v20, %v2511_v60  ;;  %v2647_v20 = vadd.f32 %v4200_v18, %v2646_v42  ;;  %v2395_v42 = vadd.f32 %v2349_v16, %v4114_v19 }
 0x426   : > { %v2757_v23 = vmax.f32 %v2725_v21, 0.0  ;;  %2560 = vmatmul.f32.gmra.mxu2 %v2456_v27  ;;  %v2658_v9 = vpop.f32.mrf.mxu3  ;;  %v2394_v27 = vadd.f32 %v2346_v3, %v4108_v28 }
 0x427   : > { %v2659_v8 = vadd.f32 %v4200_v18, %v2658_v9 }
 0x428   : > { %2789 = vst [vmem:[%s4218_s17 + $0x8] sm:$0xff] %v2757_v23  ;;  %v2352_v21 = vpop.f32.mrf.mxu1  ;;  %v2430_v23 = vadd.f32 %v4145_v26, %v2394_v27 }
 0x429   : > { %v2513_v45 = vpop.f32.mrf.mxu2 }
 0x42a   : > { %v2514_v11 = vadd.f32 %v4205_v12, %v2513_v45 }
 0x42c   : > { %v2726_v57 = vadd.f32 %v2635_v31, %v2514_v11  ;;  %v2462_v11 = vmax.f32 %v2430_v23, 0.0 }
 0x42e   : > { %v2758_v51 = vmax.f32 %v2726_v57, 0.0  ;;  %2563 = vmatmul.f32.gmra.mxu2 %v2457_v48  ;;  %v2661_v45 = vpop.f32.mrf.mxu3  ;;  %v2431_v48 = vadd.f32 %v4145_v26, %v2395_v42 }
 0x430   : > { %2790 = vst [vmem:[%s4218_s17 + $0x10] sm:$0xff] %v2758_v51  ;;  %v2355_v57 = vpop.f32.mrf.mxu1  ;;  %v2463_v46 = vmax.f32 %v2431_v48, 0.0 }
 0x431   : > { %v2516_v63 = vpop.f32.mrf.mxu2 }
 0x432   : > { %v2517_v14 = vadd.f32 %v4205_v12, %v2516_v63  ;;  %v2396_v63 = vadd.f32 %v2352_v21, %v4118_v15 }
 0x434   : > { %v2727_v41 = vadd.f32 %v2638_v50, %v2517_v14  ;;  %v2432_v33 = vadd.f32 %v4145_v26, %v2396_v63 }
 0x436   : > { %v2759_v49 = vmax.f32 %v2727_v41, 0.0  ;;  %2566 = vmatmul.f32.gmra.mxu2 %v2458_v10  ;;  %v2664_v50 = vpop.f32.mrf.mxu3  ;;  %v2464_v13 = vmax.f32 %v2432_v33, 0.0 }
 0x438   : > { %2791 = vst [vmem:[%s4218_s17 + $0x18] sm:$0xff] %v2759_v49  ;;  %v2358_v49 = vpop.f32.mrf.mxu1 }
 0x439   : > { %v2519_v30 = vpop.f32.mrf.mxu2 }
 0x43a   : > { %v2520_v56 = vadd.f32 %v4205_v12, %v2519_v30 }
 0x43c   : > { %v2728_v59 = vadd.f32 %v2641_v53, %v2520_v56  ;;  %v2397_v53 = vadd.f32 %v2355_v57, %v4125_v25 }
 0x43e   : > { %v2760_v0 = vmax.f32 %v2728_v59, 0.0  ;;  %2569 = vmatmul.f32.gmra.mxu2 %v2459_v7  ;;  %v2667_v41 = vpop.f32.mrf.mxu3  ;;  %v2433_v56 = vadd.f32 %v4145_v26, %v2397_v53 }
 0x43f   : > { %v2668_v23 = vadd.f32 %v4200_v18, %v2667_v41 }
 0x440   : > { %2792 = vst [vmem:[%s4218_s17 + $0x20] sm:$0xff] %v2760_v0  ;;  %v2465_v59 = vmax.f32 %v2433_v56, 0.0  ;;  %v2398_v0 = vadd.f32 %v2358_v49, %v4128_v34 }
 0x441   : > { %v2522_v4 = vpop.f32.mrf.mxu2 }
 0x442   : > { %v2523_v17 = vadd.f32 %v4205_v12, %v2522_v4  ;;  %v2434_v4 = vadd.f32 %v4145_v26, %v2398_v0 }
 0x444   : > { %v2729_v40 = vadd.f32 %v2644_v47, %v2523_v17  ;;  %v2361_v47 = vpop.f32.mrf.mxu1  ;;  %v2662_v17 = vadd.f32 %v4200_v18, %v2661_v45 }
 0x445   : > { %v2399_v16 = vadd.f32 %v2361_v47, %v4131_v5 }
 0x446   : > { %v2761_v58 = vmax.f32 %v2729_v40, 0.0  ;;  %2572 = vmatmul.f32.gmra.mxu2 %v2460_v32  ;;  %v2670_v55 = vpop.f32.mrf.mxu3  ;;  %v2466_v40 = vmax.f32 %v2434_v4, 0.0 }
 0x447   : > { %v2671_v48 = vadd.f32 %v4200_v18, %v2670_v55 }
 0x448   : > { %2793 = vst [vmem:[%s4218_s17 + $0x28] sm:$0xff] %v2761_v58 }
 0x449   : > { %v2525_v54 = vpop.f32.mrf.mxu2 }
 0x44a   : > { %v2526_v60 = vadd.f32 %v4205_v12, %v2525_v54  ;;  %v2665_v54 = vadd.f32 %v4200_v18, %v2664_v50 }
 0x44c   : > { %v2730_v2 = vadd.f32 %v2647_v20, %v2526_v60  ;;  %v2364_v24 = vpop.f32.mrf.mxu1  ;;  %v2435_v20 = vadd.f32 %v4145_v26, %v2399_v16 }
 0x44e   : > { %v2762_v36 = vmax.f32 %v2730_v2, 0.0  ;;  %2575 = vmatmul.f32.gmra.mxu2 %v2461_v35  ;;  %v2673_v22 = vpop.f32.mrf.mxu3  ;;  %v2467_v27 = vmax.f32 %v2435_v20, 0.0  ;;  %v2400_v2 = vadd.f32 %v2364_v24, %v4136_v29 }
 0x450   : > { %2794 = vst [vmem:[%s4218_s17 + $0x30] sm:$0xff] %v2762_v36  ;;  %v2436_v21 = vadd.f32 %v4145_v26, %v2400_v2 }
 0x451   : > { %v2528_v1 = vpop.f32.mrf.mxu2 }
 0x452   : > { %v2529_v31 = vadd.f32 %v4205_v12, %v2528_v1 }
 0x454   : > { %v2731_v6 = vadd.f32 %v2650_v37, %v2529_v31  ;;  %v2367_v37 = vpop.f32.mrf.mxu1 }
 0x455   : > { %v2401_v42 = vadd.f32 %v2367_v37, %v4138_v61  ;;  %v2674_v61 = vadd.f32 %v4200_v18, %v2673_v22 }
 0x456   : > { %v2763_v28 = vmax.f32 %v2731_v6, 0.0  ;;  %2578 = vmatmul.f32.gmra.mxu2 %v2462_v11  ;;  %v2676_v35 = vpop.f32.mrf.mxu3  ;;  %v2468_v11 = vmax.f32 %v2436_v21, 0.0 }
 0x458   : > { %2795 = vst [vmem:[%s4218_s17 + $0x38] sm:$0xff] %v2763_v28  ;;  %v2437_v28 = vadd.f32 %v4145_v26, %v2401_v42 }
 0x459   : > { %v2531_v51 = vpop.f32.mrf.mxu2 }
 0x45a   : > { %v2532_v52 = vadd.f32 %v4205_v12, %v2531_v51 }
 0x45c   : > { %v2732_v14 = vadd.f32 %v2653_v43, %v2532_v52  ;;  %v2469_v52 = vmax.f32 %v2437_v28, 0.0 }
 0x45e   : > { %v2764_v19 = vmax.f32 %v2732_v14, 0.0  ;;  %2581 = vmatmul.f32.gmra.mxu2 %v2463_v46  ;;  %v2679_v45 = vpop.f32.mrf.mxu3 }
 0x45f   : > { %v2680_v53 = vadd.f32 %v4200_v18, %v2679_v45 }
 0x460   : > { %2796 = vst [vmem:[%s4218_s17 + $0x40] sm:$0xff] %v2764_v19 }
 0x461   : > { %v2534_v10 = vpop.f32.mrf.mxu2 }
 0x462   : > { %v2535_v62 = vadd.f32 %v4205_v12, %v2534_v10 }
 0x464   : > { %v2733_v30 = vadd.f32 %v2656_v39, %v2535_v62  ;;  %v2677_v39 = vadd.f32 %v4200_v18, %v2676_v35 }
 0x466   : > { %v2765_v15 = vmax.f32 %v2733_v30, 0.0  ;;  %2584 = vmatmul.f32.gmra.mxu2 %v2464_v13  ;;  %v2682_v51 = vpop.f32.mrf.mxu3 }
 0x468   : > { %2797 = vst [vmem:[%s4218_s17 + $0x48] sm:$0xff] %v2765_v15 }
 0x469   : > { %v2537_v3 = vpop.f32.mrf.mxu2 }
 0x46a   : > { %v2538_v7 = vadd.f32 %v4205_v12, %v2537_v3  ;;  %v2683_v3 = vadd.f32 %v4200_v18, %v2682_v51 }
 0x46c   : > { %v2734_v44 = vadd.f32 %v2659_v8, %v2538_v7 }
 0x46e   : > { %v2766_v25 = vmax.f32 %v2734_v44, 0.0  ;;  %2587 = vmatmul.f32.gmra.mxu2 %v2465_v59  ;;  %v2685_v19 = vpop.f32.mrf.mxu3 }
 0x46f   : > { %v2686_v47 = vadd.f32 %v4200_v18, %v2685_v19 }
 0x470   : > { %2798 = vst [vmem:[%s4218_s17 + $0x50] sm:$0xff] %v2766_v25 }
 0x471   : > { %v2540_v38 = vpop.f32.mrf.mxu2 }
 0x472   : > { %v2541_v32 = vadd.f32 %v4205_v12, %v2540_v38 }
 0x474   : > { %v2735_v58 = vadd.f32 %v2662_v17, %v2541_v32 }
 0x476   : > { %v2767_v34 = vmax.f32 %v2735_v58, 0.0  ;;  %2590 = vmatmul.f32.gmra.mxu2 %v2466_v40  ;;  %v2688_v13 = vpop.f32.mrf.mxu3 }
 0x477   : > { %v2689_v22 = vadd.f32 %v4200_v18, %v2688_v13 }
 0x478   : > { %2799 = vst [vmem:[%s4218_s17 + $0x58] sm:$0xff] %v2767_v34 }
 0x479   : > { %v2543_v60 = vpop.f32.mrf.mxu2 }
 0x47a   : > { %v2544_v9 = vadd.f32 %v4205_v12, %v2543_v60 }
 0x47c   : > { %v2736_v36 = vadd.f32 %v2665_v54, %v2544_v9 }
 0x47e   : > { %v2768_v5 = vmax.f32 %v2736_v36, 0.0  ;;  %2593 = vmatmul.f32.gmra.mxu2 %v2467_v27  ;;  %v2691_v55 = vpop.f32.mrf.mxu3 }
 0x47f   : > { %v2692_v20 = vadd.f32 %v4200_v18, %v2691_v55 }
 0x480   : > { %2800 = vst [vmem:[%s4218_s17 + $0x60] sm:$0xff] %v2768_v5 }
 0x481   : > { %v2546_v1 = vpop.f32.mrf.mxu2 }
 0x482   : > { %v2547_v31 = vadd.f32 %v4205_v12, %v2546_v1 }
 0x484   : > { %v2737_v6 = vadd.f32 %v2668_v23, %v2547_v31 }
 0x486   : > { %v2769_v29 = vmax.f32 %v2737_v6, 0.0  ;;  %2596 = vmatmul.f32.gmra.mxu2 %v2468_v11  ;;  %v2694_v17 = vpop.f32.mrf.mxu3 }
 0x487   : > { %v2695_v2 = vadd.f32 %v4200_v18, %v2694_v17 }
 0x488   : > { %2801 = vst [vmem:[%s4218_s17 + $0x68] sm:$0xff] %v2769_v29 }
 0x489   : > { %v2549_v43 = vpop.f32.mrf.mxu2 }
 0x48a   : > { %v2550_v57 = vadd.f32 %v4205_v12, %v2549_v43 }
 0x48c   : > { %v2738_v50 = vadd.f32 %v2671_v48, %v2550_v57 }
 0x48e   : > { %v2770_v46 = vmax.f32 %v2738_v50, 0.0  ;;  %2599 = vmatmul.f32.gmra.mxu2 %v2469_v52  ;;  %v2697_v34 = vpop.f32.mrf.mxu3 }
 0x48f   : > { %v2698_v37 = vadd.f32 %v4200_v18, %v2697_v34 }
 0x490   : > { %2802 = vst [vmem:[%s4218_s17 + $0x70] sm:$0xff] %v2770_v46 }
 0x491   : > { %v2552_v63 = vpop.f32.mrf.mxu2 }
 0x492   : > { %v2553_v14 = vadd.f32 %v4205_v12, %v2552_v63 }
 0x494   : > { %v2739_v26 = vadd.f32 %v2674_v61, %v2553_v14 }
 0x496   : > { %v2771_v33 = vmax.f32 %v2739_v26, 0.0  ;;  %v2700_v27 = vpop.f32.mrf.mxu3 }
 0x497   : > { %v2701_v6 = vadd.f32 %v4200_v18, %v2700_v27 }
 0x498   : > { %2803 = vst [vmem:[%s4218_s17 + $0x78] sm:$0xff] %v2771_v33 }
 0x499   : > { %v2555_v10 = vpop.f32.mrf.mxu2 }
 0x49a   : > { %v2556_v62 = vadd.f32 %v4205_v12, %v2555_v10 }
 0x49c   : > { %v2740_v41 = vadd.f32 %v2677_v39, %v2556_v62 }
 0x49e   : > { %v2772_v49 = vmax.f32 %v2740_v41, 0.0  ;;  %v2703_v31 = vpop.f32.mrf.mxu3 }
 0x49f   : > { %v2704_v51 = vadd.f32 %v4200_v18, %v2703_v31 }
 0x4a0   : > { %2804 = vst [vmem:[%s4218_s17 + $0x80] sm:$0xff] %v2772_v49 }
 0x4a1   : > { %v2558_v30 = vpop.f32.mrf.mxu2 }
 0x4a2   : > { %v2559_v15 = vadd.f32 %v4205_v12, %v2558_v30 }
 0x4a4   : > { %v2741_v56 = vadd.f32 %v2680_v53, %v2559_v15 }
 0x4a6   : > { %v2773_v8 = vmax.f32 %v2741_v56, 0.0  ;;  %v2706_v48 = vpop.f32.mrf.mxu3 }
 0x4a7   : > { %v2707_v14 = vadd.f32 %v4200_v18, %v2706_v48 }
 0x4a8   : > { %2805 = vst [vmem:[%s4218_s17 + $0x88] sm:$0xff] %v2773_v8 }
 0x4a9   : > { %v2561_v7 = vpop.f32.mrf.mxu2 }
 0x4aa   : > { %v2562_v59 = vadd.f32 %v4205_v12, %v2561_v7 }
 0x4ac   : > { %v2742_v0 = vadd.f32 %v2683_v3, %v2562_v59 }
 0x4ae   : > { %v2774_v44 = vmax.f32 %v2742_v0, 0.0  ;;  %v2709_v61 = vpop.f32.mrf.mxu3 }
 0x4af   : > { %v2710_v62 = vadd.f32 %v4200_v18, %v2709_v61 }
 0x4b0   : > { %2806 = vst [vmem:[%s4218_s17 + $0x90] sm:$0xff] %v2774_v44 }
 0x4b1   : > { %v2564_v25 = vpop.f32.mrf.mxu2 }
 0x4b2   : > { %v2565_v4 = vadd.f32 %v4205_v12, %v2564_v25 }
 0x4b4   : > { %v2743_v38 = vadd.f32 %v2686_v47, %v2565_v4 }
 0x4b6   : > { %v2775_v32 = vmax.f32 %v2743_v38, 0.0  ;;  %v2712_v10 = vpop.f32.mrf.mxu3 }
 0x4b7   : > { %v2713_v30 = vadd.f32 %v4200_v18, %v2712_v10 }
 0x4b8   : > { %2807 = vst [vmem:[%s4218_s17 + $0x98] sm:$0xff] %v2775_v32 }
 0x4b9   : > { %v2567_v40 = vpop.f32.mrf.mxu2 }
 0x4ba   : > { %v2568_v16 = vadd.f32 %v4205_v12, %v2567_v40 }
 0x4bc   : > { %v2744_v58 = vadd.f32 %v2689_v22, %v2568_v16 }
 0x4be   : > { %v2776_v24 = vmax.f32 %v2744_v58, 0.0  ;;  %v2715_v56 = vpop.f32.mrf.mxu3 }
 0x4bf   : > { %v2716_v55 = vadd.f32 %v4200_v18, %v2715_v56 }
 0x4c0   : > { %2808 = vst [vmem:[%s4218_s17 + $0xa0] sm:$0xff] %v2776_v24 }
 0x4c1   : > { %v2570_v54 = vpop.f32.mrf.mxu2 }
 0x4c2   : > { %v2571_v60 = vadd.f32 %v4205_v12, %v2570_v54 }
 0x4c4   : > { %v2745_v9 = vadd.f32 %v2692_v20, %v2571_v60 }
 0x4c6   : > { %v2777_v35 = vmax.f32 %v2745_v9, 0.0  ;;  %v2718_v44 = vpop.f32.mrf.mxu3 }
 0x4c7   : > { %v2719_v4 = vadd.f32 %v4200_v18, %v2718_v44 }
 0x4c8   : > { %2809 = vst [vmem:[%s4218_s17 + $0xa8] sm:$0xff] %v2777_v35 }
 0x4c9   : > { %v2573_v36 = vpop.f32.mrf.mxu2 }
 0x4ca   : > { %v2574_v5 = vadd.f32 %v4205_v12, %v2573_v36 }
 0x4cc   : > { %v2746_v21 = vadd.f32 %v2695_v2, %v2574_v5 }
 0x4ce   : > { %v2778_v23 = vmax.f32 %v2746_v21, 0.0  ;;  %v2721_v22 = vpop.f32.mrf.mxu3 }
 0x4cf   : > { %v2722_v16 = vadd.f32 %v4200_v18, %v2721_v22 }
 0x4d0   : > { %2810 = vst [vmem:[%s4218_s17 + $0xb0] sm:$0xff] %v2778_v23 }
 0x4d1   : > { %v2576_v1 = vpop.f32.mrf.mxu2 }
 0x4d2   : > { %v2577_v45 = vadd.f32 %v4205_v12, %v2576_v1 }
 0x4d4   : > { %v2747_v11 = vadd.f32 %v2698_v37, %v2577_v45 }
 0x4d6   : > { %v2779_v42 = vmax.f32 %v2747_v11, 0.0 }
 0x4d8   : > { %2811 = vst [vmem:[%s4218_s17 + $0xb8] sm:$0xff] %v2779_v42 }
 0x4d9   : > { %v2579_v29 = vpop.f32.mrf.mxu2 }
 0x4da   : > { %v2580_v28 = vadd.f32 %v4205_v12, %v2579_v29 }
 0x4dc   : > { %v2748_v43 = vadd.f32 %v2701_v6, %v2580_v28 }
 0x4de   : > { %v2780_v57 = vmax.f32 %v2748_v43, 0.0 }
 0x4e0   : > { %2812 = vst [vmem:[%s4218_s17 + $0xc0] sm:$0xff] %v2780_v57 }
 0x4e1   : > { %v2582_v52 = vpop.f32.mrf.mxu2 }
 0x4e2   : > { %v2583_v50 = vadd.f32 %v4205_v12, %v2582_v52 }
 0x4e4   : > { %v2749_v46 = vadd.f32 %v2704_v51, %v2583_v50 }
 0x4e6   : > { %v2781_v63 = vmax.f32 %v2749_v46, 0.0 }
 0x4e8   : > { %2813 = vst [vmem:[%s4218_s17 + $0xc8] sm:$0xff] %v2781_v63 }
 0x4e9   : > { %v2585_v26 = vpop.f32.mrf.mxu2 }
 0x4ea   : > { %v2586_v19 = vadd.f32 %v4205_v12, %v2585_v26 }
 0x4ec   : > { %v2750_v33 = vadd.f32 %v2707_v14, %v2586_v19 }
 0x4ee   : > { %v2782_v39 = vmax.f32 %v2750_v33, 0.0 }
 0x4f0   : > { %2814 = vst [vmem:[%s4218_s17 + $0xd0] sm:$0xff] %v2782_v39 }
 0x4f1   : > { %v2588_v41 = vpop.f32.mrf.mxu2 }
 0x4f2   : > { %v2589_v49 = vadd.f32 %v4205_v12, %v2588_v41 }
 0x4f4   : > { %v2751_v13 = vadd.f32 %v2710_v62, %v2589_v49 }
 0x4f6   : > { %v2783_v53 = vmax.f32 %v2751_v13, 0.0 }
 0x4f8   : > { %2815 = vst [vmem:[%s4218_s17 + $0xd8] sm:$0xff] %v2783_v53 }
 0x4f9   : > { %v2591_v15 = vpop.f32.mrf.mxu2 }
 0x4fa   : > { %v2592_v8 = vadd.f32 %v4205_v12, %v2591_v15 }
 0x4fc   : > { %v2752_v3 = vadd.f32 %v2713_v30, %v2592_v8 }
 0x4fe   : > { %v2784_v7 = vmax.f32 %v2752_v3, 0.0 }
 0x500   : > { %2816 = vst [vmem:[%s4218_s17 + $0xe0] sm:$0xff] %v2784_v7 }
 0x501   : > { %v2594_v59 = vpop.f32.mrf.mxu2 }
 0x502   : > { %v2595_v0 = vadd.f32 %v4205_v12, %v2594_v59 }
 0x504   : > { %v2753_v47 = vadd.f32 %v2716_v55, %v2595_v0 }
 0x506   : > { %v2785_v25 = vmax.f32 %v2753_v47, 0.0 }
 0x508   : > { %2817 = vst [vmem:[%s4218_s17 + $0xe8] sm:$0xff] %v2785_v25 }
 0x509   : > { %v2597_v17 = vpop.f32.mrf.mxu2 }
 0x50a   : > { %v2598_v38 = vadd.f32 %v4205_v12, %v2597_v17 }
 0x50c   : > { %v2754_v32 = vadd.f32 %v2719_v4, %v2598_v38 }
 0x50e   : > { %v2786_v40 = vmax.f32 %v2754_v32, 0.0 }
 0x510   : > { %2818 = vst [vmem:[%s4218_s17 + $0xf0] sm:$0xff] %v2786_v40 }
 0x511   : > { %v2600_v58 = vpop.f32.mrf.mxu2 }
 0x512   : > { %v2601_v34 = vadd.f32 %v4205_v12, %v2600_v58 }
 0x514   : > { %v2755_v24 = vadd.f32 %v2722_v16, %v2601_v34 }
 0x516   : > { %v2787_v20 = vmax.f32 %v2755_v24, 0.0 }
 0x518   : > { %2819 = vst [vmem:[%s4218_s17 + $0xf8] sm:$0xff] %v2787_v20 }
 0x519 PF: > { %s20_s30 = sadd.s32 1, %s3084_s30  }
 0x51a   : > { %p17_p7 = scmp.ge.s32.totalorder %s20_s30, 4  }
 0x51c   :  { %19 = sbr.rel (!%p17_p7) target bundleno = 1 (0x1), region = 101 }
 0x521   :  { %2841 = vsyncpa [#allocation4], 1 }
 0x522   :  { %2843 = vsyncpa [#allocation4 + $0x1], 1 }

</bundles_post_ra>
